<compile_context>
chip_gen: v5e
topology: v5e:2x2
jax: 0.10.0
libtpu: 0.0.40
codegen_flags: <defaults>
</compile_context>

<pallas_src>
import jax
import jax.numpy as jnp
from jax import lax
from jax.experimental import pallas as pl
from jax.experimental.pallas import tpu as pltpu

# ----------------------------- config ---------------------------------------
N_ITEMS = 256      # config['item_num']
HIDDEN = 128       # config['hidden_size']
NUM_LAYERS = 2     # config['num_layers']  (>= 2 assumed by the fused layer-1 path)
BATCH = 8
SEQ_LEN = 8


# --------------------------- Pallas kernel -----------------------------------
def gru4rec_kernel(seq_ref, len_ref, emb_proj_ref, w_hh0_ref, b_hh0_ref,
                   fused_rhs_ref, fused_b_ref, whh_n_ref, bhh_n_ref,
                   dense_w_ref, dense_b_ref, emb_t_ref, out_ref, gi0_ref):
    """Fused embedding+GRU recurrence + last-state gather + dense/relu/emb^T head."""
    L, B, H, N = SEQ_LEN, BATCH, HIDDEN, N_ITEMS
    H2, H3 = 2 * H, 3 * H

    # --- fused embedding lookup + layer-0 input projection (one MXU matmul) ---
    # gi0[t*B+b] = emb_proj[seq[b,t]]  with  emb_proj = emb @ W_ih0^T + b_ih0
    ids = seq_ref[...]                                        # (L*B, 1) int32, time-major
    iota = lax.broadcasted_iota(jnp.int32, (L * B, N), 1)
    onehot = (iota == ids).astype(jnp.bfloat16)               # (L*B, N)
    gi0_ref[...] = jnp.dot(onehot, emb_proj_ref[...],
                           preferred_element_type=jnp.float32)  # (L*B, 3H) f32 scratch

    tgt = len_ref[...] - 1                                    # (B, 1) int32 gather index
    # NOTE: assumes 1 <= seq_length <= SEQ_LEN (matches the data generator).

    def gate_math(pre_r, pre_z, gi_n, gh_n, h_prev):
        # All elementwise gate math in f32 (v5e-safe); PyTorch gate order (r, z, n).
        r = jax.nn.sigmoid(pre_r)
        z = jax.nn.sigmoid(pre_z)
        n = jnp.tanh(gi_n + r * gh_n)
        return (1.0 - z) * n + z * h_prev

    h = [jnp.zeros((B, H), jnp.float32) for _ in range(NUM_LAYERS)]
    sel = jnp.zeros((B, H), jnp.float32)

    for t in range(L):                                        # static, fully unrolled (L=8)
        # ---- layer 0: gi precomputed (bias folded); only the recurrent matmul here.
        gi = gi0_ref[pl.ds(t * B, B), :]                      # (B, 3H) f32
        gh = jnp.dot(h[0].astype(jnp.bfloat16), w_hh0_ref[...],
                     preferred_element_type=jnp.float32) + b_hh0_ref[...]
        h[0] = gate_math(gi[:, :H] + gh[:, :H],
                         gi[:, H:H2] + gh[:, H:H2],
                         gi[:, H2:], gh[:, H2:], h[0])
        inp = h[0]

        # ---- layers >= 1: one fused K=2H matmul (r,z pre-acts + gi_n) + small gh_n matmul.
        for l in range(1, NUM_LAYERS):
            j = l - 1
            h_prev_bf = h[l].astype(jnp.bfloat16)
            gh_n = jnp.dot(h_prev_bf, whh_n_ref[j],
                           preferred_element_type=jnp.float32) + bhh_n_ref[j]
            lhs = jnp.concatenate([inp.astype(jnp.bfloat16), h_prev_bf], axis=1)  # (B, 2H)
            fused = jnp.dot(lhs, fused_rhs_ref[j],
                            preferred_element_type=jnp.float32) + fused_b_ref[j]  # (B, 3H)
            h[l] = gate_math(fused[:, :H], fused[:, H:H2], fused[:, H2:], gh_n, h[l])
            inp = h[l]

        # gather_indexes fused: keep the top-layer state where t == seq_length - 1
        sel = jnp.where(tgt == t, inp, sel)

    # ---- head: relu(sel @ W_dense^T + b) @ emb^T (RHS pre-transposed, bf16 operands)
    d = jnp.dot(sel.astype(jnp.bfloat16), dense_w_ref[...],
                preferred_element_type=jnp.float32) + dense_b_ref[...]
    d = jnp.maximum(d, 0.0)
    out_ref[...] = jnp.dot(d.astype(jnp.bfloat16), emb_t_ref[...],
                           preferred_element_type=jnp.float32).astype(out_ref.dtype)


# ------------------------------ wrapper ---------------------------------------
def run_fused(seq_col, seq_len2d, prep):
    LB = SEQ_LEN * BATCH
    H, N, H3 = HIDDEN, N_ITEMS, 3 * HIDDEN
    NL1 = NUM_LAYERS - 1

    def full(shape):
        return pl.BlockSpec(shape, lambda i, _s=shape: (0,) * len(_s))

    return pl.pallas_call(
        gru4rec_kernel,
        out_shape=jax.ShapeDtypeStruct((BATCH, N), jnp.float32),
        grid=(1,),
        in_specs=[
            full((LB, 1)),            # seq ids, time-major flattened
            full((BATCH, 1)),         # seq lengths
            full((N, H3)),            # emb_proj   (bf16)
            full((H, H3)),            # w_hh0      (bf16)
            full((1, H3)),            # b_hh0      (f32)
            full((NL1, 2 * H, H3)),   # fused_rhs  (bf16)
            full((NL1, 1, H3)),       # fused_b    (f32)
            full((NL1, H, H)),        # whh_n      (bf16)
            full((NL1, 1, H)),        # bhh_n      (f32)
            full((H, H)),             # dense_w_t  (bf16)
            full((1, H)),             # dense_b    (f32)
            full((H, N)),             # emb_t      (bf16)
        ],
        out_specs=full((BATCH, N)),
        scratch_shapes=[pltpu.VMEM((LB, H3), jnp.float32)],   # gi0 scratch
        compiler_params=pltpu.CompilerParams(
            dimension_semantics=("arbitrary",)),
    )(seq_col, seq_len2d, prep['emb_proj'], prep['w_hh0'], prep['b_hh0'],
      prep['fused_rhs'], prep['fused_b'], prep['whh_n'], prep['bhh_n'],
      prep['dense_w_t'], prep['dense_b'], prep['emb_t'])


def prepare_params(params):
    """One-time host-side layout prep (transposes, fusions, bf16 casts)."""
    H = HIDDEN
    emb = params['item_embedding'].astype(jnp.float32)            # (N, H)
    w_ih_t = jnp.transpose(params['w_ih'], (0, 2, 1)).astype(jnp.float32)  # (Lyr, H, 3H)
    w_hh_t = jnp.transpose(params['w_hh'], (0, 2, 1)).astype(jnp.float32)  # (Lyr, H, 3H)
    b_ih = params['b_ih'].astype(jnp.float32)                     # (Lyr, 3H)
    b_hh = params['b_hh'].astype(jnp.float32)                     # (Lyr, 3H)

    # Layer 0: fold embedding lookup + input projection + b_ih0 -> (N, 3H).
    emb_proj = (emb @ w_ih_t[0] + b_ih[0][None, :]).astype(jnp.bfloat16)

    # Layers >= 1: fused (2H, 3H) RHS with zeroed n-gate recurrent block, fused bias,
    # and a separate (H, H) recurrent n-gate projection.
    fused_rhs, fused_b, whh_n, bhh_n = [], [], [], []
    for l in range(1, NUM_LAYERS):
        top = w_ih_t[l]                                                        # (H, 3H)
        bot = jnp.concatenate([w_hh_t[l][:, :2 * H],
                               jnp.zeros((H, H), jnp.float32)], axis=1)        # (H, 3H)
        fused_rhs.append(jnp.concatenate([top, bot], axis=0))                  # (2H, 3H)
        fused_b.append((b_ih[l] + jnp.concatenate(
            [b_hh[l][:2 * H], jnp.zeros((H,), jnp.float32)]))[None, :])        # (1, 3H)
        whh_n.append(w_hh_t[l][:, 2 * H:])                                     # (H, H)
        bhh_n.append(b_hh[l][None, 2 * H:])                                    # (1, H)

    return {
        'emb_proj': emb_proj,
        'w_hh0': w_hh_t[0].astype(jnp.bfloat16),
        'b_hh0': b_hh[0][None, :],
        'fused_rhs': jnp.stack(fused_rhs).astype(jnp.bfloat16),
        'fused_b': jnp.stack(fused_b),
        'whh_n': jnp.stack(whh_n).astype(jnp.bfloat16),
        'bhh_n': jnp.stack(bhh_n),
        'dense_w_t': params['dense_w'].T.astype(jnp.bfloat16),
        'dense_b': params['dense_b'][None, :].astype(jnp.float32),
        'emb_t': emb.T.astype(jnp.bfloat16),
    }


@jax.jit
def gru4rec_forward(prep, seq, seq_length):
    """Mirrors GRU4Rec.forward({'seq': seq, 'seq_length': seq_length})."""
    # Only trivial int32 glue per call; all weight layout work is in prepare_params.
    seq_col = seq.astype(jnp.int32).T.reshape(SEQ_LEN * BATCH, 1)   # time-major ids
    seq_len2d = seq_length.astype(jnp.int32)[:, None]               # (B, 1)
    scores = run_fused(seq_col, seq_len2d, prep)
    return scores, 0


# --------------------------- pure-JAX reference ------------------------------
def reference_forward(params, seq, seq_length):
    emb = params['item_embedding']
    x = jnp.take(emb, seq, axis=0)
    B, L, H = x.shape
    h0 = jnp.zeros((NUM_LAYERS, B, H), jnp.float32)

    def step(h, x_t):
        inp = x_t
        hs = []
        for l in range(NUM_LAYERS):
            gi = inp @ params['w_ih'][l].T + params['b_ih'][l]
            gh = h[l] @ params['w_hh'][l].T + params['b_hh'][l]
            r = jax.nn.sigmoid(gi[:, :H] + gh[:, :H])
            z = jax.nn.sigmoid(gi[:, H:2 * H] + gh[:, H:2 * H])
            n = jnp.tanh(gi[:, 2 * H:] + r * gh[:, 2 * H:])
            h_new = (1.0 - z) * n + z * h[l]
            hs.append(h_new)
            inp = h_new
        return jnp.stack(hs), inp

    _, outs = lax.scan(step, h0, jnp.transpose(x, (1, 0, 2)))   # (L, B, H)
    seq_out = outs[seq_length - 1, jnp.arange(B), :]
    d = jnp.maximum(seq_out @ params['dense_w'].T + params['dense_b'], 0.0)
    return d @ emb.T


# ------------------------------- main ----------------------------------------
def init_params(key):
    H = HIDDEN
    k = 1.0 / jnp.sqrt(H)
    keys = jax.random.split(key, 8)
    return {
        # nn.Embedding init in _init_weights: normal(0, 0.02)
        'item_embedding': 0.02 * jax.random.normal(keys[0], (N_ITEMS, H), jnp.float32),
        # nn.GRU default init: U(-1/sqrt(H), 1/sqrt(H)), gate order (r, z, n)
        'w_ih': jax.random.uniform(keys[1], (NUM_LAYERS, 3 * H, H), jnp.float32, -k, k),
        'w_hh': jax.random.uniform(keys[2], (NUM_LAYERS, 3 * H, H), jnp.float32, -k, k),
        'b_ih': jax.random.uniform(keys[3], (NUM_LAYERS, 3 * H), jnp.float32, -k, k),
        'b_hh': jax.random.uniform(keys[4], (NUM_LAYERS, 3 * H), jnp.float32, -k, k),
        # nn.Linear(H, H)
        'dense_w': jax.random.uniform(keys[5], (H, H), jnp.float32, -k, k),
        'dense_b': jax.random.uniform(keys[6], (H,), jnp.float32, -k, k),
    }


if __name__ == "__main__":
    key = jax.random.PRNGKey(0)
    pkey, skey, lkey = jax.random.split(key, 3)
    params = init_params(pkey)
    prep = prepare_params(params)          # one-time weight layout prep

    # data = {'seq': (B, L) item ids, 'seq_length': (B,) valid lengths}
    seq = jax.random.randint(skey, (BATCH, SEQ_LEN), 1, N_ITEMS, dtype=jnp.int32)
    seq_length = jax.random.randint(lkey, (BATCH,), 1, SEQ_LEN + 1, dtype=jnp.int32)

    scores, aux = gru4rec_forward(prep, seq, seq_length)
    scores = jax.block_until_ready(scores)

    ref = jax.block_until_ready(reference_forward(params, seq, seq_length))
    # bf16 matmul operands (f32 accumulation) -> compare against the f32
    # reference with a correspondingly looser tolerance.
    if not bool(jnp.allclose(scores, ref, rtol=5e-2, atol=5e-3)):
        err = float(jnp.max(jnp.abs(scores - ref)))
        raise AssertionError(f"Pallas GRU4Rec output mismatch vs JAX reference "
                             f"(max abs diff {err:.3e})")

    print("KERNEL_OK")
</pallas_src>

<mosaic_0001>
module attributes {stable_mosaic.version = 11 : i64} {
  func.func @gru4rec_kernel(%arg0: i32, %arg1: memref<64x1xi32, #tpu.memory_space<vmem>>, %arg2: memref<8x1xi32, #tpu.memory_space<vmem>>, %arg3: memref<256x384xbf16, #tpu.memory_space<vmem>>, %arg4: memref<128x384xbf16, #tpu.memory_space<vmem>>, %arg5: memref<1x384xf32, #tpu.memory_space<vmem>>, %arg6: memref<1x256x384xbf16, #tpu.memory_space<vmem>>, %arg7: memref<1x1x384xf32, #tpu.memory_space<vmem>>, %arg8: memref<1x128x128xbf16, #tpu.memory_space<vmem>>, %arg9: memref<1x1x128xf32, #tpu.memory_space<vmem>>, %arg10: memref<128x128xbf16, #tpu.memory_space<vmem>>, %arg11: memref<1x128xf32, #tpu.memory_space<vmem>>, %arg12: memref<128x256xbf16, #tpu.memory_space<vmem>>, %arg13: memref<8x256xf32, #tpu.memory_space<vmem>>, %arg14: memref<64x384xf32, #tpu.memory_space<vmem>>) attributes {dimension_semantics = [#tpu.dimension_semantics<arbitrary>], iteration_bounds = array<i64: 1>, scalar_prefetch = 0 : i64, scratch_operands = 1 : i64, tpu.core_type = #tpu.core_type<tc>, window_params = [{pipeline_mode = #tpu.pipeline_mode<synchronous>, transform_indices = @transform_0, window_bounds = array<i64: 64, 1>}, {pipeline_mode = #tpu.pipeline_mode<synchronous>, transform_indices = @transform_1, window_bounds = array<i64: 8, 1>}, {pipeline_mode = #tpu.pipeline_mode<synchronous>, transform_indices = @transform_2, window_bounds = array<i64: 256, 384>}, {pipeline_mode = #tpu.pipeline_mode<synchronous>, transform_indices = @transform_3, window_bounds = array<i64: 128, 384>}, {pipeline_mode = #tpu.pipeline_mode<synchronous>, transform_indices = @transform_4, window_bounds = array<i64: 1, 384>}, {pipeline_mode = #tpu.pipeline_mode<synchronous>, transform_indices = @transform_5, window_bounds = array<i64: 1, 256, 384>}, {pipeline_mode = #tpu.pipeline_mode<synchronous>, transform_indices = @transform_6, window_bounds = array<i64: 1, 1, 384>}, {pipeline_mode = #tpu.pipeline_mode<synchronous>, transform_indices = @transform_7, window_bounds = array<i64: 1, 128, 128>}, {pipeline_mode = #tpu.pipeline_mode<synchronous>, transform_indices = @transform_8, window_bounds = array<i64: 1, 1, 128>}, {pipeline_mode = #tpu.pipeline_mode<synchronous>, transform_indices = @transform_9, window_bounds = array<i64: 128, 128>}, {pipeline_mode = #tpu.pipeline_mode<synchronous>, transform_indices = @transform_10, window_bounds = array<i64: 1, 128>}, {pipeline_mode = #tpu.pipeline_mode<synchronous>, transform_indices = @transform_11, window_bounds = array<i64: 128, 256>}, {pipeline_mode = #tpu.pipeline_mode<synchronous>, transform_indices = @transform_12, window_bounds = array<i64: 8, 256>}]} {
    %c0 = arith.constant 0 : index
    %c0_0 = arith.constant 0 : index
    %0 = vector.load %arg1[%c0, %c0_0] : memref<64x1xi32, #tpu.memory_space<vmem>>, vector<64x1xi32>
    %1 = tpu.iota {dimensions = array<i32: 1>} : vector<64x256xi32>
    %2 = vector.broadcast %0 : vector<64x1xi32> to vector<64x256xi32>
    %3 = arith.cmpi eq, %1, %2 : vector<64x256xi32>
    %4 = arith.extui %3 : vector<64x256xi1> to vector<64x256xi32>
    %5 = arith.sitofp %4 : vector<64x256xi32> to vector<64x256xf32>
    %6 = arith.truncf %5 : vector<64x256xf32> to vector<64x256xbf16>
    %c0_1 = arith.constant 0 : index
    %c0_2 = arith.constant 0 : index
    %7 = vector.load %arg3[%c0_1, %c0_2] : memref<256x384xbf16, #tpu.memory_space<vmem>>, vector<256x384xbf16>
    %cst = arith.constant dense<0.000000e+00> : vector<64x384xf32>
    %8 = tpu.matmul %6, %7, %cst {dimension_numbers = #tpu.dot_dimension_numbers<[1], [0], [0], [1], [0, 0, 1, 1], [], []>} : vector<64x256xbf16>, vector<256x384xbf16>, vector<64x384xf32> -> vector<64x384xf32>
    %c0_3 = arith.constant 0 : index
    %c0_4 = arith.constant 0 : index
    %9 = vector.load %arg14[%c0_3, %c0_4] : memref<64x384xf32, #tpu.memory_space<vmem>>, vector<64x384xf32>
    tpu.vector_store %arg14[%c0_3, %c0_4], %8 {strides = array<i32>} : memref<64x384xf32, #tpu.memory_space<vmem>>, vector<64x384xf32>,
    %c0_5 = arith.constant 0 : index
    %c0_6 = arith.constant 0 : index
    %10 = vector.load %arg2[%c0_5, %c0_6] : memref<8x1xi32, #tpu.memory_space<vmem>>, vector<8x1xi32>
    %c1_i32 = arith.constant 1 : i32
    %11 = vector.broadcast %c1_i32 : i32 to vector<8x1xi32>
    %12 = arith.subi %10, %11 : vector<8x1xi32>
    %cst_7 = arith.constant 0.000000e+00 : f32
    %13 = vector.broadcast %cst_7 : f32 to vector<8x128xf32>
    %cst_8 = arith.constant 0.000000e+00 : f32
    %14 = vector.broadcast %cst_8 : f32 to vector<8x128xf32>
    %cst_9 = arith.constant 0.000000e+00 : f32
    %15 = vector.broadcast %cst_9 : f32 to vector<8x128xf32>
    %c0_10 = arith.constant 0 : index
    %c0_11 = arith.constant 0 : index
    %16 = vector.load %arg14[%c0_10, %c0_11] : memref<64x384xf32, #tpu.memory_space<vmem>>, vector<8x384xf32>
    %17 = arith.truncf %13 : vector<8x128xf32> to vector<8x128xbf16>
    %c0_12 = arith.constant 0 : index
    %c0_13 = arith.constant 0 : index
    %18 = vector.load %arg4[%c0_12, %c0_13] : memref<128x384xbf16, #tpu.memory_space<vmem>>, vector<128x384xbf16>
    %cst_14 = arith.constant dense<0.000000e+00> : vector<8x384xf32>
    %19 = tpu.matmul %17, %18, %cst_14 {dimension_numbers = #tpu.dot_dimension_numbers<[1], [0], [0], [1], [0, 0, 1, 1], [], []>} : vector<8x128xbf16>, vector<128x384xbf16>, vector<8x384xf32> -> vector<8x384xf32>
    %c0_15 = arith.constant 0 : index
    %c0_16 = arith.constant 0 : index
    %20 = vector.load %arg5[%c0_15, %c0_16] : memref<1x384xf32, #tpu.memory_space<vmem>>, vector<1x384xf32>
    %21 = vector.broadcast %20 : vector<1x384xf32> to vector<8x384xf32>
    %22 = arith.addf %19, %21 : vector<8x384xf32>
    %23 = vector.extract_strided_slice %16 {offsets = [0, 0], sizes = [8, 128], strides = [1, 1]} : vector<8x384xf32> to vector<8x128xf32>
    %24 = vector.extract_strided_slice %22 {offsets = [0, 0], sizes = [8, 128], strides = [1, 1]} : vector<8x384xf32> to vector<8x128xf32>
    %25 = arith.addf %23, %24 : vector<8x128xf32>
    %26 = vector.extract_strided_slice %16 {offsets = [0, 128], sizes = [8, 128], strides = [1, 1]} : vector<8x384xf32> to vector<8x128xf32>
    %27 = vector.extract_strided_slice %22 {offsets = [0, 128], sizes = [8, 128], strides = [1, 1]} : vector<8x384xf32> to vector<8x128xf32>
    %28 = arith.addf %26, %27 : vector<8x128xf32>
    %29 = vector.extract_strided_slice %16 {offsets = [0, 256], sizes = [8, 128], strides = [1, 1]} : vector<8x384xf32> to vector<8x128xf32>
    %30 = vector.extract_strided_slice %22 {offsets = [0, 256], sizes = [8, 128], strides = [1, 1]} : vector<8x384xf32> to vector<8x128xf32>
    %31 = arith.negf %25 : vector<8x128xf32>
    %32 = math.exp %31 : vector<8x128xf32>
    %cst_17 = arith.constant 1.000000e+00 : f32
    %33 = vector.broadcast %cst_17 : f32 to vector<8x128xf32>
    %34 = arith.addf %33, %32 : vector<8x128xf32>
    %35 = arith.divf %33, %34 : vector<8x128xf32>
    %36 = arith.negf %28 : vector<8x128xf32>
    %37 = math.exp %36 : vector<8x128xf32>
    %cst_18 = arith.constant 1.000000e+00 : f32
    %38 = vector.broadcast %cst_18 : f32 to vector<8x128xf32>
    %39 = arith.addf %38, %37 : vector<8x128xf32>
    %40 = arith.divf %38, %39 : vector<8x128xf32>
    %41 = arith.mulf %35, %30 : vector<8x128xf32>
    %42 = arith.addf %29, %41 : vector<8x128xf32>
    %43 = math.tanh %42 : vector<8x128xf32>
    %cst_19 = arith.constant 1.000000e+00 : f32
    %44 = vector.broadcast %cst_19 : f32 to vector<8x128xf32>
    %45 = arith.subf %44, %40 : vector<8x128xf32>
    %46 = arith.mulf %45, %43 : vector<8x128xf32>
    %47 = arith.mulf %40, %13 : vector<8x128xf32>
    %48 = arith.addf %46, %47 : vector<8x128xf32>
    %49 = arith.truncf %14 : vector<8x128xf32> to vector<8x128xbf16>
    %c0_20 = arith.constant 0 : index
    %c0_21 = arith.constant 0 : index
    %c0_22 = arith.constant 0 : index
    %50 = vector.load %arg8[%c0_20, %c0_21, %c0_22] : memref<1x128x128xbf16, #tpu.memory_space<vmem>>, vector<1x128x128xbf16>
    %51 = vector.shape_cast %50 : vector<1x128x128xbf16> to vector<128x128xbf16>
    %cst_23 = arith.constant dense<0.000000e+00> : vector<8x128xf32>
    %52 = tpu.matmul %49, %51, %cst_23 {dimension_numbers = #tpu.dot_dimension_numbers<[1], [0], [0], [1], [0, 0, 1, 1], [], []>} : vector<8x128xbf16>, vector<128x128xbf16>, vector<8x128xf32> -> vector<8x128xf32>
    %c0_24 = arith.constant 0 : index
    %c0_25 = arith.constant 0 : index
    %c0_26 = arith.constant 0 : index
    %53 = vector.load %arg9[%c0_24, %c0_25, %c0_26] : memref<1x1x128xf32, #tpu.memory_space<vmem>>, vector<1x1x128xf32>
    %54 = vector.shape_cast %53 : vector<1x1x128xf32> to vector<1x128xf32>
    %55 = vector.broadcast %54 : vector<1x128xf32> to vector<8x128xf32>
    %56 = arith.addf %52, %55 : vector<8x128xf32>
    %57 = arith.truncf %48 : vector<8x128xf32> to vector<8x128xbf16>
    %58 = tpu.concatenate %57, %49 in 1 : vector<8x128xbf16>, vector<8x128xbf16> -> vector<8x256xbf16>
    %c0_27 = arith.constant 0 : index
    %c0_28 = arith.constant 0 : index
    %c0_29 = arith.constant 0 : index
    %59 = vector.load %arg6[%c0_27, %c0_28, %c0_29] : memref<1x256x384xbf16, #tpu.memory_space<vmem>>, vector<1x256x384xbf16>
    %60 = vector.shape_cast %59 : vector<1x256x384xbf16> to vector<256x384xbf16>
    %cst_30 = arith.constant dense<0.000000e+00> : vector<8x384xf32>
    %61 = tpu.matmul %58, %60, %cst_30 {dimension_numbers = #tpu.dot_dimension_numbers<[1], [0], [0], [1], [0, 0, 1, 1], [], []>} : vector<8x256xbf16>, vector<256x384xbf16>, vector<8x384xf32> -> vector<8x384xf32>
    %c0_31 = arith.constant 0 : index
    %c0_32 = arith.constant 0 : index
    %c0_33 = arith.constant 0 : index
    %62 = vector.load %arg7[%c0_31, %c0_32, %c0_33] : memref<1x1x384xf32, #tpu.memory_space<vmem>>, vector<1x1x384xf32>
    %63 = vector.shape_cast %62 : vector<1x1x384xf32> to vector<1x384xf32>
    %64 = vector.broadcast %63 : vector<1x384xf32> to vector<8x384xf32>
    %65 = arith.addf %61, %64 : vector<8x384xf32>
    %66 = vector.extract_strided_slice %65 {offsets = [0, 0], sizes = [8, 128], strides = [1, 1]} : vector<8x384xf32> to vector<8x128xf32>
    %67 = vector.extract_strided_slice %65 {offsets = [0, 128], sizes = [8, 128], strides = [1, 1]} : vector<8x384xf32> to vector<8x128xf32>
    %68 = vector.extract_strided_slice %65 {offsets = [0, 256], sizes = [8, 128], strides = [1, 1]} : vector<8x384xf32> to vector<8x128xf32>
    %69 = arith.negf %66 : vector<8x128xf32>
    %70 = math.exp %69 : vector<8x128xf32>
    %cst_34 = arith.constant 1.000000e+00 : f32
    %71 = vector.broadcast %cst_34 : f32 to vector<8x128xf32>
    %72 = arith.addf %71, %70 : vector<8x128xf32>
    %73 = arith.divf %71, %72 : vector<8x128xf32>
    %74 = arith.negf %67 : vector<8x128xf32>
    %75 = math.exp %74 : vector<8x128xf32>
    %cst_35 = arith.constant 1.000000e+00 : f32
    %76 = vector.broadcast %cst_35 : f32 to vector<8x128xf32>
    %77 = arith.addf %76, %75 : vector<8x128xf32>
    %78 = arith.divf %76, %77 : vector<8x128xf32>
    %79 = arith.mulf %73, %56 : vector<8x128xf32>
    %80 = arith.addf %68, %79 : vector<8x128xf32>
    %81 = math.tanh %80 : vector<8x128xf32>
    %cst_36 = arith.constant 1.000000e+00 : f32
    %82 = vector.broadcast %cst_36 : f32 to vector<8x128xf32>
    %83 = arith.subf %82, %78 : vector<8x128xf32>
    %84 = arith.mulf %83, %81 : vector<8x128xf32>
    %85 = arith.mulf %78, %14 : vector<8x128xf32>
    %86 = arith.addf %84, %85 : vector<8x128xf32>
    %c0_i32 = arith.constant 0 : i32
    %87 = vector.broadcast %c0_i32 : i32 to vector<8x1xi32>
    %88 = arith.cmpi eq, %12, %87 : vector<8x1xi32>
    %89 = vector.shape_cast %88 : vector<8x1xi1> to vector<8x1xi1>
    %90 = vector.broadcast %89 : vector<8x1xi1> to vector<8x128xi1>
    %91 = arith.select %90, %86, %15 : vector<8x128xi1>, vector<8x128xf32>
    %c8 = arith.constant 8 : index
    %c0_37 = arith.constant 0 : index
    %92 = vector.load %arg14[%c8, %c0_37] : memref<64x384xf32, #tpu.memory_space<vmem>>, vector<8x384xf32>
    %93 = arith.truncf %48 : vector<8x128xf32> to vector<8x128xbf16>
    %c0_38 = arith.constant 0 : index
    %c0_39 = arith.constant 0 : index
    %94 = vector.load %arg4[%c0_38, %c0_39] : memref<128x384xbf16, #tpu.memory_space<vmem>>, vector<128x384xbf16>
    %cst_40 = arith.constant dense<0.000000e+00> : vector<8x384xf32>
    %95 = tpu.matmul %93, %94, %cst_40 {dimension_numbers = #tpu.dot_dimension_numbers<[1], [0], [0], [1], [0, 0, 1, 1], [], []>} : vector<8x128xbf16>, vector<128x384xbf16>, vector<8x384xf32> -> vector<8x384xf32>
    %c0_41 = arith.constant 0 : index
    %c0_42 = arith.constant 0 : index
    %96 = vector.load %arg5[%c0_41, %c0_42] : memref<1x384xf32, #tpu.memory_space<vmem>>, vector<1x384xf32>
    %97 = vector.broadcast %96 : vector<1x384xf32> to vector<8x384xf32>
    %98 = arith.addf %95, %97 : vector<8x384xf32>
    %99 = vector.extract_strided_slice %92 {offsets = [0, 0], sizes = [8, 128], strides = [1, 1]} : vector<8x384xf32> to vector<8x128xf32>
    %100 = vector.extract_strided_slice %98 {offsets = [0, 0], sizes = [8, 128], strides = [1, 1]} : vector<8x384xf32> to vector<8x128xf32>
    %101 = arith.addf %99, %100 : vector<8x128xf32>
    %102 = vector.extract_strided_slice %92 {offsets = [0, 128], sizes = [8, 128], strides = [1, 1]} : vector<8x384xf32> to vector<8x128xf32>
    %103 = vector.extract_strided_slice %98 {offsets = [0, 128], sizes = [8, 128], strides = [1, 1]} : vector<8x384xf32> to vector<8x128xf32>
    %104 = arith.addf %102, %103 : vector<8x128xf32>
    %105 = vector.extract_strided_slice %92 {offsets = [0, 256], sizes = [8, 128], strides = [1, 1]} : vector<8x384xf32> to vector<8x128xf32>
    %106 = vector.extract_strided_slice %98 {offsets = [0, 256], sizes = [8, 128], strides = [1, 1]} : vector<8x384xf32> to vector<8x128xf32>
    %107 = arith.negf %101 : vector<8x128xf32>
    %108 = math.exp %107 : vector<8x128xf32>
    %cst_43 = arith.constant 1.000000e+00 : f32
    %109 = vector.broadcast %cst_43 : f32 to vector<8x128xf32>
    %110 = arith.addf %109, %108 : vector<8x128xf32>
    %111 = arith.divf %109, %110 : vector<8x128xf32>
    %112 = arith.negf %104 : vector<8x128xf32>
    %113 = math.exp %112 : vector<8x128xf32>
    %cst_44 = arith.constant 1.000000e+00 : f32
    %114 = vector.broadcast %cst_44 : f32 to vector<8x128xf32>
    %115 = arith.addf %114, %113 : vector<8x128xf32>
    %116 = arith.divf %114, %115 : vector<8x128xf32>
    %117 = arith.mulf %111, %106 : vector<8x128xf32>
    %118 = arith.addf %105, %117 : vector<8x128xf32>
    %119 = math.tanh %118 : vector<8x128xf32>
    %cst_45 = arith.constant 1.000000e+00 : f32
    %120 = vector.broadcast %cst_45 : f32 to vector<8x128xf32>
    %121 = arith.subf %120, %116 : vector<8x128xf32>
    %122 = arith.mulf %121, %119 : vector<8x128xf32>
    %123 = arith.mulf %116, %48 : vector<8x128xf32>
    %124 = arith.addf %122, %123 : vector<8x128xf32>
    %125 = arith.truncf %86 : vector<8x128xf32> to vector<8x128xbf16>
    %c0_46 = arith.constant 0 : index
    %c0_47 = arith.constant 0 : index
    %c0_48 = arith.constant 0 : index
    %126 = vector.load %arg8[%c0_46, %c0_47, %c0_48] : memref<1x128x128xbf16, #tpu.memory_space<vmem>>, vector<1x128x128xbf16>
    %127 = vector.shape_cast %126 : vector<1x128x128xbf16> to vector<128x128xbf16>
    %cst_49 = arith.constant dense<0.000000e+00> : vector<8x128xf32>
    %128 = tpu.matmul %125, %127, %cst_49 {dimension_numbers = #tpu.dot_dimension_numbers<[1], [0], [0], [1], [0, 0, 1, 1], [], []>} : vector<8x128xbf16>, vector<128x128xbf16>, vector<8x128xf32> -> vector<8x128xf32>
    %c0_50 = arith.constant 0 : index
    %c0_51 = arith.constant 0 : index
    %c0_52 = arith.constant 0 : index
    %129 = vector.load %arg9[%c0_50, %c0_51, %c0_52] : memref<1x1x128xf32, #tpu.memory_space<vmem>>, vector<1x1x128xf32>
    %130 = vector.shape_cast %129 : vector<1x1x128xf32> to vector<1x128xf32>
    %131 = vector.broadcast %130 : vector<1x128xf32> to vector<8x128xf32>
    %132 = arith.addf %128, %131 : vector<8x128xf32>
    %133 = arith.truncf %124 : vector<8x128xf32> to vector<8x128xbf16>
    %134 = tpu.concatenate %133, %125 in 1 : vector<8x128xbf16>, vector<8x128xbf16> -> vector<8x256xbf16>
    %c0_53 = arith.constant 0 : index
    %c0_54 = arith.constant 0 : index
    %c0_55 = arith.constant 0 : index
    %135 = vector.load %arg6[%c0_53, %c0_54, %c0_55] : memref<1x256x384xbf16, #tpu.memory_space<vmem>>, vector<1x256x384xbf16>
    %136 = vector.shape_cast %135 : vector<1x256x384xbf16> to vector<256x384xbf16>
    %cst_56 = arith.constant dense<0.000000e+00> : vector<8x384xf32>
    %137 = tpu.matmul %134, %136, %cst_56 {dimension_numbers = #tpu.dot_dimension_numbers<[1], [0], [0], [1], [0, 0, 1, 1], [], []>} : vector<8x256xbf16>, vector<256x384xbf16>, vector<8x384xf32> -> vector<8x384xf32>
    %c0_57 = arith.constant 0 : index
    %c0_58 = arith.constant 0 : index
    %c0_59 = arith.constant 0 : index
    %138 = vector.load %arg7[%c0_57, %c0_58, %c0_59] : memref<1x1x384xf32, #tpu.memory_space<vmem>>, vector<1x1x384xf32>
    %139 = vector.shape_cast %138 : vector<1x1x384xf32> to vector<1x384xf32>
    %140 = vector.broadcast %139 : vector<1x384xf32> to vector<8x384xf32>
    %141 = arith.addf %137, %140 : vector<8x384xf32>
    %142 = vector.extract_strided_slice %141 {offsets = [0, 0], sizes = [8, 128], strides = [1, 1]} : vector<8x384xf32> to vector<8x128xf32>
    %143 = vector.extract_strided_slice %141 {offsets = [0, 128], sizes = [8, 128], strides = [1, 1]} : vector<8x384xf32> to vector<8x128xf32>
    %144 = vector.extract_strided_slice %141 {offsets = [0, 256], sizes = [8, 128], strides = [1, 1]} : vector<8x384xf32> to vector<8x128xf32>
    %145 = arith.negf %142 : vector<8x128xf32>
    %146 = math.exp %145 : vector<8x128xf32>
    %cst_60 = arith.constant 1.000000e+00 : f32
    %147 = vector.broadcast %cst_60 : f32 to vector<8x128xf32>
    %148 = arith.addf %147, %146 : vector<8x128xf32>
    %149 = arith.divf %147, %148 : vector<8x128xf32>
    %150 = arith.negf %143 : vector<8x128xf32>
    %151 = math.exp %150 : vector<8x128xf32>
    %cst_61 = arith.constant 1.000000e+00 : f32
    %152 = vector.broadcast %cst_61 : f32 to vector<8x128xf32>
    %153 = arith.addf %152, %151 : vector<8x128xf32>
    %154 = arith.divf %152, %153 : vector<8x128xf32>
    %155 = arith.mulf %149, %132 : vector<8x128xf32>
    %156 = arith.addf %144, %155 : vector<8x128xf32>
    %157 = math.tanh %156 : vector<8x128xf32>
    %cst_62 = arith.constant 1.000000e+00 : f32
    %158 = vector.broadcast %cst_62 : f32 to vector<8x128xf32>
    %159 = arith.subf %158, %154 : vector<8x128xf32>
    %160 = arith.mulf %159, %157 : vector<8x128xf32>
    %161 = arith.mulf %154, %86 : vector<8x128xf32>
    %162 = arith.addf %160, %161 : vector<8x128xf32>
    %c1_i32_63 = arith.constant 1 : i32
    %163 = vector.broadcast %c1_i32_63 : i32 to vector<8x1xi32>
    %164 = arith.cmpi eq, %12, %163 : vector<8x1xi32>
    %165 = vector.shape_cast %164 : vector<8x1xi1> to vector<8x1xi1>
    %166 = vector.broadcast %165 : vector<8x1xi1> to vector<8x128xi1>
    %167 = arith.select %166, %162, %91 : vector<8x128xi1>, vector<8x128xf32>
    %c16 = arith.constant 16 : index
    %c0_64 = arith.constant 0 : index
    %168 = vector.load %arg14[%c16, %c0_64] : memref<64x384xf32, #tpu.memory_space<vmem>>, vector<8x384xf32>
    %169 = arith.truncf %124 : vector<8x128xf32> to vector<8x128xbf16>
    %c0_65 = arith.constant 0 : index
    %c0_66 = arith.constant 0 : index
    %170 = vector.load %arg4[%c0_65, %c0_66] : memref<128x384xbf16, #tpu.memory_space<vmem>>, vector<128x384xbf16>
    %cst_67 = arith.constant dense<0.000000e+00> : vector<8x384xf32>
    %171 = tpu.matmul %169, %170, %cst_67 {dimension_numbers = #tpu.dot_dimension_numbers<[1], [0], [0], [1], [0, 0, 1, 1], [], []>} : vector<8x128xbf16>, vector<128x384xbf16>, vector<8x384xf32> -> vector<8x384xf32>
    %c0_68 = arith.constant 0 : index
    %c0_69 = arith.constant 0 : index
    %172 = vector.load %arg5[%c0_68, %c0_69] : memref<1x384xf32, #tpu.memory_space<vmem>>, vector<1x384xf32>
    %173 = vector.broadcast %172 : vector<1x384xf32> to vector<8x384xf32>
    %174 = arith.addf %171, %173 : vector<8x384xf32>
    %175 = vector.extract_strided_slice %168 {offsets = [0, 0], sizes = [8, 128], strides = [1, 1]} : vector<8x384xf32> to vector<8x128xf32>
    %176 = vector.extract_strided_slice %174 {offsets = [0, 0], sizes = [8, 128], strides = [1, 1]} : vector<8x384xf32> to vector<8x128xf32>
    %177 = arith.addf %175, %176 : vector<8x128xf32>
    %178 = vector.extract_strided_slice %168 {offsets = [0, 128], sizes = [8, 128], strides = [1, 1]} : vector<8x384xf32> to vector<8x128xf32>
    %179 = vector.extract_strided_slice %174 {offsets = [0, 128], sizes = [8, 128], strides = [1, 1]} : vector<8x384xf32> to vector<8x128xf32>
    %180 = arith.addf %178, %179 : vector<8x128xf32>
    %181 = vector.extract_strided_slice %168 {offsets = [0, 256], sizes = [8, 128], strides = [1, 1]} : vector<8x384xf32> to vector<8x128xf32>
    %182 = vector.extract_strided_slice %174 {offsets = [0, 256], sizes = [8, 128], strides = [1, 1]} : vector<8x384xf32> to vector<8x128xf32>
    %183 = arith.negf %177 : vector<8x128xf32>
    %184 = math.exp %183 : vector<8x128xf32>
    %cst_70 = arith.constant 1.000000e+00 : f32
    %185 = vector.broadcast %cst_70 : f32 to vector<8x128xf32>
    %186 = arith.addf %185, %184 : vector<8x128xf32>
    %187 = arith.divf %185, %186 : vector<8x128xf32>
    %188 = arith.negf %180 : vector<8x128xf32>
    %189 = math.exp %188 : vector<8x128xf32>
    %cst_71 = arith.constant 1.000000e+00 : f32
    %190 = vector.broadcast %cst_71 : f32 to vector<8x128xf32>
    %191 = arith.addf %190, %189 : vector<8x128xf32>
    %192 = arith.divf %190, %191 : vector<8x128xf32>
    %193 = arith.mulf %187, %182 : vector<8x128xf32>
    %194 = arith.addf %181, %193 : vector<8x128xf32>
    %195 = math.tanh %194 : vector<8x128xf32>
    %cst_72 = arith.constant 1.000000e+00 : f32
    %196 = vector.broadcast %cst_72 : f32 to vector<8x128xf32>
    %197 = arith.subf %196, %192 : vector<8x128xf32>
    %198 = arith.mulf %197, %195 : vector<8x128xf32>
    %199 = arith.mulf %192, %124 : vector<8x128xf32>
    %200 = arith.addf %198, %199 : vector<8x128xf32>
    %201 = arith.truncf %162 : vector<8x128xf32> to vector<8x128xbf16>
    %c0_73 = arith.constant 0 : index
    %c0_74 = arith.constant 0 : index
    %c0_75 = arith.constant 0 : index
    %202 = vector.load %arg8[%c0_73, %c0_74, %c0_75] : memref<1x128x128xbf16, #tpu.memory_space<vmem>>, vector<1x128x128xbf16>
    %203 = vector.shape_cast %202 : vector<1x128x128xbf16> to vector<128x128xbf16>
    %cst_76 = arith.constant dense<0.000000e+00> : vector<8x128xf32>
    %204 = tpu.matmul %201, %203, %cst_76 {dimension_numbers = #tpu.dot_dimension_numbers<[1], [0], [0], [1], [0, 0, 1, 1], [], []>} : vector<8x128xbf16>, vector<128x128xbf16>, vector<8x128xf32> -> vector<8x128xf32>
    %c0_77 = arith.constant 0 : index
    %c0_78 = arith.constant 0 : index
    %c0_79 = arith.constant 0 : index
    %205 = vector.load %arg9[%c0_77, %c0_78, %c0_79] : memref<1x1x128xf32, #tpu.memory_space<vmem>>, vector<1x1x128xf32>
    %206 = vector.shape_cast %205 : vector<1x1x128xf32> to vector<1x128xf32>
    %207 = vector.broadcast %206 : vector<1x128xf32> to vector<8x128xf32>
    %208 = arith.addf %204, %207 : vector<8x128xf32>
    %209 = arith.truncf %200 : vector<8x128xf32> to vector<8x128xbf16>
    %210 = tpu.concatenate %209, %201 in 1 : vector<8x128xbf16>, vector<8x128xbf16> -> vector<8x256xbf16>
    %c0_80 = arith.constant 0 : index
    %c0_81 = arith.constant 0 : index
    %c0_82 = arith.constant 0 : index
    %211 = vector.load %arg6[%c0_80, %c0_81, %c0_82] : memref<1x256x384xbf16, #tpu.memory_space<vmem>>, vector<1x256x384xbf16>
    %212 = vector.shape_cast %211 : vector<1x256x384xbf16> to vector<256x384xbf16>
    %cst_83 = arith.constant dense<0.000000e+00> : vector<8x384xf32>
    %213 = tpu.matmul %210, %212, %cst_83 {dimension_numbers = #tpu.dot_dimension_numbers<[1], [0], [0], [1], [0, 0, 1, 1], [], []>} : vector<8x256xbf16>, vector<256x384xbf16>, vector<8x384xf32> -> vector<8x384xf32>
    %c0_84 = arith.constant 0 : index
    %c0_85 = arith.constant 0 : index
    %c0_86 = arith.constant 0 : index
    %214 = vector.load %arg7[%c0_84, %c0_85, %c0_86] : memref<1x1x384xf32, #tpu.memory_space<vmem>>, vector<1x1x384xf32>
    %215 = vector.shape_cast %214 : vector<1x1x384xf32> to vector<1x384xf32>
    %216 = vector.broadcast %215 : vector<1x384xf32> to vector<8x384xf32>
    %217 = arith.addf %213, %216 : vector<8x384xf32>
    %218 = vector.extract_strided_slice %217 {offsets = [0, 0], sizes = [8, 128], strides = [1, 1]} : vector<8x384xf32> to vector<8x128xf32>
    %219 = vector.extract_strided_slice %217 {offsets = [0, 128], sizes = [8, 128], strides = [1, 1]} : vector<8x384xf32> to vector<8x128xf32>
    %220 = vector.extract_strided_slice %217 {offsets = [0, 256], sizes = [8, 128], strides = [1, 1]} : vector<8x384xf32> to vector<8x128xf32>
    %221 = arith.negf %218 : vector<8x128xf32>
    %222 = math.exp %221 : vector<8x128xf32>
    %cst_87 = arith.constant 1.000000e+00 : f32
    %223 = vector.broadcast %cst_87 : f32 to vector<8x128xf32>
    %224 = arith.addf %223, %222 : vector<8x128xf32>
    %225 = arith.divf %223, %224 : vector<8x128xf32>
    %226 = arith.negf %219 : vector<8x128xf32>
    %227 = math.exp %226 : vector<8x128xf32>
    %cst_88 = arith.constant 1.000000e+00 : f32
    %228 = vector.broadcast %cst_88 : f32 to vector<8x128xf32>
    %229 = arith.addf %228, %227 : vector<8x128xf32>
    %230 = arith.divf %228, %229 : vector<8x128xf32>
    %231 = arith.mulf %225, %208 : vector<8x128xf32>
    %232 = arith.addf %220, %231 : vector<8x128xf32>
    %233 = math.tanh %232 : vector<8x128xf32>
    %cst_89 = arith.constant 1.000000e+00 : f32
    %234 = vector.broadcast %cst_89 : f32 to vector<8x128xf32>
    %235 = arith.subf %234, %230 : vector<8x128xf32>
    %236 = arith.mulf %235, %233 : vector<8x128xf32>
    %237 = arith.mulf %230, %162 : vector<8x128xf32>
    %238 = arith.addf %236, %237 : vector<8x128xf32>
    %c2_i32 = arith.constant 2 : i32
    %239 = vector.broadcast %c2_i32 : i32 to vector<8x1xi32>
    %240 = arith.cmpi eq, %12, %239 : vector<8x1xi32>
    %241 = vector.shape_cast %240 : vector<8x1xi1> to vector<8x1xi1>
    %242 = vector.broadcast %241 : vector<8x1xi1> to vector<8x128xi1>
    %243 = arith.select %242, %238, %167 : vector<8x128xi1>, vector<8x128xf32>
    %c24 = arith.constant 24 : index
    %c0_90 = arith.constant 0 : index
    %244 = vector.load %arg14[%c24, %c0_90] : memref<64x384xf32, #tpu.memory_space<vmem>>, vector<8x384xf32>
    %245 = arith.truncf %200 : vector<8x128xf32> to vector<8x128xbf16>
    %c0_91 = arith.constant 0 : index
    %c0_92 = arith.constant 0 : index
    %246 = vector.load %arg4[%c0_91, %c0_92] : memref<128x384xbf16, #tpu.memory_space<vmem>>, vector<128x384xbf16>
    %cst_93 = arith.constant dense<0.000000e+00> : vector<8x384xf32>
    %247 = tpu.matmul %245, %246, %cst_93 {dimension_numbers = #tpu.dot_dimension_numbers<[1], [0], [0], [1], [0, 0, 1, 1], [], []>} : vector<8x128xbf16>, vector<128x384xbf16>, vector<8x384xf32> -> vector<8x384xf32>
    %c0_94 = arith.constant 0 : index
    %c0_95 = arith.constant 0 : index
    %248 = vector.load %arg5[%c0_94, %c0_95] : memref<1x384xf32, #tpu.memory_space<vmem>>, vector<1x384xf32>
    %249 = vector.broadcast %248 : vector<1x384xf32> to vector<8x384xf32>
    %250 = arith.addf %247, %249 : vector<8x384xf32>
    %251 = vector.extract_strided_slice %244 {offsets = [0, 0], sizes = [8, 128], strides = [1, 1]} : vector<8x384xf32> to vector<8x128xf32>
    %252 = vector.extract_strided_slice %250 {offsets = [0, 0], sizes = [8, 128], strides = [1, 1]} : vector<8x384xf32> to vector<8x128xf32>
    %253 = arith.addf %251, %252 : vector<8x128xf32>
    %254 = vector.extract_strided_slice %244 {offsets = [0, 128], sizes = [8, 128], strides = [1, 1]} : vector<8x384xf32> to vector<8x128xf32>
    %255 = vector.extract_strided_slice %250 {offsets = [0, 128], sizes = [8, 128], strides = [1, 1]} : vector<8x384xf32> to vector<8x128xf32>
    %256 = arith.addf %254, %255 : vector<8x128xf32>
    %257 = vector.extract_strided_slice %244 {offsets = [0, 256], sizes = [8, 128], strides = [1, 1]} : vector<8x384xf32> to vector<8x128xf32>
    %258 = vector.extract_strided_slice %250 {offsets = [0, 256], sizes = [8, 128], strides = [1, 1]} : vector<8x384xf32> to vector<8x128xf32>
    %259 = arith.negf %253 : vector<8x128xf32>
    %260 = math.exp %259 : vector<8x128xf32>
    %cst_96 = arith.constant 1.000000e+00 : f32
    %261 = vector.broadcast %cst_96 : f32 to vector<8x128xf32>
    %262 = arith.addf %261, %260 : vector<8x128xf32>
    %263 = arith.divf %261, %262 : vector<8x128xf32>
    %264 = arith.negf %256 : vector<8x128xf32>
    %265 = math.exp %264 : vector<8x128xf32>
    %cst_97 = arith.constant 1.000000e+00 : f32
    %266 = vector.broadcast %cst_97 : f32 to vector<8x128xf32>
    %267 = arith.addf %266, %265 : vector<8x128xf32>
    %268 = arith.divf %266, %267 : vector<8x128xf32>
    %269 = arith.mulf %263, %258 : vector<8x128xf32>
    %270 = arith.addf %257, %269 : vector<8x128xf32>
    %271 = math.tanh %270 : vector<8x128xf32>
    %cst_98 = arith.constant 1.000000e+00 : f32
    %272 = vector.broadcast %cst_98 : f32 to vector<8x128xf32>
    %273 = arith.subf %272, %268 : vector<8x128xf32>
    %274 = arith.mulf %273, %271 : vector<8x128xf32>
    %275 = arith.mulf %268, %200 : vector<8x128xf32>
    %276 = arith.addf %274, %275 : vector<8x128xf32>
    %277 = arith.truncf %238 : vector<8x128xf32> to vector<8x128xbf16>
    %c0_99 = arith.constant 0 : index
    %c0_100 = arith.constant 0 : index
    %c0_101 = arith.constant 0 : index
    %278 = vector.load %arg8[%c0_99, %c0_100, %c0_101] : memref<1x128x128xbf16, #tpu.memory_space<vmem>>, vector<1x128x128xbf16>
    %279 = vector.shape_cast %278 : vector<1x128x128xbf16> to vector<128x128xbf16>
    %cst_102 = arith.constant dense<0.000000e+00> : vector<8x128xf32>
    %280 = tpu.matmul %277, %279, %cst_102 {dimension_numbers = #tpu.dot_dimension_numbers<[1], [0], [0], [1], [0, 0, 1, 1], [], []>} : vector<8x128xbf16>, vector<128x128xbf16>, vector<8x128xf32> -> vector<8x128xf32>
    %c0_103 = arith.constant 0 : index
    %c0_104 = arith.constant 0 : index
    %c0_105 = arith.constant 0 : index
    %281 = vector.load %arg9[%c0_103, %c0_104, %c0_105] : memref<1x1x128xf32, #tpu.memory_space<vmem>>, vector<1x1x128xf32>
    %282 = vector.shape_cast %281 : vector<1x1x128xf32> to vector<1x128xf32>
    %283 = vector.broadcast %282 : vector<1x128xf32> to vector<8x128xf32>
    %284 = arith.addf %280, %283 : vector<8x128xf32>
    %285 = arith.truncf %276 : vector<8x128xf32> to vector<8x128xbf16>
    %286 = tpu.concatenate %285, %277 in 1 : vector<8x128xbf16>, vector<8x128xbf16> -> vector<8x256xbf16>
    %c0_106 = arith.constant 0 : index
    %c0_107 = arith.constant 0 : index
    %c0_108 = arith.constant 0 : index
    %287 = vector.load %arg6[%c0_106, %c0_107, %c0_108] : memref<1x256x384xbf16, #tpu.memory_space<vmem>>, vector<1x256x384xbf16>
    %288 = vector.shape_cast %287 : vector<1x256x384xbf16> to vector<256x384xbf16>
    %cst_109 = arith.constant dense<0.000000e+00> : vector<8x384xf32>
    %289 = tpu.matmul %286, %288, %cst_109 {dimension_numbers = #tpu.dot_dimension_numbers<[1], [0], [0], [1], [0, 0, 1, 1], [], []>} : vector<8x256xbf16>, vector<256x384xbf16>, vector<8x384xf32> -> vector<8x384xf32>
    %c0_110 = arith.constant 0 : index
    %c0_111 = arith.constant 0 : index
    %c0_112 = arith.constant 0 : index
    %290 = vector.load %arg7[%c0_110, %c0_111, %c0_112] : memref<1x1x384xf32, #tpu.memory_space<vmem>>, vector<1x1x384xf32>
    %291 = vector.shape_cast %290 : vector<1x1x384xf32> to vector<1x384xf32>
    %292 = vector.broadcast %291 : vector<1x384xf32> to vector<8x384xf32>
    %293 = arith.addf %289, %292 : vector<8x384xf32>
    %294 = vector.extract_strided_slice %293 {offsets = [0, 0], sizes = [8, 128], strides = [1, 1]} : vector<8x384xf32> to vector<8x128xf32>
    %295 = vector.extract_strided_slice %293 {offsets = [0, 128], sizes = [8, 128], strides = [1, 1]} : vector<8x384xf32> to vector<8x128xf32>
    %296 = vector.extract_strided_slice %293 {offsets = [0, 256], sizes = [8, 128], strides = [1, 1]} : vector<8x384xf32> to vector<8x128xf32>
    %297 = arith.negf %294 : vector<8x128xf32>
    %298 = math.exp %297 : vector<8x128xf32>
    %cst_113 = arith.constant 1.000000e+00 : f32
    %299 = vector.broadcast %cst_113 : f32 to vector<8x128xf32>
    %300 = arith.addf %299, %298 : vector<8x128xf32>
    %301 = arith.divf %299, %300 : vector<8x128xf32>
    %302 = arith.negf %295 : vector<8x128xf32>
    %303 = math.exp %302 : vector<8x128xf32>
    %cst_114 = arith.constant 1.000000e+00 : f32
    %304 = vector.broadcast %cst_114 : f32 to vector<8x128xf32>
    %305 = arith.addf %304, %303 : vector<8x128xf32>
    %306 = arith.divf %304, %305 : vector<8x128xf32>
    %307 = arith.mulf %301, %284 : vector<8x128xf32>
    %308 = arith.addf %296, %307 : vector<8x128xf32>
    %309 = math.tanh %308 : vector<8x128xf32>
    %cst_115 = arith.constant 1.000000e+00 : f32
    %310 = vector.broadcast %cst_115 : f32 to vector<8x128xf32>
    %311 = arith.subf %310, %306 : vector<8x128xf32>
    %312 = arith.mulf %311, %309 : vector<8x128xf32>
    %313 = arith.mulf %306, %238 : vector<8x128xf32>
    %314 = arith.addf %312, %313 : vector<8x128xf32>
    %c3_i32 = arith.constant 3 : i32
    %315 = vector.broadcast %c3_i32 : i32 to vector<8x1xi32>
    %316 = arith.cmpi eq, %12, %315 : vector<8x1xi32>
    %317 = vector.shape_cast %316 : vector<8x1xi1> to vector<8x1xi1>
    %318 = vector.broadcast %317 : vector<8x1xi1> to vector<8x128xi1>
    %319 = arith.select %318, %314, %243 : vector<8x128xi1>, vector<8x128xf32>
    %c32 = arith.constant 32 : index
    %c0_116 = arith.constant 0 : index
    %320 = vector.load %arg14[%c32, %c0_116] : memref<64x384xf32, #tpu.memory_space<vmem>>, vector<8x384xf32>
    %321 = arith.truncf %276 : vector<8x128xf32> to vector<8x128xbf16>
    %c0_117 = arith.constant 0 : index
    %c0_118 = arith.constant 0 : index
    %322 = vector.load %arg4[%c0_117, %c0_118] : memref<128x384xbf16, #tpu.memory_space<vmem>>, vector<128x384xbf16>
    %cst_119 = arith.constant dense<0.000000e+00> : vector<8x384xf32>
    %323 = tpu.matmul %321, %322, %cst_119 {dimension_numbers = #tpu.dot_dimension_numbers<[1], [0], [0], [1], [0, 0, 1, 1], [], []>} : vector<8x128xbf16>, vector<128x384xbf16>, vector<8x384xf32> -> vector<8x384xf32>
    %c0_120 = arith.constant 0 : index
    %c0_121 = arith.constant 0 : index
    %324 = vector.load %arg5[%c0_120, %c0_121] : memref<1x384xf32, #tpu.memory_space<vmem>>, vector<1x384xf32>
    %325 = vector.broadcast %324 : vector<1x384xf32> to vector<8x384xf32>
    %326 = arith.addf %323, %325 : vector<8x384xf32>
    %327 = vector.extract_strided_slice %320 {offsets = [0, 0], sizes = [8, 128], strides = [1, 1]} : vector<8x384xf32> to vector<8x128xf32>
    %328 = vector.extract_strided_slice %326 {offsets = [0, 0], sizes = [8, 128], strides = [1, 1]} : vector<8x384xf32> to vector<8x128xf32>
    %329 = arith.addf %327, %328 : vector<8x128xf32>
    %330 = vector.extract_strided_slice %320 {offsets = [0, 128], sizes = [8, 128], strides = [1, 1]} : vector<8x384xf32> to vector<8x128xf32>
    %331 = vector.extract_strided_slice %326 {offsets = [0, 128], sizes = [8, 128], strides = [1, 1]} : vector<8x384xf32> to vector<8x128xf32>
    %332 = arith.addf %330, %331 : vector<8x128xf32>
    %333 = vector.extract_strided_slice %320 {offsets = [0, 256], sizes = [8, 128], strides = [1, 1]} : vector<8x384xf32> to vector<8x128xf32>
    %334 = vector.extract_strided_slice %326 {offsets = [0, 256], sizes = [8, 128], strides = [1, 1]} : vector<8x384xf32> to vector<8x128xf32>
    %335 = arith.negf %329 : vector<8x128xf32>
    %336 = math.exp %335 : vector<8x128xf32>
    %cst_122 = arith.constant 1.000000e+00 : f32
    %337 = vector.broadcast %cst_122 : f32 to vector<8x128xf32>
    %338 = arith.addf %337, %336 : vector<8x128xf32>
    %339 = arith.divf %337, %338 : vector<8x128xf32>
    %340 = arith.negf %332 : vector<8x128xf32>
    %341 = math.exp %340 : vector<8x128xf32>
    %cst_123 = arith.constant 1.000000e+00 : f32
    %342 = vector.broadcast %cst_123 : f32 to vector<8x128xf32>
    %343 = arith.addf %342, %341 : vector<8x128xf32>
    %344 = arith.divf %342, %343 : vector<8x128xf32>
    %345 = arith.mulf %339, %334 : vector<8x128xf32>
    %346 = arith.addf %333, %345 : vector<8x128xf32>
    %347 = math.tanh %346 : vector<8x128xf32>
    %cst_124 = arith.constant 1.000000e+00 : f32
    %348 = vector.broadcast %cst_124 : f32 to vector<8x128xf32>
    %349 = arith.subf %348, %344 : vector<8x128xf32>
    %350 = arith.mulf %349, %347 : vector<8x128xf32>
    %351 = arith.mulf %344, %276 : vector<8x128xf32>
    %352 = arith.addf %350, %351 : vector<8x128xf32>
    %353 = arith.truncf %314 : vector<8x128xf32> to vector<8x128xbf16>
    %c0_125 = arith.constant 0 : index
    %c0_126 = arith.constant 0 : index
    %c0_127 = arith.constant 0 : index
    %354 = vector.load %arg8[%c0_125, %c0_126, %c0_127] : memref<1x128x128xbf16, #tpu.memory_space<vmem>>, vector<1x128x128xbf16>
    %355 = vector.shape_cast %354 : vector<1x128x128xbf16> to vector<128x128xbf16>
    %cst_128 = arith.constant dense<0.000000e+00> : vector<8x128xf32>
    %356 = tpu.matmul %353, %355, %cst_128 {dimension_numbers = #tpu.dot_dimension_numbers<[1], [0], [0], [1], [0, 0, 1, 1], [], []>} : vector<8x128xbf16>, vector<128x128xbf16>, vector<8x128xf32> -> vector<8x128xf32>
    %c0_129 = arith.constant 0 : index
    %c0_130 = arith.constant 0 : index
    %c0_131 = arith.constant 0 : index
    %357 = vector.load %arg9[%c0_129, %c0_130, %c0_131] : memref<1x1x128xf32, #tpu.memory_space<vmem>>, vector<1x1x128xf32>
    %358 = vector.shape_cast %357 : vector<1x1x128xf32> to vector<1x128xf32>
    %359 = vector.broadcast %358 : vector<1x128xf32> to vector<8x128xf32>
    %360 = arith.addf %356, %359 : vector<8x128xf32>
    %361 = arith.truncf %352 : vector<8x128xf32> to vector<8x128xbf16>
    %362 = tpu.concatenate %361, %353 in 1 : vector<8x128xbf16>, vector<8x128xbf16> -> vector<8x256xbf16>
    %c0_132 = arith.constant 0 : index
    %c0_133 = arith.constant 0 : index
    %c0_134 = arith.constant 0 : index
    %363 = vector.load %arg6[%c0_132, %c0_133, %c0_134] : memref<1x256x384xbf16, #tpu.memory_space<vmem>>, vector<1x256x384xbf16>
    %364 = vector.shape_cast %363 : vector<1x256x384xbf16> to vector<256x384xbf16>
    %cst_135 = arith.constant dense<0.000000e+00> : vector<8x384xf32>
    %365 = tpu.matmul %362, %364, %cst_135 {dimension_numbers = #tpu.dot_dimension_numbers<[1], [0], [0], [1], [0, 0, 1, 1], [], []>} : vector<8x256xbf16>, vector<256x384xbf16>, vector<8x384xf32> -> vector<8x384xf32>
    %c0_136 = arith.constant 0 : index
    %c0_137 = arith.constant 0 : index
    %c0_138 = arith.constant 0 : index
    %366 = vector.load %arg7[%c0_136, %c0_137, %c0_138] : memref<1x1x384xf32, #tpu.memory_space<vmem>>, vector<1x1x384xf32>
    %367 = vector.shape_cast %366 : vector<1x1x384xf32> to vector<1x384xf32>
    %368 = vector.broadcast %367 : vector<1x384xf32> to vector<8x384xf32>
    %369 = arith.addf %365, %368 : vector<8x384xf32>
    %370 = vector.extract_strided_slice %369 {offsets = [0, 0], sizes = [8, 128], strides = [1, 1]} : vector<8x384xf32> to vector<8x128xf32>
    %371 = vector.extract_strided_slice %369 {offsets = [0, 128], sizes = [8, 128], strides = [1, 1]} : vector<8x384xf32> to vector<8x128xf32>
    %372 = vector.extract_strided_slice %369 {offsets = [0, 256], sizes = [8, 128], strides = [1, 1]} : vector<8x384xf32> to vector<8x128xf32>
    %373 = arith.negf %370 : vector<8x128xf32>
    %374 = math.exp %373 : vector<8x128xf32>
    %cst_139 = arith.constant 1.000000e+00 : f32
    %375 = vector.broadcast %cst_139 : f32 to vector<8x128xf32>
    %376 = arith.addf %375, %374 : vector<8x128xf32>
    %377 = arith.divf %375, %376 : vector<8x128xf32>
    %378 = arith.negf %371 : vector<8x128xf32>
    %379 = math.exp %378 : vector<8x128xf32>
    %cst_140 = arith.constant 1.000000e+00 : f32
    %380 = vector.broadcast %cst_140 : f32 to vector<8x128xf32>
    %381 = arith.addf %380, %379 : vector<8x128xf32>
    %382 = arith.divf %380, %381 : vector<8x128xf32>
    %383 = arith.mulf %377, %360 : vector<8x128xf32>
    %384 = arith.addf %372, %383 : vector<8x128xf32>
    %385 = math.tanh %384 : vector<8x128xf32>
    %cst_141 = arith.constant 1.000000e+00 : f32
    %386 = vector.broadcast %cst_141 : f32 to vector<8x128xf32>
    %387 = arith.subf %386, %382 : vector<8x128xf32>
    %388 = arith.mulf %387, %385 : vector<8x128xf32>
    %389 = arith.mulf %382, %314 : vector<8x128xf32>
    %390 = arith.addf %388, %389 : vector<8x128xf32>
    %c4_i32 = arith.constant 4 : i32
    %391 = vector.broadcast %c4_i32 : i32 to vector<8x1xi32>
    %392 = arith.cmpi eq, %12, %391 : vector<8x1xi32>
    %393 = vector.shape_cast %392 : vector<8x1xi1> to vector<8x1xi1>
    %394 = vector.broadcast %393 : vector<8x1xi1> to vector<8x128xi1>
    %395 = arith.select %394, %390, %319 : vector<8x128xi1>, vector<8x128xf32>
    %c40 = arith.constant 40 : index
    %c0_142 = arith.constant 0 : index
    %396 = vector.load %arg14[%c40, %c0_142] : memref<64x384xf32, #tpu.memory_space<vmem>>, vector<8x384xf32>
    %397 = arith.truncf %352 : vector<8x128xf32> to vector<8x128xbf16>
    %c0_143 = arith.constant 0 : index
    %c0_144 = arith.constant 0 : index
    %398 = vector.load %arg4[%c0_143, %c0_144] : memref<128x384xbf16, #tpu.memory_space<vmem>>, vector<128x384xbf16>
    %cst_145 = arith.constant dense<0.000000e+00> : vector<8x384xf32>
    %399 = tpu.matmul %397, %398, %cst_145 {dimension_numbers = #tpu.dot_dimension_numbers<[1], [0], [0], [1], [0, 0, 1, 1], [], []>} : vector<8x128xbf16>, vector<128x384xbf16>, vector<8x384xf32> -> vector<8x384xf32>
    %c0_146 = arith.constant 0 : index
    %c0_147 = arith.constant 0 : index
    %400 = vector.load %arg5[%c0_146, %c0_147] : memref<1x384xf32, #tpu.memory_space<vmem>>, vector<1x384xf32>
    %401 = vector.broadcast %400 : vector<1x384xf32> to vector<8x384xf32>
    %402 = arith.addf %399, %401 : vector<8x384xf32>
    %403 = vector.extract_strided_slice %396 {offsets = [0, 0], sizes = [8, 128], strides = [1, 1]} : vector<8x384xf32> to vector<8x128xf32>
    %404 = vector.extract_strided_slice %402 {offsets = [0, 0], sizes = [8, 128], strides = [1, 1]} : vector<8x384xf32> to vector<8x128xf32>
    %405 = arith.addf %403, %404 : vector<8x128xf32>
    %406 = vector.extract_strided_slice %396 {offsets = [0, 128], sizes = [8, 128], strides = [1, 1]} : vector<8x384xf32> to vector<8x128xf32>
    %407 = vector.extract_strided_slice %402 {offsets = [0, 128], sizes = [8, 128], strides = [1, 1]} : vector<8x384xf32> to vector<8x128xf32>
    %408 = arith.addf %406, %407 : vector<8x128xf32>
    %409 = vector.extract_strided_slice %396 {offsets = [0, 256], sizes = [8, 128], strides = [1, 1]} : vector<8x384xf32> to vector<8x128xf32>
    %410 = vector.extract_strided_slice %402 {offsets = [0, 256], sizes = [8, 128], strides = [1, 1]} : vector<8x384xf32> to vector<8x128xf32>
    %411 = arith.negf %405 : vector<8x128xf32>
    %412 = math.exp %411 : vector<8x128xf32>
    %cst_148 = arith.constant 1.000000e+00 : f32
    %413 = vector.broadcast %cst_148 : f32 to vector<8x128xf32>
    %414 = arith.addf %413, %412 : vector<8x128xf32>
    %415 = arith.divf %413, %414 : vector<8x128xf32>
    %416 = arith.negf %408 : vector<8x128xf32>
    %417 = math.exp %416 : vector<8x128xf32>
    %cst_149 = arith.constant 1.000000e+00 : f32
    %418 = vector.broadcast %cst_149 : f32 to vector<8x128xf32>
    %419 = arith.addf %418, %417 : vector<8x128xf32>
    %420 = arith.divf %418, %419 : vector<8x128xf32>
    %421 = arith.mulf %415, %410 : vector<8x128xf32>
    %422 = arith.addf %409, %421 : vector<8x128xf32>
    %423 = math.tanh %422 : vector<8x128xf32>
    %cst_150 = arith.constant 1.000000e+00 : f32
    %424 = vector.broadcast %cst_150 : f32 to vector<8x128xf32>
    %425 = arith.subf %424, %420 : vector<8x128xf32>
    %426 = arith.mulf %425, %423 : vector<8x128xf32>
    %427 = arith.mulf %420, %352 : vector<8x128xf32>
    %428 = arith.addf %426, %427 : vector<8x128xf32>
    %429 = arith.truncf %390 : vector<8x128xf32> to vector<8x128xbf16>
    %c0_151 = arith.constant 0 : index
    %c0_152 = arith.constant 0 : index
    %c0_153 = arith.constant 0 : index
    %430 = vector.load %arg8[%c0_151, %c0_152, %c0_153] : memref<1x128x128xbf16, #tpu.memory_space<vmem>>, vector<1x128x128xbf16>
    %431 = vector.shape_cast %430 : vector<1x128x128xbf16> to vector<128x128xbf16>
    %cst_154 = arith.constant dense<0.000000e+00> : vector<8x128xf32>
    %432 = tpu.matmul %429, %431, %cst_154 {dimension_numbers = #tpu.dot_dimension_numbers<[1], [0], [0], [1], [0, 0, 1, 1], [], []>} : vector<8x128xbf16>, vector<128x128xbf16>, vector<8x128xf32> -> vector<8x128xf32>
    %c0_155 = arith.constant 0 : index
    %c0_156 = arith.constant 0 : index
    %c0_157 = arith.constant 0 : index
    %433 = vector.load %arg9[%c0_155, %c0_156, %c0_157] : memref<1x1x128xf32, #tpu.memory_space<vmem>>, vector<1x1x128xf32>
    %434 = vector.shape_cast %433 : vector<1x1x128xf32> to vector<1x128xf32>
    %435 = vector.broadcast %434 : vector<1x128xf32> to vector<8x128xf32>
    %436 = arith.addf %432, %435 : vector<8x128xf32>
    %437 = arith.truncf %428 : vector<8x128xf32> to vector<8x128xbf16>
    %438 = tpu.concatenate %437, %429 in 1 : vector<8x128xbf16>, vector<8x128xbf16> -> vector<8x256xbf16>
    %c0_158 = arith.constant 0 : index
    %c0_159 = arith.constant 0 : index
    %c0_160 = arith.constant 0 : index
    %439 = vector.load %arg6[%c0_158, %c0_159, %c0_160] : memref<1x256x384xbf16, #tpu.memory_space<vmem>>, vector<1x256x384xbf16>
    %440 = vector.shape_cast %439 : vector<1x256x384xbf16> to vector<256x384xbf16>
    %cst_161 = arith.constant dense<0.000000e+00> : vector<8x384xf32>
    %441 = tpu.matmul %438, %440, %cst_161 {dimension_numbers = #tpu.dot_dimension_numbers<[1], [0], [0], [1], [0, 0, 1, 1], [], []>} : vector<8x256xbf16>, vector<256x384xbf16>, vector<8x384xf32> -> vector<8x384xf32>
    %c0_162 = arith.constant 0 : index
    %c0_163 = arith.constant 0 : index
    %c0_164 = arith.constant 0 : index
    %442 = vector.load %arg7[%c0_162, %c0_163, %c0_164] : memref<1x1x384xf32, #tpu.memory_space<vmem>>, vector<1x1x384xf32>
    %443 = vector.shape_cast %442 : vector<1x1x384xf32> to vector<1x384xf32>
    %444 = vector.broadcast %443 : vector<1x384xf32> to vector<8x384xf32>
    %445 = arith.addf %441, %444 : vector<8x384xf32>
    %446 = vector.extract_strided_slice %445 {offsets = [0, 0], sizes = [8, 128], strides = [1, 1]} : vector<8x384xf32> to vector<8x128xf32>
    %447 = vector.extract_strided_slice %445 {offsets = [0, 128], sizes = [8, 128], strides = [1, 1]} : vector<8x384xf32> to vector<8x128xf32>
    %448 = vector.extract_strided_slice %445 {offsets = [0, 256], sizes = [8, 128], strides = [1, 1]} : vector<8x384xf32> to vector<8x128xf32>
    %449 = arith.negf %446 : vector<8x128xf32>
    %450 = math.exp %449 : vector<8x128xf32>
    %cst_165 = arith.constant 1.000000e+00 : f32
    %451 = vector.broadcast %cst_165 : f32 to vector<8x128xf32>
    %452 = arith.addf %451, %450 : vector<8x128xf32>
    %453 = arith.divf %451, %452 : vector<8x128xf32>
    %454 = arith.negf %447 : vector<8x128xf32>
    %455 = math.exp %454 : vector<8x128xf32>
    %cst_166 = arith.constant 1.000000e+00 : f32
    %456 = vector.broadcast %cst_166 : f32 to vector<8x128xf32>
    %457 = arith.addf %456, %455 : vector<8x128xf32>
    %458 = arith.divf %456, %457 : vector<8x128xf32>
    %459 = arith.mulf %453, %436 : vector<8x128xf32>
    %460 = arith.addf %448, %459 : vector<8x128xf32>
    %461 = math.tanh %460 : vector<8x128xf32>
    %cst_167 = arith.constant 1.000000e+00 : f32
    %462 = vector.broadcast %cst_167 : f32 to vector<8x128xf32>
    %463 = arith.subf %462, %458 : vector<8x128xf32>
    %464 = arith.mulf %463, %461 : vector<8x128xf32>
    %465 = arith.mulf %458, %390 : vector<8x128xf32>
    %466 = arith.addf %464, %465 : vector<8x128xf32>
    %c5_i32 = arith.constant 5 : i32
    %467 = vector.broadcast %c5_i32 : i32 to vector<8x1xi32>
    %468 = arith.cmpi eq, %12, %467 : vector<8x1xi32>
    %469 = vector.shape_cast %468 : vector<8x1xi1> to vector<8x1xi1>
    %470 = vector.broadcast %469 : vector<8x1xi1> to vector<8x128xi1>
    %471 = arith.select %470, %466, %395 : vector<8x128xi1>, vector<8x128xf32>
    %c48 = arith.constant 48 : index
    %c0_168 = arith.constant 0 : index
    %472 = vector.load %arg14[%c48, %c0_168] : memref<64x384xf32, #tpu.memory_space<vmem>>, vector<8x384xf32>
    %473 = arith.truncf %428 : vector<8x128xf32> to vector<8x128xbf16>
    %c0_169 = arith.constant 0 : index
    %c0_170 = arith.constant 0 : index
    %474 = vector.load %arg4[%c0_169, %c0_170] : memref<128x384xbf16, #tpu.memory_space<vmem>>, vector<128x384xbf16>
    %cst_171 = arith.constant dense<0.000000e+00> : vector<8x384xf32>
    %475 = tpu.matmul %473, %474, %cst_171 {dimension_numbers = #tpu.dot_dimension_numbers<[1], [0], [0], [1], [0, 0, 1, 1], [], []>} : vector<8x128xbf16>, vector<128x384xbf16>, vector<8x384xf32> -> vector<8x384xf32>
    %c0_172 = arith.constant 0 : index
    %c0_173 = arith.constant 0 : index
    %476 = vector.load %arg5[%c0_172, %c0_173] : memref<1x384xf32, #tpu.memory_space<vmem>>, vector<1x384xf32>
    %477 = vector.broadcast %476 : vector<1x384xf32> to vector<8x384xf32>
    %478 = arith.addf %475, %477 : vector<8x384xf32>
    %479 = vector.extract_strided_slice %472 {offsets = [0, 0], sizes = [8, 128], strides = [1, 1]} : vector<8x384xf32> to vector<8x128xf32>
    %480 = vector.extract_strided_slice %478 {offsets = [0, 0], sizes = [8, 128], strides = [1, 1]} : vector<8x384xf32> to vector<8x128xf32>
    %481 = arith.addf %479, %480 : vector<8x128xf32>
    %482 = vector.extract_strided_slice %472 {offsets = [0, 128], sizes = [8, 128], strides = [1, 1]} : vector<8x384xf32> to vector<8x128xf32>
    %483 = vector.extract_strided_slice %478 {offsets = [0, 128], sizes = [8, 128], strides = [1, 1]} : vector<8x384xf32> to vector<8x128xf32>
    %484 = arith.addf %482, %483 : vector<8x128xf32>
    %485 = vector.extract_strided_slice %472 {offsets = [0, 256], sizes = [8, 128], strides = [1, 1]} : vector<8x384xf32> to vector<8x128xf32>
    %486 = vector.extract_strided_slice %478 {offsets = [0, 256], sizes = [8, 128], strides = [1, 1]} : vector<8x384xf32> to vector<8x128xf32>
    %487 = arith.negf %481 : vector<8x128xf32>
    %488 = math.exp %487 : vector<8x128xf32>
    %cst_174 = arith.constant 1.000000e+00 : f32
    %489 = vector.broadcast %cst_174 : f32 to vector<8x128xf32>
    %490 = arith.addf %489, %488 : vector<8x128xf32>
    %491 = arith.divf %489, %490 : vector<8x128xf32>
    %492 = arith.negf %484 : vector<8x128xf32>
    %493 = math.exp %492 : vector<8x128xf32>
    %cst_175 = arith.constant 1.000000e+00 : f32
    %494 = vector.broadcast %cst_175 : f32 to vector<8x128xf32>
    %495 = arith.addf %494, %493 : vector<8x128xf32>
    %496 = arith.divf %494, %495 : vector<8x128xf32>
    %497 = arith.mulf %491, %486 : vector<8x128xf32>
    %498 = arith.addf %485, %497 : vector<8x128xf32>
    %499 = math.tanh %498 : vector<8x128xf32>
    %cst_176 = arith.constant 1.000000e+00 : f32
    %500 = vector.broadcast %cst_176 : f32 to vector<8x128xf32>
    %501 = arith.subf %500, %496 : vector<8x128xf32>
    %502 = arith.mulf %501, %499 : vector<8x128xf32>
    %503 = arith.mulf %496, %428 : vector<8x128xf32>
    %504 = arith.addf %502, %503 : vector<8x128xf32>
    %505 = arith.truncf %466 : vector<8x128xf32> to vector<8x128xbf16>
    %c0_177 = arith.constant 0 : index
    %c0_178 = arith.constant 0 : index
    %c0_179 = arith.constant 0 : index
    %506 = vector.load %arg8[%c0_177, %c0_178, %c0_179] : memref<1x128x128xbf16, #tpu.memory_space<vmem>>, vector<1x128x128xbf16>
    %507 = vector.shape_cast %506 : vector<1x128x128xbf16> to vector<128x128xbf16>
    %cst_180 = arith.constant dense<0.000000e+00> : vector<8x128xf32>
    %508 = tpu.matmul %505, %507, %cst_180 {dimension_numbers = #tpu.dot_dimension_numbers<[1], [0], [0], [1], [0, 0, 1, 1], [], []>} : vector<8x128xbf16>, vector<128x128xbf16>, vector<8x128xf32> -> vector<8x128xf32>
    %c0_181 = arith.constant 0 : index
    %c0_182 = arith.constant 0 : index
    %c0_183 = arith.constant 0 : index
    %509 = vector.load %arg9[%c0_181, %c0_182, %c0_183] : memref<1x1x128xf32, #tpu.memory_space<vmem>>, vector<1x1x128xf32>
    %510 = vector.shape_cast %509 : vector<1x1x128xf32> to vector<1x128xf32>
    %511 = vector.broadcast %510 : vector<1x128xf32> to vector<8x128xf32>
    %512 = arith.addf %508, %511 : vector<8x128xf32>
    %513 = arith.truncf %504 : vector<8x128xf32> to vector<8x128xbf16>
    %514 = tpu.concatenate %513, %505 in 1 : vector<8x128xbf16>, vector<8x128xbf16> -> vector<8x256xbf16>
    %c0_184 = arith.constant 0 : index
    %c0_185 = arith.constant 0 : index
    %c0_186 = arith.constant 0 : index
    %515 = vector.load %arg6[%c0_184, %c0_185, %c0_186] : memref<1x256x384xbf16, #tpu.memory_space<vmem>>, vector<1x256x384xbf16>
    %516 = vector.shape_cast %515 : vector<1x256x384xbf16> to vector<256x384xbf16>
    %cst_187 = arith.constant dense<0.000000e+00> : vector<8x384xf32>
    %517 = tpu.matmul %514, %516, %cst_187 {dimension_numbers = #tpu.dot_dimension_numbers<[1], [0], [0], [1], [0, 0, 1, 1], [], []>} : vector<8x256xbf16>, vector<256x384xbf16>, vector<8x384xf32> -> vector<8x384xf32>
    %c0_188 = arith.constant 0 : index
    %c0_189 = arith.constant 0 : index
    %c0_190 = arith.constant 0 : index
    %518 = vector.load %arg7[%c0_188, %c0_189, %c0_190] : memref<1x1x384xf32, #tpu.memory_space<vmem>>, vector<1x1x384xf32>
    %519 = vector.shape_cast %518 : vector<1x1x384xf32> to vector<1x384xf32>
    %520 = vector.broadcast %519 : vector<1x384xf32> to vector<8x384xf32>
    %521 = arith.addf %517, %520 : vector<8x384xf32>
    %522 = vector.extract_strided_slice %521 {offsets = [0, 0], sizes = [8, 128], strides = [1, 1]} : vector<8x384xf32> to vector<8x128xf32>
    %523 = vector.extract_strided_slice %521 {offsets = [0, 128], sizes = [8, 128], strides = [1, 1]} : vector<8x384xf32> to vector<8x128xf32>
    %524 = vector.extract_strided_slice %521 {offsets = [0, 256], sizes = [8, 128], strides = [1, 1]} : vector<8x384xf32> to vector<8x128xf32>
    %525 = arith.negf %522 : vector<8x128xf32>
    %526 = math.exp %525 : vector<8x128xf32>
    %cst_191 = arith.constant 1.000000e+00 : f32
    %527 = vector.broadcast %cst_191 : f32 to vector<8x128xf32>
    %528 = arith.addf %527, %526 : vector<8x128xf32>
    %529 = arith.divf %527, %528 : vector<8x128xf32>
    %530 = arith.negf %523 : vector<8x128xf32>
    %531 = math.exp %530 : vector<8x128xf32>
    %cst_192 = arith.constant 1.000000e+00 : f32
    %532 = vector.broadcast %cst_192 : f32 to vector<8x128xf32>
    %533 = arith.addf %532, %531 : vector<8x128xf32>
    %534 = arith.divf %532, %533 : vector<8x128xf32>
    %535 = arith.mulf %529, %512 : vector<8x128xf32>
    %536 = arith.addf %524, %535 : vector<8x128xf32>
    %537 = math.tanh %536 : vector<8x128xf32>
    %cst_193 = arith.constant 1.000000e+00 : f32
    %538 = vector.broadcast %cst_193 : f32 to vector<8x128xf32>
    %539 = arith.subf %538, %534 : vector<8x128xf32>
    %540 = arith.mulf %539, %537 : vector<8x128xf32>
    %541 = arith.mulf %534, %466 : vector<8x128xf32>
    %542 = arith.addf %540, %541 : vector<8x128xf32>
    %c6_i32 = arith.constant 6 : i32
    %543 = vector.broadcast %c6_i32 : i32 to vector<8x1xi32>
    %544 = arith.cmpi eq, %12, %543 : vector<8x1xi32>
    %545 = vector.shape_cast %544 : vector<8x1xi1> to vector<8x1xi1>
    %546 = vector.broadcast %545 : vector<8x1xi1> to vector<8x128xi1>
    %547 = arith.select %546, %542, %471 : vector<8x128xi1>, vector<8x128xf32>
    %c56 = arith.constant 56 : index
    %c0_194 = arith.constant 0 : index
    %548 = vector.load %arg14[%c56, %c0_194] : memref<64x384xf32, #tpu.memory_space<vmem>>, vector<8x384xf32>
    %549 = arith.truncf %504 : vector<8x128xf32> to vector<8x128xbf16>
    %c0_195 = arith.constant 0 : index
    %c0_196 = arith.constant 0 : index
    %550 = vector.load %arg4[%c0_195, %c0_196] : memref<128x384xbf16, #tpu.memory_space<vmem>>, vector<128x384xbf16>
    %cst_197 = arith.constant dense<0.000000e+00> : vector<8x384xf32>
    %551 = tpu.matmul %549, %550, %cst_197 {dimension_numbers = #tpu.dot_dimension_numbers<[1], [0], [0], [1], [0, 0, 1, 1], [], []>} : vector<8x128xbf16>, vector<128x384xbf16>, vector<8x384xf32> -> vector<8x384xf32>
    %c0_198 = arith.constant 0 : index
    %c0_199 = arith.constant 0 : index
    %552 = vector.load %arg5[%c0_198, %c0_199] : memref<1x384xf32, #tpu.memory_space<vmem>>, vector<1x384xf32>
    %553 = vector.broadcast %552 : vector<1x384xf32> to vector<8x384xf32>
    %554 = arith.addf %551, %553 : vector<8x384xf32>
    %555 = vector.extract_strided_slice %548 {offsets = [0, 0], sizes = [8, 128], strides = [1, 1]} : vector<8x384xf32> to vector<8x128xf32>
    %556 = vector.extract_strided_slice %554 {offsets = [0, 0], sizes = [8, 128], strides = [1, 1]} : vector<8x384xf32> to vector<8x128xf32>
    %557 = arith.addf %555, %556 : vector<8x128xf32>
    %558 = vector.extract_strided_slice %548 {offsets = [0, 128], sizes = [8, 128], strides = [1, 1]} : vector<8x384xf32> to vector<8x128xf32>
    %559 = vector.extract_strided_slice %554 {offsets = [0, 128], sizes = [8, 128], strides = [1, 1]} : vector<8x384xf32> to vector<8x128xf32>
    %560 = arith.addf %558, %559 : vector<8x128xf32>
    %561 = vector.extract_strided_slice %548 {offsets = [0, 256], sizes = [8, 128], strides = [1, 1]} : vector<8x384xf32> to vector<8x128xf32>
    %562 = vector.extract_strided_slice %554 {offsets = [0, 256], sizes = [8, 128], strides = [1, 1]} : vector<8x384xf32> to vector<8x128xf32>
    %563 = arith.negf %557 : vector<8x128xf32>
    %564 = math.exp %563 : vector<8x128xf32>
    %cst_200 = arith.constant 1.000000e+00 : f32
    %565 = vector.broadcast %cst_200 : f32 to vector<8x128xf32>
    %566 = arith.addf %565, %564 : vector<8x128xf32>
    %567 = arith.divf %565, %566 : vector<8x128xf32>
    %568 = arith.negf %560 : vector<8x128xf32>
    %569 = math.exp %568 : vector<8x128xf32>
    %cst_201 = arith.constant 1.000000e+00 : f32
    %570 = vector.broadcast %cst_201 : f32 to vector<8x128xf32>
    %571 = arith.addf %570, %569 : vector<8x128xf32>
    %572 = arith.divf %570, %571 : vector<8x128xf32>
    %573 = arith.mulf %567, %562 : vector<8x128xf32>
    %574 = arith.addf %561, %573 : vector<8x128xf32>
    %575 = math.tanh %574 : vector<8x128xf32>
    %cst_202 = arith.constant 1.000000e+00 : f32
    %576 = vector.broadcast %cst_202 : f32 to vector<8x128xf32>
    %577 = arith.subf %576, %572 : vector<8x128xf32>
    %578 = arith.mulf %577, %575 : vector<8x128xf32>
    %579 = arith.mulf %572, %504 : vector<8x128xf32>
    %580 = arith.addf %578, %579 : vector<8x128xf32>
    %581 = arith.truncf %542 : vector<8x128xf32> to vector<8x128xbf16>
    %c0_203 = arith.constant 0 : index
    %c0_204 = arith.constant 0 : index
    %c0_205 = arith.constant 0 : index
    %582 = vector.load %arg8[%c0_203, %c0_204, %c0_205] : memref<1x128x128xbf16, #tpu.memory_space<vmem>>, vector<1x128x128xbf16>
    %583 = vector.shape_cast %582 : vector<1x128x128xbf16> to vector<128x128xbf16>
    %cst_206 = arith.constant dense<0.000000e+00> : vector<8x128xf32>
    %584 = tpu.matmul %581, %583, %cst_206 {dimension_numbers = #tpu.dot_dimension_numbers<[1], [0], [0], [1], [0, 0, 1, 1], [], []>} : vector<8x128xbf16>, vector<128x128xbf16>, vector<8x128xf32> -> vector<8x128xf32>
    %c0_207 = arith.constant 0 : index
    %c0_208 = arith.constant 0 : index
    %c0_209 = arith.constant 0 : index
    %585 = vector.load %arg9[%c0_207, %c0_208, %c0_209] : memref<1x1x128xf32, #tpu.memory_space<vmem>>, vector<1x1x128xf32>
    %586 = vector.shape_cast %585 : vector<1x1x128xf32> to vector<1x128xf32>
    %587 = vector.broadcast %586 : vector<1x128xf32> to vector<8x128xf32>
    %588 = arith.addf %584, %587 : vector<8x128xf32>
    %589 = arith.truncf %580 : vector<8x128xf32> to vector<8x128xbf16>
    %590 = tpu.concatenate %589, %581 in 1 : vector<8x128xbf16>, vector<8x128xbf16> -> vector<8x256xbf16>
    %c0_210 = arith.constant 0 : index
    %c0_211 = arith.constant 0 : index
    %c0_212 = arith.constant 0 : index
    %591 = vector.load %arg6[%c0_210, %c0_211, %c0_212] : memref<1x256x384xbf16, #tpu.memory_space<vmem>>, vector<1x256x384xbf16>
    %592 = vector.shape_cast %591 : vector<1x256x384xbf16> to vector<256x384xbf16>
    %cst_213 = arith.constant dense<0.000000e+00> : vector<8x384xf32>
    %593 = tpu.matmul %590, %592, %cst_213 {dimension_numbers = #tpu.dot_dimension_numbers<[1], [0], [0], [1], [0, 0, 1, 1], [], []>} : vector<8x256xbf16>, vector<256x384xbf16>, vector<8x384xf32> -> vector<8x384xf32>
    %c0_214 = arith.constant 0 : index
    %c0_215 = arith.constant 0 : index
    %c0_216 = arith.constant 0 : index
    %594 = vector.load %arg7[%c0_214, %c0_215, %c0_216] : memref<1x1x384xf32, #tpu.memory_space<vmem>>, vector<1x1x384xf32>
    %595 = vector.shape_cast %594 : vector<1x1x384xf32> to vector<1x384xf32>
    %596 = vector.broadcast %595 : vector<1x384xf32> to vector<8x384xf32>
    %597 = arith.addf %593, %596 : vector<8x384xf32>
    %598 = vector.extract_strided_slice %597 {offsets = [0, 0], sizes = [8, 128], strides = [1, 1]} : vector<8x384xf32> to vector<8x128xf32>
    %599 = vector.extract_strided_slice %597 {offsets = [0, 128], sizes = [8, 128], strides = [1, 1]} : vector<8x384xf32> to vector<8x128xf32>
    %600 = vector.extract_strided_slice %597 {offsets = [0, 256], sizes = [8, 128], strides = [1, 1]} : vector<8x384xf32> to vector<8x128xf32>
    %601 = arith.negf %598 : vector<8x128xf32>
    %602 = math.exp %601 : vector<8x128xf32>
    %cst_217 = arith.constant 1.000000e+00 : f32
    %603 = vector.broadcast %cst_217 : f32 to vector<8x128xf32>
    %604 = arith.addf %603, %602 : vector<8x128xf32>
    %605 = arith.divf %603, %604 : vector<8x128xf32>
    %606 = arith.negf %599 : vector<8x128xf32>
    %607 = math.exp %606 : vector<8x128xf32>
    %cst_218 = arith.constant 1.000000e+00 : f32
    %608 = vector.broadcast %cst_218 : f32 to vector<8x128xf32>
    %609 = arith.addf %608, %607 : vector<8x128xf32>
    %610 = arith.divf %608, %609 : vector<8x128xf32>
    %611 = arith.mulf %605, %588 : vector<8x128xf32>
    %612 = arith.addf %600, %611 : vector<8x128xf32>
    %613 = math.tanh %612 : vector<8x128xf32>
    %cst_219 = arith.constant 1.000000e+00 : f32
    %614 = vector.broadcast %cst_219 : f32 to vector<8x128xf32>
    %615 = arith.subf %614, %610 : vector<8x128xf32>
    %616 = arith.mulf %615, %613 : vector<8x128xf32>
    %617 = arith.mulf %610, %542 : vector<8x128xf32>
    %618 = arith.addf %616, %617 : vector<8x128xf32>
    %c7_i32 = arith.constant 7 : i32
    %619 = vector.broadcast %c7_i32 : i32 to vector<8x1xi32>
    %620 = arith.cmpi eq, %12, %619 : vector<8x1xi32>
    %621 = vector.shape_cast %620 : vector<8x1xi1> to vector<8x1xi1>
    %622 = vector.broadcast %621 : vector<8x1xi1> to vector<8x128xi1>
    %623 = arith.select %622, %618, %547 : vector<8x128xi1>, vector<8x128xf32>
    %624 = arith.truncf %623 : vector<8x128xf32> to vector<8x128xbf16>
    %c0_220 = arith.constant 0 : index
    %c0_221 = arith.constant 0 : index
    %625 = vector.load %arg10[%c0_220, %c0_221] : memref<128x128xbf16, #tpu.memory_space<vmem>>, vector<128x128xbf16>
    %cst_222 = arith.constant dense<0.000000e+00> : vector<8x128xf32>
    %626 = tpu.matmul %624, %625, %cst_222 {dimension_numbers = #tpu.dot_dimension_numbers<[1], [0], [0], [1], [0, 0, 1, 1], [], []>} : vector<8x128xbf16>, vector<128x128xbf16>, vector<8x128xf32> -> vector<8x128xf32>
    %c0_223 = arith.constant 0 : index
    %c0_224 = arith.constant 0 : index
    %627 = vector.load %arg11[%c0_223, %c0_224] : memref<1x128xf32, #tpu.memory_space<vmem>>, vector<1x128xf32>
    %628 = vector.broadcast %627 : vector<1x128xf32> to vector<8x128xf32>
    %629 = arith.addf %626, %628 : vector<8x128xf32>
    %cst_225 = arith.constant 0.000000e+00 : f32
    %630 = vector.broadcast %cst_225 : f32 to vector<8x128xf32>
    %631 = arith.maximumf %629, %630 : vector<8x128xf32>
    %632 = arith.truncf %631 : vector<8x128xf32> to vector<8x128xbf16>
    %c0_226 = arith.constant 0 : index
    %c0_227 = arith.constant 0 : index
    %633 = vector.load %arg12[%c0_226, %c0_227] : memref<128x256xbf16, #tpu.memory_space<vmem>>, vector<128x256xbf16>
    %cst_228 = arith.constant dense<0.000000e+00> : vector<8x256xf32>
    %634 = tpu.matmul %632, %633, %cst_228 {dimension_numbers = #tpu.dot_dimension_numbers<[1], [0], [0], [1], [0, 0, 1, 1], [], []>} : vector<8x128xbf16>, vector<128x256xbf16>, vector<8x256xf32> -> vector<8x256xf32>
    %c0_229 = arith.constant 0 : index
    %c0_230 = arith.constant 0 : index
    %635 = vector.load %arg13[%c0_229, %c0_230] : memref<8x256xf32, #tpu.memory_space<vmem>>, vector<8x256xf32>
    tpu.vector_store %arg13[%c0_229, %c0_230], %634 {strides = array<i32>} : memref<8x256xf32, #tpu.memory_space<vmem>>, vector<8x256xf32>,
    return
  }
  func.func @transform_0(%arg0: i32) -> (i32, i32) {
    %c0_i32 = arith.constant 0 : i32
    %c0_i32_0 = arith.constant 0 : i32
    %c0_i32_1 = arith.constant 0 : i32
    return %c0_i32, %c0_i32_0 : i32, i32
  }
  func.func @transform_1(%arg0: i32) -> (i32, i32) {
    %c0_i32 = arith.constant 0 : i32
    %c0_i32_0 = arith.constant 0 : i32
    %c0_i32_1 = arith.constant 0 : i32
    return %c0_i32, %c0_i32_0 : i32, i32
  }
  func.func @transform_2(%arg0: i32) -> (i32, i32) {
    %c0_i32 = arith.constant 0 : i32
    %c0_i32_0 = arith.constant 0 : i32
    %c0_i32_1 = arith.constant 0 : i32
    return %c0_i32, %c0_i32_0 : i32, i32
  }
  func.func @transform_3(%arg0: i32) -> (i32, i32) {
    %c0_i32 = arith.constant 0 : i32
    %c0_i32_0 = arith.constant 0 : i32
    %c0_i32_1 = arith.constant 0 : i32
    return %c0_i32, %c0_i32_0 : i32, i32
  }
  func.func @transform_4(%arg0: i32) -> (i32, i32) {
    %c0_i32 = arith.constant 0 : i32
    %c0_i32_0 = arith.constant 0 : i32
    %c0_i32_1 = arith.constant 0 : i32
    return %c0_i32, %c0_i32_0 : i32, i32
  }
  func.func @transform_5(%arg0: i32) -> (i32, i32, i32) {
    %c0_i32 = arith.constant 0 : i32
    %c0_i32_0 = arith.constant 0 : i32
    %c0_i32_1 = arith.constant 0 : i32
    %c0_i32_2 = arith.constant 0 : i32
    return %c0_i32, %c0_i32_0, %c0_i32_1 : i32, i32, i32
  }
  func.func @transform_6(%arg0: i32) -> (i32, i32, i32) {
    %c0_i32 = arith.constant 0 : i32
    %c0_i32_0 = arith.constant 0 : i32
    %c0_i32_1 = arith.constant 0 : i32
    %c0_i32_2 = arith.constant 0 : i32
    return %c0_i32, %c0_i32_0, %c0_i32_1 : i32, i32, i32
  }
  func.func @transform_7(%arg0: i32) -> (i32, i32, i32) {
    %c0_i32 = arith.constant 0 : i32
    %c0_i32_0 = arith.constant 0 : i32
    %c0_i32_1 = arith.constant 0 : i32
    %c0_i32_2 = arith.constant 0 : i32
    return %c0_i32, %c0_i32_0, %c0_i32_1 : i32, i32, i32
  }
  func.func @transform_8(%arg0: i32) -> (i32, i32, i32) {
    %c0_i32 = arith.constant 0 : i32
    %c0_i32_0 = arith.constant 0 : i32
    %c0_i32_1 = arith.constant 0 : i32
    %c0_i32_2 = arith.constant 0 : i32
    return %c0_i32, %c0_i32_0, %c0_i32_1 : i32, i32, i32
  }
  func.func @transform_9(%arg0: i32) -> (i32, i32) {
    %c0_i32 = arith.constant 0 : i32
    %c0_i32_0 = arith.constant 0 : i32
    %c0_i32_1 = arith.constant 0 : i32
    return %c0_i32, %c0_i32_0 : i32, i32
  }
  func.func @transform_10(%arg0: i32) -> (i32, i32) {
    %c0_i32 = arith.constant 0 : i32
    %c0_i32_0 = arith.constant 0 : i32
    %c0_i32_1 = arith.constant 0 : i32
    return %c0_i32, %c0_i32_0 : i32, i32
  }
  func.func @transform_11(%arg0: i32) -> (i32, i32) {
    %c0_i32 = arith.constant 0 : i32
    %c0_i32_0 = arith.constant 0 : i32
    %c0_i32_1 = arith.constant 0 : i32
    return %c0_i32, %c0_i32_0 : i32, i32
  }
  func.func @transform_12(%arg0: i32) -> (i32, i32) {
    %c0_i32 = arith.constant 0 : i32
    %c0_i32_0 = arith.constant 0 : i32
    %c0_i32_1 = arith.constant 0 : i32
    return %c0_i32, %c0_i32_0 : i32, i32
  }
}

</mosaic_0001>

<bundles_post_ra>
// kernel: gru4rec_forward.1
= control target key start
LH: loop header
LB: loop body
LE: loop exit
PB: predicated region body
PF: predicated region fallthrough
CT: control target
= control target key end

     0   :  { %17 = vsyncpa [#allocation4], 0  ;;  %s6205_s0 = inlined_call_operand.vmem [shape: s32[64,1], index: 0, kind: input, shape index: {}]   ;;  %s6206_s1 = inlined_call_operand.vmem [shape: s32[8,1], index: 1, kind: input, shape index: {}]   ;;  %s6207_s2 = inlined_call_operand.hbm [shape: bf16[256,384], index: 2, kind: input, shape index: {}]   ;;  %s6208_s3 = inlined_call_operand.hbm [shape: bf16[128,384], index: 3, kind: input, shape index: {}]   ;;  %s6209_s4 = inlined_call_operand.vmem [shape: f32[1,384], index: 4, kind: input, shape index: {}]   ;;  %s6210_s5 = inlined_call_operand.hbm [shape: bf16[1,256,384], index: 5, kind: input, shape index: {}]   ;;  %s6211_s6 = inlined_call_operand.vmem [shape: f32[1,1,384], index: 6, kind: input, shape index: {}]   ;;  %s6212_s7 = inlined_call_operand.vmem [shape: bf16[1,128,128], index: 7, kind: input, shape index: {}]   ;;  %s6213_s8 = inlined_call_operand.vmem [shape: f32[1,1,128], index: 8, kind: input, shape index: {}]   ;;  %s6214_s9 = inlined_call_operand.hbm [shape: bf16[128,128], index: 9, kind: input, shape index: {}]   ;;  %s6215_s10 = inlined_call_operand.vmem [shape: f32[1,128], index: 10, kind: input, shape index: {}]   ;;  %s6216_s11 = inlined_call_operand.hbm [shape: bf16[128,256], index: 11, kind: input, shape index: {}]   ;;  %s6217_s12 = inlined_call_operand.hbm [shape: f32[8,256], index: 12, kind: output, shape index: {}]  }
   0x1   :  { %18 = vsyncpa [#allocation7], 0 }
   0x2   :  { %19 = vsyncpa [#allocation10], 0 }
   0x3   :  { %20 = vsyncpa [#allocation5], 0  ;;  %s42_s23 = sshll.u32 %s6208_s3, 4  ;;  %s4600_s24 = smov [#allocation6]   ;;  %s43_s23 = int_to_ptr.hbm [resolvable:$true] %s42_s23 }
   0x4   :  { %s44_s25 = sshll.u32 %s4600_s24, 4  ;;  %s76_s28 = sshll.u32 %s6214_s9, 4  ;;  %s45_s25 = int_to_ptr.vmem [resolvable:$true] %s44_s25  ;;  %s77_s28 = int_to_ptr.hbm [resolvable:$true] %s76_s28 }
   0x5   :  { %s4601_s29 = smov 192   ;;  %s4602_s30 = smov 12  }
   0x6   :  { %50 = dma.hbm_to_vmem [thread:$0]  %s43_s23, 3072, %s45_s25, [#allocation7], %s4601_s29, %s4601_s29, %s4602_s30  }
   0x7   :  { %s4603_s13 = smov [#allocation9]   ;;  %s4604_s15 = smov 64  }
   0x8   :  { %s78_s14 = sshll.u32 %s4603_s13, 4  ;;  %s4605_s16 = smov 4   ;;  %s79_s14 = int_to_ptr.vmem [resolvable:$true] %s78_s14 }
   0x9   :  { %84 = dma.hbm_to_vmem [thread:$0]  %s77_s28, 1024, %s79_s14, [#allocation10], %s4604_s15, %s4604_s15, %s4605_s16  }
   0xa   :  { %s29_s18 = sshll.u32 %s6207_s2, 4  ;;  %s4606_s19 = smov [#allocation3]   ;;  %s30_s18 = int_to_ptr.hbm [resolvable:$true] %s29_s18 }
   0xb   :  { %s31_s20 = sshll.u32 %s4606_s19, 4  ;;  %s57_s22 = sshll.u32 %s6210_s5, 4  ;;  %s32_s20 = int_to_ptr.vmem [resolvable:$true] %s31_s20  ;;  %s58_s22 = int_to_ptr.hbm [resolvable:$true] %s57_s22 }
   0xc   :  { %37 = dma.hbm_to_vmem [thread:$0]  %s30_s18, 6144, %s32_s20, [#allocation4], %s4601_s29, %s4601_s29, %s4602_s30  }
   0xd   :  { %s4607_s23 = smov [#allocation8]   ;;  %s91_s27 = sshll.u32 %s6216_s11, 4  ;;  %s92_s27 = int_to_ptr.hbm [resolvable:$true] %s91_s27 }
   0xe   :  { %s59_s24 = sshll.u32 %s4607_s23, 4  ;;  %s4608_s2 = smov [#allocation11]   ;;  %s60_s24 = int_to_ptr.vmem [resolvable:$true] %s59_s24 }
   0xf   :  { %65 = dma.hbm_to_vmem [thread:$0]  %s58_s22, 6144, %s60_s24, [#allocation7], %s4601_s29, %s4601_s29, %s4602_s30  }
  0x10   :  { %s93_s28 = sshll.u32 %s4608_s2, 4  ;;  %s4609_s13 = smov 128   ;;  %s94_s28 = int_to_ptr.vmem [resolvable:$true] %s93_s28 }
  0x11   :  { %s4610_s14 = smov 8  }
  0x12   :  { %99 = dma.hbm_to_vmem [thread:$0]  %s92_s27, 2048, %s94_s28, [#allocation10], %s4609_s13, %s4609_s13, %s4610_s14  }
  0x13   :  { %4592 = dma.done.wait [#allocation4], 6144  }
  0x14   :  { %4593 = vsyncadd [#allocation4], 4294961152 }
  0x15   :  { %4594 = dma.done.wait [#allocation7], 9216  }
  0x16   :  { %4595 = vsyncadd [#allocation7], 4294958080 }
  0x17   :  { %4596 = dma.done.wait [#allocation10], 3072  }
  0x18   :  { %4597 = vsyncadd [#allocation10], 4294964224  ;;  %v6218_v0 = vmov 0   ;;  %v123_v1 = vld [vmem:[%s6205_s0 + $0x10] sm:$0xff]  ;;  %v121_v2 = vld [vmem:[%s6205_s0] sm:$0xff]  ;;  %s4613_s28 = smov [#allocation12]  }
  0x19   :  { %4266 = vset.pattern.permute.xlu1 %v6218_v0  ;;  %4265 = vset.pattern.permute.xlu0 %v6218_v0  ;;  %v125_v3 = vld [vmem:[%s6205_s0 + $0x20] sm:$0xff]  ;;  %v124_v6 = vld [vmem:[%s6205_s0 + $0x18] sm:$0xff]  ;;  %v122_v7 = vld [vmem:[%s6205_s0 + $0x8] sm:$0xff]  ;;  %s3380_s13 = sshll.u32 %s4613_s28, 4  ;;  %s3382_s11 = sshll.u32 %s6217_s12, 4  ;;  %s3381_s13 = int_to_ptr.vmem [resolvable:$true] %s3380_s13  ;;  %s3383_s11 = int_to_ptr.hbm [resolvable:$true] %s3382_s11 }
  0x1a   :  { %4267 = vset.pattern.permute.xlu2 %v6218_v0  ;;  %139 = vperm.xlu1 %4266, %v123_v1   ;;  %v730_v4 = vld [vmem:[%s6206_s1] sm:$0xff]  ;;  %v126_v8 = vld [vmem:[%s6205_s0 + $0x28] sm:$0xff]  ;;  %v4121_v10 = vld [vmem:[#allocation3 + $0xb0] sm:$0xf0] }
  0x1b   :  { %133 = vperm.xlu0 %4265, %v121_v2   ;;  %145 = vperm.xlu2 %4267, %v125_v3   ;;  %v4709_v5 = vadd.s32 4294967295, %v730_v4  ;;  %v3496_v9 = vld [vmem:[#allocation3 + $0xa8] sm:$0xf]  ;;  %v4145_v14 = vld [vmem:[#allocation3 + $0x170] sm:$0xf0]  ;;  %v128_v19 = vld [vmem:[%s6205_s0 + $0x38] sm:$0xff] }
  0x1c   :  { %v3497_v12 = vor.u32 %v4121_v10, %v3496_v9  ;;  %v3592_v13 = vld [vmem:[#allocation3 + $0x168] sm:$0xf]  ;;  %v4120_v16 = vld [vmem:[#allocation3 + $0xac] sm:$0xf]  ;;  %v3498_v17 = vld [vmem:[#allocation3 + $0xb4] sm:$0xf0] }
  0x1d   :  { %vm1522_vm0 = vcmp.eq.s32.totalorder %v4709_v5, 0  ;;  %v3593_v15 = vor.u32 %v4145_v14, %v3592_v13  ;;  %v4144_v18 = vld [vmem:[#allocation3 + $0x16c] sm:$0xf]  ;;  %v127_v20 = vld [vmem:[%s6205_s0 + $0x30] sm:$0xff]  ;;  %v3501_v21 = vor.u32 %v4120_v16, %v3498_v17  ;;  %v3594_v22 = vld [vmem:[#allocation3 + $0x174] sm:$0xf0] }
  0x1e   :  { %v1523_v11 = vsel %vm1522_vm0, 1, %v6218_v0  ;;  %532 = vmatpush.bf16.msra.mxu0 %v3497_v12  ;;  %v3484_v23 = vld [vmem:[#allocation3 + $0x90] sm:$0xf]  ;;  %v4118_v24 = vld [vmem:[#allocation3 + $0x98] sm:$0xf0]  ;;  %v3597_v25 = vor.u32 %v4144_v18, %v3594_v22  ;;  %vm1990_vm1 = vcmp.eq.s32.totalorder %v4709_v5, 2 }
  0x1f   :  { %561 = vmatpush.bf16.msra.mxu1 %v3593_v15  ;;  %v3485_v26 = vor.u32 %v4118_v24, %v3484_v23  ;;  %v3580_v27 = vld [vmem:[#allocation3 + $0x150] sm:$0xf]  ;;  %v4142_v28 = vld [vmem:[#allocation3 + $0x158] sm:$0xf0]  ;;  %v4117_v29 = vld [vmem:[#allocation3 + $0x94] sm:$0xf]  ;;  %590 = vmatpush.bf16.msra.mxu2 %v3501_v21 }
  0x20   :  { %v3581_v30 = vor.u32 %v4142_v28, %v3580_v27  ;;  %v3486_v31 = vld [vmem:[#allocation3 + $0x9c] sm:$0xf0]  ;;  %v4141_v32 = vld [vmem:[#allocation3 + $0x154] sm:$0xf]  ;;  %619 = vmatpush.bf16.msra.mxu3 %v3597_v25  ;;  %v3472_v36 = vld [vmem:[#allocation3 + $0x78] sm:$0xf] }
  0x21   :  { %v3582_v33 = vld [vmem:[#allocation3 + $0x15c] sm:$0xf0]  ;;  %v3489_v34 = vor.u32 %v4117_v29, %v3486_v31  ;;  %v4115_v37 = vld [vmem:[#allocation3 + $0x80] sm:$0xf0]  ;;  %v3568_v38 = vld [vmem:[#allocation3 + $0x138] sm:$0xf] }
  0x22   :  { %142 = vperm.xlu1 %4266, %v124_v6   ;;  %v3585_v35 = vor.u32 %v4141_v32, %v3582_v33  ;;  %533 = vmatpush.bf16.msra.mxu0 %v3485_v26  ;;  %v3473_v39 = vor.u32 %v4115_v37, %v3472_v36  ;;  %v4139_v40 = vld [vmem:[#allocation3 + $0x140] sm:$0xf0]  ;;  %v4114_v41 = vld [vmem:[#allocation3 + $0x7c] sm:$0xf]  ;;  %v3474_v42 = vld [vmem:[#allocation3 + $0x84] sm:$0xf0] }
  0x23   :  { %136 = vperm.xlu0 %4265, %v122_v7   ;;  %148 = vperm.xlu2 %4267, %v126_v8   ;;  %v4138_v43 = vld [vmem:[#allocation3 + $0x13c] sm:$0xf]  ;;  %v3570_v44 = vld [vmem:[#allocation3 + $0x144] sm:$0xf0]  ;;  %v3460_v45 = vld [vmem:[#allocation3 + $0x60] sm:$0xf]  ;;  %v3569_v46 = vor.u32 %v4139_v40, %v3568_v38  ;;  %v3477_v47 = vor.u32 %v4114_v41, %v3474_v42 }
  0x24   :  { %vm1756_vm2 = vcmp.eq.s32.totalorder %v4709_v5, 1  ;;  %562 = vmatpush.bf16.msra.mxu1 %v3581_v30  ;;  %591 = vmatpush.bf16.msra.mxu2 %v3489_v34  ;;  %v4112_v48 = vld [vmem:[#allocation3 + $0x68] sm:$0xf0]  ;;  %v3556_v49 = vld [vmem:[#allocation3 + $0x120] sm:$0xf]  ;;  %v3573_v50 = vor.u32 %v4138_v43, %v3570_v44  ;;  %vm2224_vm3 = vcmp.eq.s32.totalorder %v4709_v5, 3 }
  0x25   :  { %620 = vmatpush.bf16.msra.mxu3 %v3585_v35  ;;  %v4136_v51 = vld [vmem:[#allocation3 + $0x128] sm:$0xf0]  ;;  %v4111_v52 = vld [vmem:[#allocation3 + $0x64] sm:$0xf]  ;;  %v3462_v53 = vld [vmem:[#allocation3 + $0x6c] sm:$0xf0]  ;;  %v3461_v54 = vor.u32 %v4112_v48, %v3460_v45 }
  0x26   :  { %534 = vmatpush.bf16.msra.mxu0 %v3473_v39  ;;  %v4135_v55 = vld [vmem:[#allocation3 + $0x124] sm:$0xf]  ;;  %v3558_v56 = vld [vmem:[#allocation3 + $0x12c] sm:$0xf0]  ;;  %v3448_v57 = vld [vmem:[#allocation3 + $0x48] sm:$0xf]  ;;  %v3557_v61 = vor.u32 %v4136_v51, %v3556_v49  ;;  %v3465_v62 = vor.u32 %v4111_v52, %v3462_v53 }
  0x27   :  { %v4109_v58 = vld [vmem:[#allocation3 + $0x50] sm:$0xf0]  ;;  %v1991_v59 = vsel %vm1990_vm1, 1, %v6218_v0  ;;  %v1757_v60 = vsel %vm1756_vm2, 1, %v6218_v0  ;;  %v3544_v63 = vld [vmem:[#allocation3 + $0x108] sm:$0xf]  ;;  %v3561_v1 = vor.u32 %v4135_v55, %v3558_v56 }
  0x28   :  { %563 = vmatpush.bf16.msra.mxu1 %v3569_v46  ;;  %592 = vmatpush.bf16.msra.mxu2 %v3477_v47  ;;  %v4133_v2 = vld [vmem:[#allocation3 + $0x110] sm:$0xf0]  ;;  %v4108_v3 = vld [vmem:[#allocation3 + $0x4c] sm:$0xf]  ;;  %v3450_v4 = vld [vmem:[#allocation3 + $0x54] sm:$0xf0]  ;;  %v3449_v7 = vor.u32 %v4109_v58, %v3448_v57 }
  0x29   :  { %621 = vmatpush.bf16.msra.mxu3 %v3573_v50  ;;  %v2225_v6 = vsel %vm2224_vm3, 1, %v6218_v0  ;;  %v4132_v8 = vld [vmem:[#allocation3 + $0x10c] sm:$0xf]  ;;  %v3546_v9 = vld [vmem:[#allocation3 + $0x114] sm:$0xf0]  ;;  %vm2692_vm4 = vcmp.eq.s32.totalorder %v4709_v5, 5  ;;  %v3545_v12 = vor.u32 %v4133_v2, %v3544_v63  ;;  %v3453_v13 = vor.u32 %v4108_v3, %v3450_v4 }
  0x2a   :  { %154 = vperm.xlu1 %4266, %v128_v19   ;;  %535 = vmatpush.bf16.msra.mxu0 %v3461_v54  ;;  %v3436_v10 = vld [vmem:[#allocation3 + $0x30] sm:$0xf]  ;;  %vm2458_vm5 = vcmp.eq.s32.totalorder %v4709_v5, 4  ;;  %v3549_v15 = vor.u32 %v4132_v8, %v3546_v9  ;;  %v4130_v16 = vld [vmem:[#allocation3 + $0xf8] sm:$0xf0]  ;;  %vm2926_vm6 = vcmp.eq.s32.totalorder %v4709_v5, 6  ;;  %v129_v3 = vlaneseq }
  0x2b   :  { %151 = vperm.xlu0 %4265, %v127_v20   ;;  %1525 = vperm.xlu2 %4267, %v1523_v11   ;;  %v4106_v11 = vld [vmem:[#allocation3 + $0x38] sm:$0xf0]  ;;  %v3532_v14 = vld [vmem:[#allocation3 + $0xf0] sm:$0xf]  ;;  %v4105_v17 = vld [vmem:[#allocation3 + $0x34] sm:$0xf] }
  0x2c   :  { %564 = vmatpush.bf16.msra.mxu1 %v3557_v61  ;;  %593 = vmatpush.bf16.msra.mxu2 %v3465_v62  ;;  %v3438_v18 = vld [vmem:[#allocation3 + $0x3c] sm:$0xf0]  ;;  %v3437_v19 = vor.u32 %v4106_v11, %v3436_v10  ;;  %v4129_v20 = vld [vmem:[#allocation3 + $0xf4] sm:$0xf]  ;;  %v2693_v22 = vsel %vm2692_vm4, 1, %v6218_v0  ;;  %v2459_v23 = vsel %vm2458_vm5, 1, %v6218_v0  ;;  %v3533_v24 = vor.u32 %v4130_v16, %v3532_v14 }
  0x2d   :  { %622 = vmatpush.bf16.msra.mxu3 %v3561_v1  ;;  %v3534_v21 = vld [vmem:[#allocation3 + $0xfc] sm:$0xf0]  ;;  %v3441_v25 = vor.u32 %v4105_v17, %v3438_v18  ;;  %v2927_v27 = vsel %vm2926_vm6, 1, %v6218_v0  ;;  %vm3160_vm7 = vcmp.eq.s32.totalorder %v4709_v5, 7  ;;  %v3424_v29 = vld [vmem:[#allocation3 + $0x18] sm:$0xf] }
  0x2e   :  { %536 = vmatpush.bf16.msra.mxu0 %v3449_v7  ;;  %v3537_v26 = vor.u32 %v4129_v20, %v3534_v21  ;;  %v3161_v28 = vsel %vm3160_vm7, 1, %v6218_v0  ;;  %v4103_v30 = vld [vmem:[#allocation3 + $0x20] sm:$0xf0]  ;;  %v3520_v31 = vld [vmem:[#allocation3 + $0xd8] sm:$0xf]  ;;  %v4765_v10 = vand.u32 127, %v129_v3 }
  0x2f   :  { %v3425_v32 = vor.u32 %v4103_v30, %v3424_v29  ;;  %v4127_v33 = vld [vmem:[#allocation3 + $0xe0] sm:$0xf0]  ;;  %v4102_v34 = vld [vmem:[#allocation3 + $0x1c] sm:$0xf]  ;;  %v3426_v35 = vld [vmem:[#allocation3 + $0x24] sm:$0xf0] }
  0x30   :  { %565 = vmatpush.bf16.msra.mxu1 %v3545_v12  ;;  %594 = vmatpush.bf16.msra.mxu2 %v3453_v13  ;;  %v3521_v36 = vor.u32 %v4127_v33, %v3520_v31  ;;  %v3429_v37 = vor.u32 %v4102_v34, %v3426_v35  ;;  %v4126_v38 = vld [vmem:[#allocation3 + $0xdc] sm:$0xf]  ;;  %v3522_v39 = vld [vmem:[#allocation3 + $0xe4] sm:$0xf0]  ;;  %v3412_v40 = vld [vmem:[#allocation3] sm:$0xf] }
  0x31   :  { %623 = vmatpush.bf16.msra.mxu3 %v3549_v15  ;;  %v3525_v41 = vor.u32 %v4126_v38, %v3522_v39  ;;  %v4100_v5 = vld [vmem:[#allocation3 + $0x8] sm:$0xf0]  ;;  %v3508_v42 = vld [vmem:[#allocation3 + $0xc0] sm:$0xf]  ;;  %v4099_v46 = vld [vmem:[#allocation3 + $0x4] sm:$0xf] }
  0x32   :  { %1993 = vperm.xlu1 %4266, %v1991_v59   ;;  %537 = vmatpush.bf16.msra.mxu0 %v3437_v19  ;;  %v4124_v43 = vld [vmem:[#allocation3 + $0xc8] sm:$0xf0]  ;;  %v3413_v44 = vor.u32 %v4100_v5, %v3412_v40  ;;  %v3414_v47 = vld [vmem:[#allocation3 + $0xc] sm:$0xf0]  ;;  %v4123_v48 = vld [vmem:[#allocation3 + $0xc4] sm:$0xf] }
  0x33   :  { %1759 = vperm.xlu0 %4265, %v1757_v60   ;;  %2227 = vperm.xlu2 %4267, %v2225_v6   ;;  %v3509_v45 = vor.u32 %v4124_v43, %v3508_v42  ;;  %v3417_v49 = vor.u32 %v4099_v46, %v3414_v47  ;;  %v3510_v50 = vld [vmem:[#allocation3 + $0xcc] sm:$0xf0]  ;;  %v3737_v52 = vld [vmem:[#allocation6 + $0xa8] sm:$0xf]  ;;  %v4169_v53 = vld [vmem:[#allocation6 + $0xb0] sm:$0xf0] }
  0x34   :  { %566 = vmatpush.bf16.msra.mxu1 %v3533_v24  ;;  %595 = vmatpush.bf16.msra.mxu2 %v3441_v25  ;;  %v3513_v51 = vor.u32 %v4123_v48, %v3510_v50  ;;  %v4750_v54 = vor.u32 %v4169_v53, %v3737_v52  ;;  %v3725_v55 = vld [vmem:[#allocation6 + $0x90] sm:$0xf]  ;;  %v4166_v56 = vld [vmem:[#allocation6 + $0x98] sm:$0xf0]  ;;  %v4168_v57 = vld [vmem:[#allocation6 + $0xac] sm:$0xf] }
  0x35   :  { %624 = vmatpush.bf16.msra.mxu3 %v3537_v26  ;;  %v4753_v58 = vor.u32 %v4166_v56, %v3725_v55  ;;  %v3739_v59 = vld [vmem:[#allocation6 + $0xb4] sm:$0xf0]  ;;  %v4163_v62 = vld [vmem:[#allocation6 + $0x80] sm:$0xf0]  ;;  %v4165_v63 = vld [vmem:[#allocation6 + $0x94] sm:$0xf] }
  0x36   :  { %538 = vmatpush.bf16.msra.mxu0 %v3425_v32  ;;  %6381 = vst [vmem:[#allocation17_spill] sm:$0xff] %v4750_v54  ;;  %v4755_v60 = vor.u32 %v4168_v57, %v3739_v59  ;;  %v3713_v61 = vld [vmem:[#allocation6 + $0x78] sm:$0xf]  ;;  %v3727_v2 = vld [vmem:[#allocation6 + $0x9c] sm:$0xf0]  ;;  %v4774_v14 = vadd.s32 128, %v4765_v10 }
  0x37   :  { %6382 = vst [vmem:[#allocation18_spill] sm:$0xff] %v4753_v58  ;;  %v4759_v1 = vor.u32 %v4163_v62, %v3713_v61  ;;  %v4761_v4 = vor.u32 %v4165_v63, %v3727_v2  ;;  %v3701_v7 = vld [vmem:[#allocation6 + $0x60] sm:$0xf]  ;;  %v4160_v8 = vld [vmem:[#allocation6 + $0x68] sm:$0xf0]  ;;  %v4957_v16 = vld [vmem:[%s6212_s7 + $0x38] sm:$0xff] }
  0x38   :  { %567 = vmatpush.bf16.msra.mxu1 %v3521_v36  ;;  %596 = vmatpush.bf16.msra.mxu2 %v3429_v37  ;;  %6383 = vst [vmem:[#allocation19_spill] sm:$0xff] %v4755_v60  ;;  %v4162_v9 = vld [vmem:[#allocation6 + $0x7c] sm:$0xf]  ;;  %v4767_v11 = vor.u32 %v4160_v8, %v3701_v7  ;;  %v3715_v12 = vld [vmem:[#allocation6 + $0x84] sm:$0xf0]  ;;  %v4967_v59 = vld [vmem:[%s6212_s7 + $0x30] sm:$0xff] }
  0x39   :  { %625 = vmatpush.bf16.msra.mxu3 %v3525_v41  ;;  %6384 = vst [vmem:[#allocation20_spill] sm:$0xff] %v4759_v1  ;;  %v4769_v13 = vor.u32 %v4162_v9, %v3715_v12  ;;  %v3504_v17 = vld [vmem:[#allocation3 + $0xb0] sm:$0xf]  ;;  %v4122_v18 = vld [vmem:[#allocation3 + $0xb8] sm:$0xf0] }
  0x3a   :  { %2695 = vperm.xlu1 %4266, %v2693_v22   ;;  %539 = vmatpush.bf16.msra.mxu0 %v3413_v44  ;;  %6385 = vst [vmem:[#allocation21_spill] sm:$0xff] %v4761_v4  ;;  %v4612_v20 = vmov 1.0|1.0   ;;  %v3505_v22 = vor.u32 %v4122_v18, %v3504_v17  ;;  %v4146_v24 = vld [vmem:[#allocation3 + $0x178] sm:$0xf0] }
  0x3b   :  { %2461 = vperm.xlu0 %4265, %v2459_v23   ;;  %2929 = vperm.xlu2 %4267, %v2927_v27   ;;  %6386 = vst [vmem:[#allocation22_spill] sm:$0xff] %v4767_v11  ;;  %v3600_v23 = vld [vmem:[#allocation3 + $0x170] sm:$0xf]  ;;  %v3689_v25 = vld [vmem:[#allocation6 + $0x48] sm:$0xf] }
  0x3c   :  { %568 = vmatpush.bf16.msra.mxu1 %v3509_v45  ;;  %597 = vmatpush.bf16.msra.mxu2 %v3417_v49  ;;  %6387 = vst [vmem:[#allocation23_spill] sm:$0xff] %v4769_v13  ;;  %v4157_v26 = vld [vmem:[#allocation6 + $0x50] sm:$0xf0]  ;;  %v3601_v27 = vor.u32 %v4146_v24, %v3600_v23  ;;  %v4159_v29 = vld [vmem:[#allocation6 + $0x64] sm:$0xf] }
  0x3d   :  { %626 = vmatpush.bf16.msra.mxu3 %v3513_v51  ;;  %v3703_v30 = vld [vmem:[#allocation6 + $0x6c] sm:$0xf0]  ;;  %v3492_v32 = vld [vmem:[#allocation3 + $0x98] sm:$0xf]  ;;  %v4119_v33 = vld [vmem:[#allocation3 + $0xa0] sm:$0xf0] }
  0x3e   :  { %648 = vmatpush.bf16.msrb.mxu0 %v3505_v22  ;;  %v4802_v31 = vor.u32 %v4159_v29, %v3703_v30  ;;  %v3588_v34 = vld [vmem:[#allocation3 + $0x158] sm:$0xf]  ;;  %v3493_v35 = vor.u32 %v4119_v33, %v3492_v32  ;;  %v4143_v36 = vld [vmem:[#allocation3 + $0x160] sm:$0xf0]  ;;  %v3677_v37 = vld [vmem:[#allocation6 + $0x30] sm:$0xf] }
  0x3f   :  { %v4154_v38 = vld [vmem:[#allocation6 + $0x38] sm:$0xf0]  ;;  %v3589_v39 = vor.u32 %v4143_v36, %v3588_v34  ;;  %v3480_v41 = vld [vmem:[#allocation3 + $0x80] sm:$0xf]  ;;  %v4116_v5 = vld [vmem:[#allocation3 + $0x88] sm:$0xf0] }
  0x40   :  { %903 = vmatpush.bf16.msrb.mxu2 %v4750_v54  ;;  %677 = vmatpush.bf16.msrb.mxu1 %v3601_v27  ;;  %6393 = vst [vmem:[#allocation25_spill] sm:$0xff] %v4802_v31  ;;  %v4806_v40 = vor.u32 %v4154_v38, %v3677_v37  ;;  %v3576_v42 = vld [vmem:[#allocation3 + $0x140] sm:$0xf]  ;;  %v4140_v43 = vld [vmem:[#allocation3 + $0x148] sm:$0xf0]  ;;  %v3481_v46 = vor.u32 %v4116_v5, %v3480_v41 }
  0x41   :  { %916 = vmatpush.bf16.msrb.mxu3 %v4755_v60  ;;  %v4156_v44 = vld [vmem:[#allocation6 + $0x4c] sm:$0xf]  ;;  %v3691_v45 = vld [vmem:[#allocation6 + $0x54] sm:$0xf0]  ;;  %v3577_v47 = vor.u32 %v4140_v43, %v3576_v42  ;;  %v3468_v49 = vld [vmem:[#allocation3 + $0x68] sm:$0xf] }
  0x42   :  { %6394 = vst [vmem:[#allocation26_spill] sm:$0xff] %v4806_v40  ;;  %649 = vmatpush.bf16.msrb.mxu0 %v3493_v35  ;;  %v4808_v48 = vor.u32 %v4156_v44, %v3691_v45  ;;  %v4113_v50 = vld [vmem:[#allocation3 + $0x70] sm:$0xf0]  ;;  %v3564_v51 = vld [vmem:[#allocation3 + $0x128] sm:$0xf] }
  0x43   :  { %3163 = vperm.xlu0 %4265, %v3161_v28   ;;  %v4800_v28 = vor.u32 %v4157_v26, %v3689_v25  ;;  %v4137_v52 = vld [vmem:[#allocation3 + $0x130] sm:$0xf0]  ;;  %v3469_v55 = vor.u32 %v4113_v50, %v3468_v49  ;;  %v3456_v61 = vld [vmem:[#allocation3 + $0x50] sm:$0xf]  ;;  %v4110_v62 = vld [vmem:[#allocation3 + $0x58] sm:$0xf0] }
  0x44   :  { %904 = vmatpush.bf16.msrb.mxu2 %v4753_v58  ;;  %678 = vmatpush.bf16.msrb.mxu1 %v3589_v39  ;;  %6395 = vst [vmem:[#allocation27_spill] sm:$0xff] %v4808_v48  ;;  %v3565_v56 = vor.u32 %v4137_v52, %v3564_v51  ;;  %v3552_v63 = vld [vmem:[#allocation3 + $0x110] sm:$0xf]  ;;  %v3665_v3 = vld [vmem:[#allocation6 + $0x18] sm:$0xf]  ;;  %v3457_v7 = vor.u32 %v4110_v62, %v3456_v61 }
  0x45   :  { %917 = vmatpush.bf16.msrb.mxu3 %v4761_v4  ;;  %6392 = vst [vmem:[#allocation24_spill] sm:$0xff] %v4800_v28  ;;  %v4134_v8 = vld [vmem:[#allocation3 + $0x118] sm:$0xf0]  ;;  %v3679_v17 = vld [vmem:[#allocation6 + $0x3c] sm:$0xf0] }
  0x46   :  { %650 = vmatpush.bf16.msrb.mxu0 %v3481_v46  ;;  %v3553_v12 = vor.u32 %v4134_v8, %v3552_v63  ;;  %v3444_v18 = vld [vmem:[#allocation3 + $0x38] sm:$0xf]  ;;  %v4107_v22 = vld [vmem:[#allocation3 + $0x40] sm:$0xf0]  ;;  %v3653_v27 = vld [vmem:[#allocation6] sm:$0xf] }
  0x47   :  { %v3540_v23 = vld [vmem:[#allocation3 + $0xf8] sm:$0xf]  ;;  %v4131_v24 = vld [vmem:[#allocation3 + $0x100] sm:$0xf0]  ;;  %v3445_v25 = vor.u32 %v4107_v22, %v3444_v18  ;;  %v4148_v29 = vld [vmem:[#allocation6 + $0x8] sm:$0xf0] }
  0x48   :  { %905 = vmatpush.bf16.msrb.mxu2 %v4759_v1  ;;  %679 = vmatpush.bf16.msrb.mxu1 %v3577_v47  ;;  %v3541_v26 = vor.u32 %v4131_v24, %v3540_v23  ;;  %v3745_v30 = vld [vmem:[#allocation6 + $0xb0] sm:$0xf]  ;;  %v4844_v32 = vor.u32 %v4148_v29, %v3653_v27  ;;  %v4170_v33 = vld [vmem:[#allocation6 + $0xb8] sm:$0xf0]  ;;  %v3432_v34 = vld [vmem:[#allocation3 + $0x20] sm:$0xf] }
  0x49   :  { %918 = vmatpush.bf16.msrb.mxu3 %v4769_v13  ;;  %v4104_v35 = vld [vmem:[#allocation3 + $0x28] sm:$0xf0]  ;;  %v4846_v36 = vor.u32 %v4170_v33, %v3745_v30  ;;  %v3528_v37 = vld [vmem:[#allocation3 + $0xe0] sm:$0xf]  ;;  %v4150_v41 = vld [vmem:[#allocation6 + $0x1c] sm:$0xf] }
  0x4a   :  { %651 = vmatpush.bf16.msrb.mxu0 %v3469_v55  ;;  %6402 = vst [vmem:[#allocation30_spill] sm:$0xff] %v4844_v32  ;;  %v4128_v38 = vld [vmem:[#allocation3 + $0xe8] sm:$0xf0]  ;;  %v3433_v39 = vor.u32 %v4104_v35, %v3432_v34  ;;  %v3667_v5 = vld [vmem:[#allocation6 + $0x24] sm:$0xf0] }
  0x4b   :  { %v3733_v42 = vld [vmem:[#allocation6 + $0x98] sm:$0xf]  ;;  %v3529_v43 = vor.u32 %v4128_v38, %v3528_v37  ;;  %v4849_v44 = vor.u32 %v4150_v41, %v3667_v5  ;;  %v4167_v45 = vld [vmem:[#allocation6 + $0xa0] sm:$0xf0]  ;;  %v3420_v46 = vld [vmem:[#allocation3 + $0x8] sm:$0xf] }
  0x4c   :  { %906 = vmatpush.bf16.msrb.mxu2 %v4767_v11  ;;  %680 = vmatpush.bf16.msrb.mxu1 %v3565_v56  ;;  %v4101_v47 = vld [vmem:[#allocation3 + $0x10] sm:$0xf0]  ;;  %v4852_v49 = vor.u32 %v4167_v45, %v3733_v42  ;;  %v4147_v50 = vld [vmem:[#allocation6 + $0x4] sm:$0xf]  ;;  %v3516_v51 = vld [vmem:[#allocation3 + $0xc8] sm:$0xf] }
  0x4d   :  { %919 = vmatpush.bf16.msrb.mxu3 %v4802_v31  ;;  %6403 = vst [vmem:[#allocation31_spill] sm:$0xff] %v4849_v44  ;;  %v3655_v52 = vld [vmem:[#allocation6 + $0xc] sm:$0xf0]  ;;  %v3421_v55 = vor.u32 %v4101_v47, %v3420_v46  ;;  %v4125_v56 = vld [vmem:[#allocation3 + $0xd0] sm:$0xf0]  ;;  %v4995_v47 = vld [vmem:[%s6212_s7 + $0x18] sm:$0xff] }
  0x4e   :  { %652 = vmatpush.bf16.msrb.mxu0 %v3457_v7  ;;  %v4855_v61 = vor.u32 %v4147_v50, %v3655_v52  ;;  %v3721_v62 = vld [vmem:[#allocation6 + $0x80] sm:$0xf]  ;;  %v4164_v63 = vld [vmem:[#allocation6 + $0x88] sm:$0xf0]  ;;  %v3709_v8 = vld [vmem:[#allocation6 + $0x68] sm:$0xf] }
  0x4f   :  { %v4158_v18 = vld [vmem:[#allocation6 + $0x58] sm:$0xf0]  ;;  %v3685_v23 = vld [vmem:[#allocation6 + $0x38] sm:$0xf]  ;;  %v4155_v24 = vld [vmem:[#allocation6 + $0x40] sm:$0xf0] }
  0x50   :  { %907 = vmatpush.bf16.msrb.mxu2 %v4800_v28  ;;  %681 = vmatpush.bf16.msrb.mxu1 %v3553_v12  ;;  %6404 = vst [vmem:[#allocation32_spill] sm:$0xff] %v4855_v61  ;;  %v4161_v12 = vld [vmem:[#allocation6 + $0x70] sm:$0xf0]  ;;  %v4894_v27 = vor.u32 %v4155_v24, %v3685_v23  ;;  %v3673_v29 = vld [vmem:[#allocation6 + $0x20] sm:$0xf] }
  0x51   :  { %920 = vmatpush.bf16.msrb.mxu3 %v4808_v48  ;;  %v4152_v30 = vld [vmem:[#allocation6 + $0x28] sm:$0xf0]  ;;  %v3867_v23 = vld [vmem:[#allocation8 + $0xa8] sm:$0xf]  ;;  %v4201_v24 = vld [vmem:[#allocation8 + $0xb0] sm:$0xf0] }
  0x52   :  { %653 = vmatpush.bf16.msrb.mxu0 %v3445_v25  ;;  %v4901_v33 = vor.u32 %v4152_v30, %v3673_v29  ;;  %v4221_v29 = vld [vmem:[#allocation8 + $0x154] sm:$0xf]  ;;  %v3953_v30 = vld [vmem:[#allocation8 + $0x15c] sm:$0xf0] }
  0x53   :  { %v5033_v35 = vor.u32 %v4221_v29, %v3953_v30  ;;  %v4215_v30 = vld [vmem:[#allocation8 + $0x124] sm:$0xf] }
  0x54   :  { %908 = vmatpush.bf16.msrb.mxu2 %v4806_v40  ;;  %682 = vmatpush.bf16.msrb.mxu1 %v3541_v26  ;;  %6409 = vst [vmem:[#allocation33_spill] sm:$0xff] %v4901_v33 }
  0x56   :  { %654 = vmatpush.bf16.msrb.mxu0 %v3433_v39  ;;  %v4973_v39 = vld [vmem:[%s6212_s7 + $0x28] sm:$0xff] }
  0x58   :  { %683 = vmatpush.bf16.msrb.mxu1 %v3529_v43  ;;  %v4985_v43 = vld [vmem:[%s6212_s7 + $0x20] sm:$0xff] }
  0x5a   :  { %655 = vmatpush.bf16.msrb.mxu0 %v3421_v55 }
  0x75   :  { %v4830_v2 = vpop.permute.xlu2 %145 }
  0x76   :  { %vm164_vm4 = vcmp.eq.s32.totalorder %v4765_v10, %v4830_v2  ;;  %vm165_vm6 = vcmp.eq.s32.totalorder %v4774_v14, %v4830_v2  ;;  %v5021_v2 = vld [vmem:[%s6212_s7] sm:$0xff] }
  0x8c   :  { %v140_v19 = vpop.permute.xlu1 %139 }
  0x8d   :  { %v134_v6 = vpop.permute.xlu0 %133  ;;  %vm160_vm14 = vcmp.eq.s32.totalorder %v4765_v10, %v140_v19  ;;  %vm161_vm0 = vcmp.eq.s32.totalorder %v4774_v14, %v140_v19 }
  0x8e   :  { %vm156_vm8 = vcmp.eq.s32.totalorder %v4765_v10, %v134_v6  ;;  %vm157_vm11 = vcmp.eq.s32.totalorder %v4774_v14, %v134_v6  ;;  %v4151_v6 = vld [vmem:[#allocation6 + $0x20] sm:$0xf0] }
  0x8f   :  { %v4838_v9 = vor.u32 %v4151_v6, %v3665_v3  ;;  %v3517_v3 = vor.u32 %v4125_v56, %v3516_v51  ;;  %v4865_v6 = vor.u32 %v4164_v63, %v3721_v62  ;;  %v5009_v62 = vld [vmem:[%s6212_s7 + $0x8] sm:$0xff] }
  0x91   :  { %6400 = vst [vmem:[#allocation28_spill] sm:$0xff] %v4838_v9  ;;  %909 = vmatpush.bf16.msrb.mxu2 %v4838_v9  ;;  %684 = vmatpush.bf16.msrb.mxu1 %v3517_v3 }
  0x94   :  { %v143_v53 = vpop.permute.xlu1 %142 }
  0x95   :  { %v137_v15 = vpop.permute.xlu0 %136  ;;  %vm162_vm15 = vcmp.eq.s32.totalorder %v4765_v10, %v143_v53  ;;  %vm163_vm1 = vcmp.eq.s32.totalorder %v4774_v14, %v143_v53  ;;  %910 = vmatpush.bf16.msrb.mxu2 %v4844_v32  ;;  %v149_v53 = vpop.permute.xlu2 %148 }
  0x96   :  { %vm158_vm9 = vcmp.eq.s32.totalorder %v4765_v10, %v137_v15  ;;  %vm159_vm10 = vcmp.eq.s32.totalorder %v4774_v14, %v137_v15  ;;  %vm4816_vm2 = vmpackc.low %vm162_vm15, %vm160_vm14  ;;  %v4153_v15 = vld [vmem:[#allocation6 + $0x34] sm:$0xf]  ;;  %vm166_vm5 = vcmp.eq.s32.totalorder %v4765_v10, %v149_v53  ;;  %vm167_vm7 = vcmp.eq.s32.totalorder %v4774_v14, %v149_v53 }
  0x97   :  { %vm4780_vm12 = vmpackc.low %vm158_vm9, %vm156_vm8  ;;  %v4840_v19 = vor.u32 %v4153_v15, %v3679_v17  ;;  %v4888_v15 = vor.u32 %v4161_v12, %v3709_v8  ;;  %v3697_v17 = vld [vmem:[#allocation6 + $0x50] sm:$0xf]  ;;  %v4224_v8 = vld [vmem:[#allocation8 + $0x16c] sm:$0xf] }
  0x98   :  { %3603 = vmatmul.msk.bf16.vlgmr.msra.gmra.mxu0 %vm4780_vm12, %v4612_v20  ;;  %vm4787_vm13 = vmpackc.low %vm159_vm10, %vm157_vm11  ;;  %3619 = vmatmul.msk.bf16.vlgmr.msra.gmra.mxu2 %vm4780_vm12, %v4612_v20  ;;  %v4891_v22 = vor.u32 %v4158_v18, %v3697_v17  ;;  %v5003_v53 = vld [vmem:[%s6212_s7 + $0x10] sm:$0xff]  ;;  %v3965_v12 = vld [vmem:[#allocation8 + $0x174] sm:$0xf0] }
  0x99   :  { %3611 = vmatmul.msk.bf16.vlgmr.msra.gmra.mxu1 %vm4787_vm13, %v4612_v20  ;;  %3627 = vmatmul.msk.bf16.vlgmr.msra.gmra.mxu3 %vm4787_vm13, %v4612_v20  ;;  %vm4820_vm3 = vmpackc.low %vm163_vm1, %vm161_vm0  ;;  %6401 = vst [vmem:[#allocation29_spill] sm:$0xff] %v4840_v19  ;;  %v5023_v17 = vor.u32 %v4224_v8, %v3965_v12  ;;  %v3843_v12 = vld [vmem:[#allocation8 + $0x78] sm:$0xf] }
  0x9a   :  { %921 = vmatpush.bf16.msrb.mxu3 %v4840_v19  ;;  %929 = vmatpush.bf16.msra.mxu2 %v4846_v36  ;;  %vm4867_vm8 = vmpackc.low %vm166_vm5, %vm164_vm4 }
  0x9b   :  { %vm4874_vm9 = vmpackc.low %vm167_vm7, %vm165_vm6 }
  0x9c   :  { %v155_v25 = vpop.permute.xlu1 %154 }
  0x9d   :  { %v152_v26 = vpop.permute.xlu0 %151  ;;  %vm170_vm10 = vcmp.eq.s32.totalorder %v4765_v10, %v155_v25  ;;  %vm171_vm14 = vcmp.eq.s32.totalorder %v4774_v14, %v155_v25 }
  0x9e   :  { %922 = vmatpush.bf16.msrb.mxu3 %v4849_v44  ;;  %930 = vmatpush.bf16.msra.mxu2 %v4852_v49  ;;  %vm168_vm11 = vcmp.eq.s32.totalorder %v4765_v10, %v152_v26  ;;  %vm169_vm15 = vcmp.eq.s32.totalorder %v4774_v14, %v152_v26  ;;  %v3661_v10 = vld [vmem:[#allocation6 + $0x8] sm:$0xf]  ;;  %v4149_v14 = vld [vmem:[#allocation6 + $0x10] sm:$0xf0]  ;;  %v5031_v26 = vor.u32 %v4201_v24, %v3867_v23  ;;  %v4195_v23 = vld [vmem:[#allocation8 + $0x80] sm:$0xf0] }
  0x9f   :  { %vm4903_vm0 = vmpackc.low %vm170_vm10, %vm168_vm11  ;;  %v4924_v37 = vor.u32 %v4149_v14, %v3661_v10  ;;  %v5046_v29 = vor.u32 %v4195_v23, %v3843_v12  ;;  %v4200_v12 = vld [vmem:[#allocation8 + $0xac] sm:$0xf]  ;;  %v3869_v23 = vld [vmem:[#allocation8 + $0xb4] sm:$0xf0] }
  0xa0   :  { %vm4910_vm1 = vmpackc.low %vm171_vm14, %vm169_vm15  ;;  %1399 = vmatpush.bf16.msra.mxu0 %v5031_v26 }
  0xa1   :  { %6414 = vst [vmem:[#allocation34_spill] sm:$0xff] %v4924_v37 }
  0xa2   :  { %923 = vmatpush.bf16.msrb.mxu3 %v4855_v61  ;;  %931 = vmatpush.bf16.msra.mxu2 %v4865_v6 }
  0xa6   :  { %932 = vmatpush.bf16.msra.mxu2 %v4888_v15  ;;  %1057 = vmatpush.bf16.msra.mxu3 %v4957_v16 }
  0xa8   :  { %3605 = vmatmul.msk.bf16.gmra.mxu0 %vm4816_vm2, %v4612_v20  ;;  %3621 = vmatmul.msk.bf16.gmra.mxu2 %vm4816_vm2, %v4612_v20 }
  0xa9   :  { %3613 = vmatmul.msk.bf16.gmra.mxu1 %vm4820_vm3, %v4612_v20  ;;  %3629 = vmatmul.msk.bf16.gmra.mxu3 %vm4820_vm3, %v4612_v20 }
  0xaa   :  { %933 = vmatpush.bf16.msra.mxu2 %v4891_v22  ;;  %1058 = vmatpush.bf16.msra.mxu3 %v4967_v59 }
  0xae   :  { %934 = vmatpush.bf16.msra.mxu2 %v4894_v27  ;;  %1059 = vmatpush.bf16.msra.mxu3 %v4973_v39 }
  0xb2   :  { %935 = vmatpush.bf16.msra.mxu2 %v4901_v33  ;;  %1060 = vmatpush.bf16.msra.mxu3 %v4985_v43  ;;  %v3839_v33 = vld [vmem:[#allocation8 + $0x68] sm:$0xf] }
  0xb6   :  { %936 = vmatpush.bf16.msra.mxu2 %v4924_v37  ;;  %1061 = vmatpush.bf16.msra.mxu3 %v4995_v47 }
  0xb8   :  { %3607 = vmatmul.msk.bf16.gmra.mxu0 %vm4867_vm8, %v4612_v20  ;;  %3623 = vmatmul.msk.bf16.gmra.mxu2 %vm4867_vm8, %v4612_v20 }
  0xb9   :  { %3615 = vmatmul.msk.bf16.gmra.mxu1 %vm4874_vm9, %v4612_v20  ;;  %3631 = vmatmul.msk.bf16.gmra.mxu3 %vm4874_vm9, %v4612_v20 }
  0xba   :  { %1062 = vmatpush.bf16.msra.mxu3 %v5003_v53 }
  0xbe   :  { %1063 = vmatpush.bf16.msra.mxu3 %v5009_v62 }
  0xc2   :  { %1064 = vmatpush.bf16.msra.mxu3 %v5021_v2 }
  0xc8   :  { %3609 = vmatmul.msk.bf16.gmra.mxu0 %vm4903_vm0, %v4612_v20  ;;  %3625 = vmatmul.msk.bf16.gmra.mxu2 %vm4903_vm0, %v4612_v20 }
  0xc9   :  { %3617 = vmatmul.msk.bf16.gmra.mxu1 %vm4910_vm1, %v4612_v20  ;;  %3633 = vmatmul.msk.bf16.gmra.mxu3 %vm4910_vm1, %v4612_v20 }
  0xd8   :  { %3635 = vmatmul.msk.bf16.vlgmr.msrb.gmra.mxu0 %vm4780_vm12, %v4612_v20  ;;  %911 = vmatmul.bf16.vlgmr.msrb.gmra.mxu2 %v6218_v0 }
  0xd9   :  { %3643 = vmatmul.msk.bf16.vlgmr.msrb.gmra.mxu1 %vm4787_vm13, %v4612_v20  ;;  %924 = vmatmul.bf16.vlgmr.msrb.gmra.mxu3 %v6218_v0 }
  0xda   :  { %1438 = vmatpush.bf16.msrb.mxu3 %v5023_v17 }
  0xde   :  { %1439 = vmatpush.bf16.msrb.mxu3 %v5033_v35 }
  0xe8   :  { %3637 = vmatmul.msk.bf16.gmra.mxu0 %vm4816_vm2, %v4612_v20  ;;  %937 = vmatmul.bf16.vlgmr.msra.gmra.mxu2 %v6218_v0 }
  0xe9   :  { %3645 = vmatmul.msk.bf16.gmra.mxu1 %vm4820_vm3, %v4612_v20  ;;  %1065 = vmatmul.bf16.vlgmr.msra.gmra.mxu3 %v6218_v0 }
  0xf8   :  { %3639 = vmatmul.msk.bf16.gmra.mxu0 %vm4867_vm8, %v4612_v20 }
  0xf9   :  { %3647 = vmatmul.msk.bf16.gmra.mxu1 %vm4874_vm9, %v4612_v20 }
 0x108   :  { %3641 = vmatmul.msk.bf16.gmra.mxu0 %vm4903_vm0, %v4612_v20 }
 0x109   :  { %3649 = vmatmul.msk.bf16.gmra.mxu1 %vm4910_vm1, %v4612_v20 }
 0x115   :  { %v4959_v21 = vpop.f32.mrf.mxu0 }
 0x116   :  { %v4961_v57 = vpop.f32.mrf.mxu1 }
 0x11b   :  { %v599_v38 = vpop.f32.mrf.mxu2 }
 0x11c   :  { %v628_v20 = vpop.f32.mrf.mxu3 }
 0x11d   :  { %v4975_v41 = vadd.f32 %v628_v20, %v599_v38  ;;  %v4977_v5 = vpop.f32.mrf.mxu0  ;;  %v3855_v38 = vld [vmem:[#allocation8 + $0x90] sm:$0xf]  ;;  %v4198_v20 = vld [vmem:[#allocation8 + $0x98] sm:$0xf0] }
 0x11e   :  { %6415 = vst [vmem:[#allocation35_spill] sm:$0xff] %v4977_v5  ;;  %v4979_v42 = vpop.f32.mrf.mxu1  ;;  %v3845_v5 = vld [vmem:[#allocation8 + $0x84] sm:$0xf0] }
 0x11f   :  { %6416 = vst [vmem:[#allocation36_spill] sm:$0xff] %v4979_v42  ;;  %v4186_v42 = vld [vmem:[#allocation8 + $0x38] sm:$0xf0] }
 0x123   :  { %v4988_v45 = vpop.f32.mrf.mxu2 }
 0x124   :  { %6417 = vst [vmem:[#allocation37_spill] sm:$0xff] %v4988_v45  ;;  %v4990_v46 = vpop.f32.mrf.mxu3 }
 0x125   :  { %6418 = vst [vmem:[#allocation38_spill] sm:$0xff] %v4990_v46  ;;  %v546_v50 = vpop.f32.mrf.mxu0  ;;  %v4206_v46 = vld [vmem:[#allocation8 + $0xdc] sm:$0xf] }
 0x126   :  { %v575_v51 = vpop.f32.mrf.mxu1 }
 0x127   :  { %v4998_v52 = vadd.f32 %v575_v51, %v546_v50  ;;  %v4218_v50 = vld [vmem:[#allocation8 + $0x13c] sm:$0xf]  ;;  %v5040_v51 = vor.u32 %v4198_v20, %v3855_v38 }
 0x129   :  { %6419 = vst [vmem:[#allocation39_spill] sm:$0xff] %v4998_v52  ;;  %1400 = vmatpush.bf16.msra.mxu0 %v5040_v51 }
 0x12b   :  { %v604_v55 = vpop.f32.mrf.mxu2 }
 0x12c   :  { %v633_v56 = vpop.f32.mrf.mxu3 }
 0x12d   :  { %v5011_v63 = vadd.f32 %v633_v56, %v604_v55  ;;  %v5013_v3 = vpop.f32.mrf.mxu0  ;;  %v3941_v55 = vld [vmem:[#allocation8 + $0x144] sm:$0xf0]  ;;  %1401 = vmatpush.bf16.msra.mxu0 %v5046_v29 }
 0x12e   :  { %6421 = vst [vmem:[#allocation41_spill] sm:$0xff] %v5013_v3  ;;  %v5015_v7 = vpop.f32.mrf.mxu1  ;;  %v5042_v56 = vor.u32 %v4218_v50, %v3941_v55  ;;  %v3831_v50 = vld [vmem:[#allocation8 + $0x60] sm:$0xf]  ;;  %v4192_v55 = vld [vmem:[#allocation8 + $0x68] sm:$0xf0] }
 0x12f   :  { %6420 = vst [vmem:[#allocation40_spill] sm:$0xff] %v5011_v63  ;;  %v4209_v3 = vld [vmem:[#allocation8 + $0xf4] sm:$0xf] }
 0x130   :  { %6422 = vst [vmem:[#allocation42_spill] sm:$0xff] %v5015_v7  ;;  %1440 = vmatpush.bf16.msrb.mxu3 %v5042_v56  ;;  %v3857_v7 = vld [vmem:[#allocation8 + $0x9c] sm:$0xf0] }
 0x131   :  { %6426 = vst [vmem:[#allocation46_spill] sm:$0xff] %v5042_v56 }
 0x133   :  { %v5026_v18 = vpop.f32.mrf.mxu2 }
 0x134   :  { %6423 = vst [vmem:[#allocation43_spill] sm:$0xff] %v5026_v18  ;;  %v5029_v25 = vpop.f32.mrf.mxu3  ;;  %v5060_v18 = vor.u32 %v4200_v12, %v3869_v23  ;;  %v4197_v23 = vld [vmem:[#allocation8 + $0x94] sm:$0xf] }
 0x135   :  { %6424 = vst [vmem:[#allocation44_spill] sm:$0xff] %v5029_v25  ;;  %v551_v34 = vpop.f32.mrf.mxu0  ;;  %v4212_v25 = vld [vmem:[#allocation8 + $0x10c] sm:$0xf] }
 0x136   :  { %v580_v10 = vpop.f32.mrf.mxu1  ;;  %6431 = vst [vmem:[#allocation51_spill] sm:$0xff] %v5060_v18  ;;  %1425 = vmatpush.bf16.msrb.mxu2 %v5060_v18 }
 0x137   :  { %v5037_v14 = vadd.f32 %v580_v10, %v551_v34  ;;  %v3929_v34 = vld [vmem:[#allocation8 + $0x12c] sm:$0xf0] }
 0x138   :  { %v5052_v38 = vor.u32 %v4215_v30, %v3929_v34 }
 0x139   :  { %6425 = vst [vmem:[#allocation45_spill] sm:$0xff] %v5037_v14  ;;  %v5058_v14 = vor.u32 %v4192_v55, %v3831_v50  ;;  %v3819_v50 = vld [vmem:[#allocation8 + $0x48] sm:$0xf]  ;;  %v4189_v55 = vld [vmem:[#allocation8 + $0x50] sm:$0xf0] }
 0x13a   :  { %6429 = vst [vmem:[#allocation49_spill] sm:$0xff] %v5052_v38  ;;  %1441 = vmatpush.bf16.msrb.mxu3 %v5052_v38  ;;  %v5073_v12 = vor.u32 %v4189_v55, %v3819_v50  ;;  %v3807_v55 = vld [vmem:[#allocation8 + $0x30] sm:$0xf]  ;;  %v3797_v38 = vld [vmem:[#allocation8 + $0x24] sm:$0xf0] }
 0x13b   :  { %v609_v8 = vpop.f32.mrf.mxu2  ;;  %1402 = vmatpush.bf16.msra.mxu0 %v5058_v14 }
 0x13c   :  { %v638_v24 = vpop.f32.mrf.mxu3 }
 0x13d   :  { %v5048_v10 = vadd.f32 %v638_v24, %v609_v8  ;;  %v5050_v0 = vpop.f32.mrf.mxu0  ;;  %v3917_v8 = vld [vmem:[#allocation8 + $0x114] sm:$0xf0]  ;;  %v3963_v24 = vld [vmem:[#allocation8 + $0x168] sm:$0xf] }
 0x13e   :  { %6428 = vst [vmem:[#allocation48_spill] sm:$0xff] %v5050_v0  ;;  %v5054_v20 = vpop.f32.mrf.mxu1  ;;  %v4225_v0 = vld [vmem:[#allocation8 + $0x170] sm:$0xf0]  ;;  %v5063_v30 = vor.u32 %v4212_v25, %v3917_v8  ;;  %v5076_v25 = vor.u32 %v4197_v23, %v3857_v7  ;;  %v5087_v7 = vor.u32 %v4186_v42, %v3807_v55  ;;  %v4194_v23 = vld [vmem:[#allocation8 + $0x7c] sm:$0xf] }
 0x13f   :  { %6427 = vst [vmem:[#allocation47_spill] sm:$0xff] %v5048_v10  ;;  %1403 = vmatpush.bf16.msra.mxu0 %v5073_v12  ;;  %v3795_v42 = vld [vmem:[#allocation8 + $0x18] sm:$0xf]  ;;  %v4183_v55 = vld [vmem:[#allocation8 + $0x20] sm:$0xf0] }
 0x140   :  { %6430 = vst [vmem:[#allocation50_spill] sm:$0xff] %v5054_v20  ;;  %v5067_v20 = vor.u32 %v4225_v0, %v3963_v24  ;;  %1442 = vmatpush.bf16.msrb.mxu3 %v5063_v30  ;;  %v3905_v0 = vld [vmem:[#allocation8 + $0xfc] sm:$0xf0]  ;;  %1426 = vmatpush.bf16.msrb.mxu2 %v5076_v25 }
 0x141   :  { %6432 = vst [vmem:[#allocation52_spill] sm:$0xff] %v5063_v30  ;;  %v5079_v24 = vor.u32 %v4209_v3, %v3905_v0  ;;  %v5090_v3 = vor.u32 %v4194_v23, %v3845_v5  ;;  %v3893_v0 = vld [vmem:[#allocation8 + $0xe4] sm:$0xf0]  ;;  %v4191_v5 = vld [vmem:[#allocation8 + $0x64] sm:$0xf] }
 0x142   :  { %6434 = vst [vmem:[#allocation54_spill] sm:$0xff] %v5067_v20  ;;  %1412 = vmatpush.bf16.msra.mxu1 %v5067_v20  ;;  %v3833_v23 = vld [vmem:[#allocation8 + $0x6c] sm:$0xf0] }
 0x143   :  { %v5065_v34 = vpop.f32.mrf.mxu2  ;;  %6436 = vst [vmem:[#allocation56_spill] sm:$0xff] %v5076_v25  ;;  %1404 = vmatpush.bf16.msra.mxu0 %v5087_v7  ;;  %v4203_v25 = vld [vmem:[#allocation8 + $0xc4] sm:$0xf] }
 0x144   :  { %6433 = vst [vmem:[#allocation53_spill] sm:$0xff] %v5065_v34  ;;  %v5070_v10 = vpop.f32.mrf.mxu3  ;;  %v3951_v34 = vld [vmem:[#allocation8 + $0x150] sm:$0xf]  ;;  %1443 = vmatpush.bf16.msrb.mxu3 %v5079_v24  ;;  %1427 = vmatpush.bf16.msrb.mxu2 %v5090_v3 }
 0x145   :  { %6435 = vst [vmem:[#allocation55_spill] sm:$0xff] %v5070_v10  ;;  %v556_v52 = vpop.f32.mrf.mxu0  ;;  %v4222_v10 = vld [vmem:[#allocation8 + $0x158] sm:$0xf0] }
 0x146   :  { %v585_v8 = vpop.f32.mrf.mxu1  ;;  %6437 = vst [vmem:[#allocation57_spill] sm:$0xff] %v5079_v24  ;;  %v5084_v50 = vor.u32 %v4222_v10, %v3951_v34  ;;  %v3939_v10 = vld [vmem:[#allocation8 + $0x138] sm:$0xf]  ;;  %v4219_v34 = vld [vmem:[#allocation8 + $0x140] sm:$0xf0]  ;;  %v5099_v24 = vor.u32 %v4183_v55, %v3795_v42 }
 0x147   :  { %v5081_v63 = vadd.f32 %v585_v8, %v556_v52  ;;  %6440 = vst [vmem:[#allocation60_spill] sm:$0xff] %v5087_v7  ;;  %v5093_v52 = vor.u32 %v4206_v46, %v3893_v0  ;;  %v5106_v0 = vor.u32 %v4191_v5, %v3833_v23  ;;  %v3927_v42 = vld [vmem:[#allocation8 + $0x120] sm:$0xf]  ;;  %v4216_v55 = vld [vmem:[#allocation8 + $0x128] sm:$0xf0] }
 0x148   :  { %6439 = vst [vmem:[#allocation59_spill] sm:$0xff] %v5084_v50  ;;  %1413 = vmatpush.bf16.msra.mxu1 %v5084_v50  ;;  %1405 = vmatpush.bf16.msra.mxu0 %v5099_v24  ;;  %v4188_v5 = vld [vmem:[#allocation8 + $0x4c] sm:$0xf]  ;;  %v3821_v23 = vld [vmem:[#allocation8 + $0x54] sm:$0xf0] }
 0x149   :  { %6438 = vst [vmem:[#allocation58_spill] sm:$0xff] %v5081_v63  ;;  %v5096_v63 = vor.u32 %v4219_v34, %v3939_v10  ;;  %1444 = vmatpush.bf16.msrb.mxu3 %v5093_v52  ;;  %v3881_v10 = vld [vmem:[#allocation8 + $0xcc] sm:$0xf0]  ;;  %1428 = vmatpush.bf16.msrb.mxu2 %v5106_v0 }
 0x14a   :  { %6441 = vst [vmem:[#allocation61_spill] sm:$0xff] %v5090_v3  ;;  %v5111_v3 = vor.u32 %v4203_v25, %v3881_v10  ;;  %v5121_v25 = vor.u32 %v4188_v5, %v3821_v23  ;;  %v4202_v10 = vld [vmem:[#allocation8 + $0xb8] sm:$0xf0]  ;;  %v6456_v5 = vmov 0  }
 0x14b   :  { %6442 = vst [vmem:[#allocation62_spill] sm:$0xff] %v5093_v52  ;;  %v614_v8 = vpop.f32.mrf.mxu2  ;;  %v5114_v52 = vor.u32 %v4216_v55, %v3927_v42  ;;  %v3915_v55 = vld [vmem:[#allocation8 + $0x108] sm:$0xf] }
 0x14c   :  { %6443 = vst [vmem:[#allocation63_spill] sm:$0xff] %v5096_v63  ;;  %v643_v45 = vpop.f32.mrf.mxu3  ;;  %1414 = vmatpush.bf16.msra.mxu1 %v5096_v63 }
 0x14d   :  { %6444 = vst [vmem:[#allocation64_spill] sm:$0xff] %v5099_v24  ;;  %v5101_v30 = vadd.f32 %v643_v45, %v614_v8  ;;  %v5103_v46 = vpop.f32.mrf.mxu0  ;;  %v3783_v45 = vld [vmem:[#allocation8] sm:$0xf]  ;;  %v4180_v8 = vld [vmem:[#allocation8 + $0x8] sm:$0xf0]  ;;  %1445 = vmatpush.bf16.msrb.mxu3 %v5111_v3  ;;  %1429 = vmatpush.bf16.msrb.mxu2 %v5121_v25  ;;  %v571_v24 = vadd.f32 %v4961_v57, %v4959_v21 }
 0x14e   :  { %6446 = vst [vmem:[#allocation66_spill] sm:$0xff] %v5103_v46  ;;  %v5108_v34 = vpop.f32.mrf.mxu1  ;;  %v5117_v46 = vor.u32 %v4180_v8, %v3783_v45  ;;  %v5131_v45 = vld [vmem:[%s6209_s4] sm:$0x7] }
 0x14f   :  { %6445 = vst [vmem:[#allocation65_spill] sm:$0xff] %v5101_v30  ;;  %v3875_v30 = vld [vmem:[#allocation8 + $0xb0] sm:$0xf] }
 0x150   :  { %6447 = vst [vmem:[#allocation67_spill] sm:$0xff] %v5106_v0  ;;  %1415 = vmatpush.bf16.msra.mxu1 %v5114_v52  ;;  %1406 = vmatpush.bf16.msra.mxu0 %v5117_v46  ;;  %v5124_v42 = vor.u32 %v4202_v10, %v3875_v30  ;;  %v4185_v30 = vld [vmem:[#allocation8 + $0x34] sm:$0xf]  ;;  %v3809_v10 = vld [vmem:[#allocation8 + $0x3c] sm:$0xf0] }
 0x151   :  { %6448 = vst [vmem:[#allocation68_spill] sm:$0xff] %v5108_v34  ;;  %1545 = vmatpush.bf16.msra.mxu3 %v4755_v60  ;;  %v4213_v34 = vld [vmem:[#allocation8 + $0x110] sm:$0xf0]  ;;  %v3863_v60 = vld [vmem:[#allocation8 + $0x98] sm:$0xf] }
 0x152   :  { %6449 = vst [vmem:[#allocation69_spill] sm:$0xff] %v5111_v3  ;;  %v5134_v8 = vor.u32 %v4213_v34, %v3915_v55  ;;  %1446 = vmatmul.bf16.vlgmr.msrb.gmra.mxu3 %v6456_v5 }
 0x153   :  { %6450 = vst [vmem:[#allocation70_spill] sm:$0xff] %v5114_v52  ;;  %v5126_v0 = vpop.f32.mrf.mxu2 }
 0x154   :  { %6451 = vst [vmem:[#allocation71_spill] sm:$0xff] %v5117_v46  ;;  %v5137_v23 = vpop.f32.mrf.mxu3  ;;  %1451 = vmatpush.bf16.msrb.mxu0 %v5124_v42  ;;  %1416 = vmatpush.bf16.msra.mxu1 %v5134_v8  ;;  %v3903_v46 = vld [vmem:[#allocation8 + $0xf0] sm:$0xf] }
 0x155   :  { %6452 = vst [vmem:[#allocation72_spill] sm:$0xff] %v5121_v25  ;;  %v5140_v3 = vpop.f32.mrf.mxu0  ;;  %1546 = vmatpush.bf16.msra.mxu3 %v4761_v4  ;;  %v4199_v25 = vld [vmem:[#allocation8 + $0xa0] sm:$0xf0]  ;;  %v4182_v4 = vld [vmem:[#allocation8 + $0x1c] sm:$0xf] }
 0x156   :  { %6453 = vst [vmem:[#allocation73_spill] sm:$0xff] %v5124_v42  ;;  %v5146_v34 = vpop.f32.mrf.mxu1  ;;  %v5148_v55 = vor.u32 %v4199_v25, %v3863_v60  ;;  %v5151_v42 = vperm.slane %v5131_v45, 0  ;;  %v5162_v60 = vor.u32 %v4182_v4, %v3797_v38  ;;  %v4196_v25 = vld [vmem:[#allocation8 + $0x88] sm:$0xf0]  ;;  %v4179_v4 = vld [vmem:[#allocation8 + $0x4] sm:$0xf] }
 0x157   :  { %6454 = vst [vmem:[#allocation74_spill] sm:$0xff] %v5126_v0  ;;  %v5144_v0 = vor.u32 %v4185_v30, %v3809_v10  ;;  %v3851_v30 = vld [vmem:[#allocation8 + $0x80] sm:$0xf]  ;;  %v5158_v10 = vperm.slane %v5131_v45, 1  ;;  %v3785_v38 = vld [vmem:[#allocation8 + $0xc] sm:$0xf0] }
 0x158   :  { %6455 = vst [vmem:[#allocation75_spill] sm:$0xff] %v5134_v8  ;;  %1452 = vmatpush.bf16.msrb.mxu0 %v5148_v55  ;;  %v5164_v37 = vor.u32 %v4196_v25, %v3851_v30 }
 0x159   :  { %6457 = vst [vmem:[#allocation76_spill] sm:$0xff] %v5137_v23  ;;  %v4210_v23 = vld [vmem:[#allocation8 + $0xf8] sm:$0xf0]  ;;  %1430 = vmatpush.bf16.msrb.mxu2 %v5144_v0  ;;  %1547 = vmatpush.bf16.msra.mxu3 %v4769_v13 }
 0x15a   :  { %6458 = vst [vmem:[#allocation77_spill] sm:$0xff] %v5144_v0  ;;  %v5154_v18 = vor.u32 %v4210_v23, %v3903_v46  ;;  %v3891_v0 = vld [vmem:[#allocation8 + $0xd8] sm:$0xf]  ;;  %v4207_v46 = vld [vmem:[#allocation8 + $0xe0] sm:$0xf0] }
 0x15b   :  { %6459 = vst [vmem:[#allocation78_spill] sm:$0xff] %v5148_v55  ;;  %v912_v23 = vpop.f32.mrf.mxu2  ;;  %v5167_v55 = vor.u32 %v4207_v46, %v3891_v0  ;;  %v5178_v0 = vor.u32 %v4179_v4, %v3785_v38  ;;  %v4193_v46 = vld [vmem:[#allocation8 + $0x70] sm:$0xf0]  ;;  %v4223_v38 = vld [vmem:[#allocation8 + $0x160] sm:$0xf0] }
 0x15c   :  { %6460 = vst [vmem:[#allocation79_spill] sm:$0xff] %v5151_v42  ;;  %1417 = vmatpush.bf16.msra.mxu1 %v5154_v18  ;;  %v913_v56 = vadd.f32 %v912_v23, %v5151_v42  ;;  %v925_v13 = vpop.f32.mrf.mxu3  ;;  %1453 = vmatpush.bf16.msrb.mxu0 %v5164_v37  ;;  %v5182_v23 = vor.u32 %v4193_v46, %v3839_v33  ;;  %v3879_v42 = vld [vmem:[#allocation8 + $0xc0] sm:$0xf]  ;;  %v4190_v33 = vld [vmem:[#allocation8 + $0x58] sm:$0xf0] }
 0x15d   :  { %6461 = vst [vmem:[#allocation80_spill] sm:$0xff] %v5154_v18  ;;  %1431 = vmatpush.bf16.msrb.mxu2 %v5162_v60  ;;  %v926_v30 = vadd.f32 %v925_v13, %v5158_v10  ;;  %v5174_v25 = vpop.f32.mrf.mxu0  ;;  %1548 = vmatpush.bf16.msra.mxu3 %v4802_v31  ;;  %v4226_v31 = vld [vmem:[#allocation8 + $0x178] sm:$0xf0] }
 0x15e   :  { %6462 = vst [vmem:[#allocation81_spill] sm:$0xff] %v5158_v10  ;;  %v942_v21 = vadd.f32 %v913_v56, %v571_v24  ;;  %v5180_v57 = vpop.f32.mrf.mxu1  ;;  %v3827_v24 = vld [vmem:[#allocation8 + $0x50] sm:$0xf] }
 0x15f   :  { %6463 = vst [vmem:[#allocation82_spill] sm:$0xff] %v5162_v60  ;;  %v4204_v60 = vld [vmem:[#allocation8 + $0xc8] sm:$0xf0] }
 0x160   :  { %6464 = vst [vmem:[#allocation83_spill] sm:$0xff] %v5164_v37  ;;  %1418 = vmatpush.bf16.msra.mxu1 %v5167_v55  ;;  %v943_v37 = vadd.f32 %v926_v30, %v4975_v41  ;;  %v5186_v13 = vor.u32 %v4204_v60, %v3879_v42  ;;  %v3747_v10 = vmul.f32 -1.442695, %v942_v21  ;;  %1454 = vmatpush.bf16.msrb.mxu0 %v5182_v23  ;;  %v3959_v60 = vld [vmem:[#allocation8 + $0x158] sm:$0xf] }
 0x161   :  { %6465 = vst [vmem:[#allocation84_spill] sm:$0xff] %v5167_v55  ;;  %1432 = vmatpush.bf16.msrb.mxu2 %v5178_v0  ;;  %1549 = vmatpush.bf16.msra.mxu3 %v4808_v48  ;;  %v5194_v41 = vor.u32 %v4190_v33, %v3827_v24  ;;  %v3947_v33 = vld [vmem:[#allocation8 + $0x140] sm:$0xf] }
 0x162   :  { %6466 = vst [vmem:[#allocation85_spill] sm:$0xff] %v5174_v25  ;;  %v3971_v25 = vld [vmem:[#allocation8 + $0x170] sm:$0xf]  ;;  %v3748_v4 = vmul.f32 -1.442695, %v943_v37  ;;  %4270 = vpow2.f32 %v3747_v10 }
 0x163   :  { %6467 = vst [vmem:[#allocation86_spill] sm:$0xff] %v5178_v0  ;;  %v5190_v56 = vor.u32 %v4226_v31, %v3971_v25  ;;  %v914_v42 = vpop.f32.mrf.mxu2  ;;  %v5199_v31 = vor.u32 %v4223_v38, %v3959_v60  ;;  %v3815_v37 = vld [vmem:[#allocation8 + $0x38] sm:$0xf]  ;;  %v4187_v25 = vld [vmem:[#allocation8 + $0x40] sm:$0xf0] }
 0x164   :  { %6468 = vst [vmem:[#allocation87_spill] sm:$0xff] %v5180_v57  ;;  %1419 = vmatpush.bf16.msra.mxu1 %v5186_v13  ;;  %4272 = vpow2.f32 %v3748_v4  ;;  %v927_v30 = vpop.f32.mrf.mxu3  ;;  %1455 = vmatpush.bf16.msrb.mxu0 %v5194_v41  ;;  %v5202_v21 = vor.u32 %v4187_v25, %v3815_v37  ;;  %v4220_v4 = vld [vmem:[#allocation8 + $0x148] sm:$0xf0]  ;;  %v3803_v38 = vld [vmem:[#allocation8 + $0x20] sm:$0xf] }
 0x165   :  { %6469 = vst [vmem:[#allocation88_spill] sm:$0xff] %v5182_v23  ;;  %1532 = vmatpush.bf16.msra.mxu2 %v4750_v54  ;;  %v662_v46 = vpop.f32.mrf.mxu0  ;;  %1550 = vmatpush.bf16.msra.mxu3 %v4840_v19  ;;  %v5210_v60 = vor.u32 %v4220_v4, %v3947_v33  ;;  %v4184_v30 = vld [vmem:[#allocation8 + $0x28] sm:$0xf0]  ;;  %v4217_v33 = vld [vmem:[#allocation8 + $0x130] sm:$0xf0] }
 0x166   :  { %6470 = vst [vmem:[#allocation89_spill] sm:$0xff] %v5186_v13  ;;  %v691_v10 = vpop.f32.mrf.mxu1  ;;  %v5213_v19 = vor.u32 %v4184_v30, %v3803_v38  ;;  %v3791_v4 = vld [vmem:[#allocation8 + $0x8] sm:$0xf]  ;;  %v4181_v30 = vld [vmem:[#allocation8 + $0x10] sm:$0xf0] }
 0x167   :  { %6471 = vst [vmem:[#allocation90_spill] sm:$0xff] %v5190_v56  ;;  %1420 = vmatmul.bf16.vlgmr.msra.gmra.mxu1 %v6456_v5  ;;  %v5206_v24 = vadd.f32 %v691_v10, %v662_v46  ;;  %v3935_v10 = vld [vmem:[#allocation8 + $0x128] sm:$0xf]  ;;  %v4214_v57 = vld [vmem:[#allocation8 + $0x118] sm:$0xf0] }
 0x168   :  { %6472 = vst [vmem:[#allocation91_spill] sm:$0xff] %v5194_v41  ;;  %1464 = vmatpush.bf16.msrb.mxu1 %v5190_v56  ;;  %v4271_v42 = vpop.eup %4270  ;;  %1456 = vmatpush.bf16.msrb.mxu0 %v5202_v21  ;;  %v5224_v38 = vor.u32 %v4217_v33, %v3935_v10  ;;  %v3899_v0 = vld [vmem:[#allocation8 + $0xe0] sm:$0xf] }
 0x169   :  { %1533 = vmatpush.bf16.msra.mxu2 %v4753_v58  ;;  %6473 = vst [vmem:[#allocation92_spill] sm:$0xff] %v5199_v31  ;;  %v947_v25 = vadd.f32 1.0, %v4271_v42  ;;  %1551 = vmatpush.bf16.msra.mxu3 %v4849_v44  ;;  %v3923_v44 = vld [vmem:[#allocation8 + $0x110] sm:$0xf] }
 0x16a   :  { %6474 = vst [vmem:[#allocation93_spill] sm:$0xff] %v5202_v21  ;;  %v4273_v37 = vpop.eup %4272  ;;  %v4205_v21 = vld [vmem:[#allocation8 + $0xd0] sm:$0xf0] }
 0x16b   :  { %6475 = vst [vmem:[#allocation94_spill] sm:$0xff] %v5206_v24  ;;  %v5215_v48 = vadd.f32 1.0, %v4273_v37  ;;  %4274 = vrcp.f32 %v947_v25  ;;  %v938_v46 = vpop.f32.mrf.mxu2  ;;  %v5228_v24 = vor.u32 %v4181_v30, %v3791_v4  ;;  %v957_v54 = vand.u32 2147483647, %v947_v25 }
 0x16c   :  { %1465 = vmatpush.bf16.msrb.mxu1 %v5199_v31  ;;  %6476 = vst [vmem:[#allocation95_spill] sm:$0xff] %v5210_v60  ;;  %1457 = vmatpush.bf16.msrb.mxu0 %v5213_v19  ;;  %vm953_vm13 = vweird.f32 %v947_v25 }
 0x16d   :  { %1534 = vmatpush.bf16.msra.mxu2 %v4759_v1  ;;  %6477 = vst [vmem:[#allocation96_spill] sm:$0xff] %v5213_v19  ;;  %4276 = vrcp.f32 %v5215_v48  ;;  %v5221_v42 = vpop.f32.mrf.mxu0  ;;  %1552 = vmatpush.bf16.msra.mxu3 %v4855_v61  ;;  %v4211_v1 = vld [vmem:[#allocation8 + $0x100] sm:$0xf0]  ;;  %v4208_v19 = vld [vmem:[#allocation8 + $0xe8] sm:$0xf0]  ;;  %vm958_vm3 = vcmp.eq.f32.partialorder %v957_v54, 8.507059e+37  ;;  %vm972_vm5 = vweird.f32 %v5215_v48 }
 0x16e   :  { %6478 = vst [vmem:[#allocation97_spill] sm:$0xff] %v5221_v42  ;;  %v5226_v37 = vpop.f32.mrf.mxu1  ;;  %v5234_v42 = vor.u32 %v4214_v57, %v3923_v44  ;;  %v959_v57 = vand.u32 2147483648, %v947_v25  ;;  %v976_v54 = vand.u32 2147483647, %v5215_v48 }
 0x16f   :  { %6479 = vst [vmem:[#allocation98_spill] sm:$0xff] %v5224_v38 }
 0x170   :  { %1466 = vmatpush.bf16.msrb.mxu1 %v5210_v60  ;;  %6480 = vst [vmem:[#allocation99_spill] sm:$0xff] %v5226_v37  ;;  %1458 = vmatpush.bf16.msrb.mxu0 %v5228_v24  ;;  %vm977_vm7 = vcmp.eq.f32.partialorder %v976_v54, 8.507059e+37  ;;  %v6504_v54 = vld [vmem:[#allocation62_spill] sm:$0xff] }
 0x171   :  { %1535 = vmatpush.bf16.msra.mxu2 %v4767_v11  ;;  %6481 = vst [vmem:[#allocation100_spill] sm:$0xff] %v5228_v24  ;;  %1646 = vmatpush.bf16.msrb.mxu3 %v5067_v20  ;;  %v4275_v61 = vpop.eup %4274  ;;  %v3911_v11 = vld [vmem:[#allocation8 + $0xf8] sm:$0xf]  ;;  %v5242_v20 = vperm.slane %v5131_v45, 2 }
 0x172   :  { %6482 = vst [vmem:[#allocation101_spill] sm:$0xff] %v5234_v42  ;;  %v949_v33 = vmul.f32 %v4275_v61, %v947_v25  ;;  %v5239_v37 = vor.u32 %v4211_v1, %v3911_v11  ;;  %vm954_vm12 = vweird.f32 %v4275_v61  ;;  %v5249_v11 = vor.u32 %v4208_v19, %v3899_v0 }
 0x173   :  { %v4277_v10 = vpop.eup %4276  ;;  %v940_v30 = vpop.f32.mrf.mxu2  ;;  %v939_v45 = vadd.f32 %v938_v46, %v5242_v20  ;;  %vm955_vm2 = vmor %vm953_vm13, %vm954_vm12  ;;  %v687_v0 = vadd.f32 %v5146_v34, %v5140_v3 }
 0x174   :  { %1467 = vmatpush.bf16.msrb.mxu1 %v5224_v38  ;;  %v968_v4 = vmul.f32 %v4277_v10, %v5215_v48  ;;  %6483 = vst [vmem:[#allocation102_spill] sm:$0xff] %v5239_v37  ;;  %vm973_vm4 = vweird.f32 %v4277_v10 }
 0x175   :  { %1536 = vmatpush.bf16.msra.mxu2 %v4800_v28  ;;  %1647 = vmatpush.bf16.msrb.mxu3 %v5084_v50  ;;  %v950_v28 = vsub.f32 1.0, %v949_v33  ;;  %v667_v58 = vpop.f32.mrf.mxu0  ;;  %6485 = vst [vmem:[#allocation104_spill] sm:$0xff] %v5249_v11  ;;  %vm974_vm6 = vmor %vm972_vm5, %vm973_vm4 }
 0x176   :  { %v969_v44 = vsub.f32 1.0, %v968_v4  ;;  %v696_v50 = vpop.f32.mrf.mxu1 }
 0x177   :  { %v951_v24 = vmul.f32 %v4275_v61, %v950_v28  ;;  %v5246_v1 = vadd.f32 %v696_v50, %v667_v58  ;;  %v960_v28 = vor.u32 1.1754944e-38, %v959_v57 }
 0x178   :  { %1468 = vmatpush.bf16.msrb.mxu1 %v5234_v42  ;;  %v970_v30 = vmul.f32 %v4277_v10, %v969_v44 }
 0x179   :  { %1537 = vmatpush.bf16.msra.mxu2 %v4806_v40  ;;  %1648 = vmatpush.bf16.msrb.mxu3 %v5096_v63  ;;  %6484 = vst [vmem:[#allocation103_spill] sm:$0xff] %v5246_v1  ;;  %v952_v33 = vadd.f32 %v4275_v61, %v951_v24  ;;  %v3887_v40 = vld [vmem:[#allocation8 + $0xc8] sm:$0xf]  ;;  %v978_v24 = vand.u32 2147483648, %v5215_v48  ;;  %v6517_v1 = vld [vmem:[#allocation22_spill] sm:$0xff] }
 0x17a   :  { %v971_v50 = vadd.f32 %v4277_v10, %v970_v30  ;;  %v5255_v19 = vor.u32 %v4205_v21, %v3887_v40 }
 0x17b   :  { %v956_v4 = vsel %vm955_vm2, %v4275_v61, %v952_v33  ;;  %v979_v3 = vor.u32 1.1754944e-38, %v978_v24  ;;  %v6502_v24 = vld [vmem:[#allocation61_spill] sm:$0xff] }
 0x17c   :  { %1469 = vmatpush.bf16.msrb.mxu1 %v5239_v37  ;;  %v961_v58 = vsel %vm958_vm3, %v960_v28, %v956_v4  ;;  %6486 = vst [vmem:[#allocation105_spill] sm:$0xff] %v5255_v19  ;;  %v975_v40 = vsel %vm974_vm6, %v4277_v10, %v971_v50  ;;  %v6497_v28 = vld [vmem:[#allocation73_spill] sm:$0xff]  ;;  %v6498_v4 = vld [vmem:[#allocation52_spill] sm:$0xff]  ;;  %v6500_v50 = vld [vmem:[#allocation78_spill] sm:$0xff] }
 0x17d   :  { %1538 = vmatpush.bf16.msra.mxu2 %v4838_v9  ;;  %1649 = vmatpush.bf16.msrb.mxu3 %v5114_v52  ;;  %v982_v25 = vmul.f32 %v961_v58, %v939_v45  ;;  %v5263_v61 = vpop.f32.mrf.mxu0  ;;  %v980_v34 = vsel %vm977_vm7, %v979_v3, %v975_v40  ;;  %v6499_v58 = vld [vmem:[#allocation56_spill] sm:$0xff]  ;;  %v5325_v40 = vpop.f32.mrf.mxu3  ;;  %v6506_v3 = vld [vmem:[#allocation69_spill] sm:$0xff] }
 0x17e   :  { %6487 = vst [vmem:[#allocation106_spill] sm:$0xff] %v5263_v61  ;;  %v5265_v44 = vpop.f32.mrf.mxu1  ;;  %v985_v48 = vsub.f32 1.0, %v980_v34  ;;  %v987_v45 = vmul.f32 0.0, %v980_v34  ;;  %v6507_v34 = vld [vmem:[#allocation72_spill] sm:$0xff] }
 0x17f   :  { %v983_v46 = vadd.f32 %v982_v25, %v687_v0  ;;  %6488 = vst [vmem:[#allocation107_spill] sm:$0xff] %v5265_v44  ;;  %v6501_v0 = vld [vmem:[#allocation57_spill] sm:$0xff]  ;;  %v6503_v25 = vld [vmem:[#allocation83_spill] sm:$0xff]  ;;  %v6515_v44 = vld [vmem:[#allocation18_spill] sm:$0xff] }
 0x180   :  { %1470 = vmatpush.bf16.msrb.mxu1 %v5249_v11  ;;  %v6516_v61 = vld [vmem:[#allocation20_spill] sm:$0xff] }
 0x181   :  { %1539 = vmatpush.bf16.msra.mxu2 %v4844_v32  ;;  %1650 = vmatpush.bf16.msrb.mxu3 %v5134_v8  ;;  %4278 = vtanh.f32 %v983_v46  ;;  %v6505_v46 = vld [vmem:[#allocation67_spill] sm:$0xff] }
 0x184   :  { %1471 = vmatpush.bf16.msrb.mxu1 %v5255_v19 }
 0x185   :  { %1651 = vmatpush.bf16.msrb.mxu3 %v5154_v18  ;;  %v672_v21 = vpop.f32.mrf.mxu0 }
 0x186   :  { %v701_v30 = vpop.f32.mrf.mxu1 }
 0x187   :  { %1472 = vmatmul.bf16.vlgmr.msrb.gmra.mxu1 %v6456_v5  ;;  %v4279_v57 = vpop.eup %4278  ;;  %v5274_v33 = vadd.f32 %v701_v30, %v672_v21  ;;  %v1068_v21 = vpop.f32.mrf.mxu3  ;;  %v6510_v30 = vld [vmem:[#allocation82_spill] sm:$0xff] }
 0x188   :  { %1619 = vmatpush.bf16.msra.mxu1 %v4957_v16  ;;  %v986_v10 = vmul.f32 %v4279_v57, %v985_v48  ;;  %v6508_v48 = vld [vmem:[#allocation77_spill] sm:$0xff]  ;;  %v6518_v21 = vld [vmem:[#allocation24_spill] sm:$0xff] }
 0x189   :  { %1652 = vmatpush.bf16.msrb.mxu3 %v5167_v55  ;;  %6489 = vst [vmem:[#allocation108_spill] sm:$0xff] %v5274_v33  ;;  %v6509_v57 = vld [vmem:[#allocation93_spill] sm:$0xff]  ;;  %v6514_v33 = vld [vmem:[#allocation100_spill] sm:$0xff] }
 0x18a   :  { %v5277_v16 = vadd.f32 %v987_v45, %v986_v10  ;;  %v6511_v10 = vld [vmem:[#allocation96_spill] sm:$0xff]  ;;  %v6512_v45 = vld [vmem:[#allocation86_spill] sm:$0xff] }
 0x18c   :  { %1620 = vmatpush.bf16.msra.mxu1 %v4967_v59  ;;  %v1070_v5 = vpack.c.bf16 %v5277_v16, %v5277_v16  ;;  %v6490_v59 = vld [vmem:[#allocation33_spill] sm:$0xff] }
 0x18d   :  { %1653 = vmatpush.bf16.msrb.mxu3 %v5186_v13 }
 0x18e   :  { %1407 = vmatmul.bf16.vlgmr.msra.gmra.mxu0 %v1070_v5  ;;  %1433 = vmatmul.bf16.vlgmr.msrb.gmra.mxu2 %v1070_v5 }
 0x18f   :  { %1553 = vmatmul.bf16.vlgmr.msra.gmra.mxu3 %v1070_v5  ;;  %1558 = vmatpush.bf16.msra.mxu0 %v4846_v36 }
 0x190   :  { %1621 = vmatpush.bf16.msra.mxu1 %v4973_v39  ;;  %1633 = vmatpush.bf16.msrb.mxu2 %v5031_v26  ;;  %v6491_v39 = vld [vmem:[#allocation46_spill] sm:$0xff] }
 0x191   :  { %1698 = vmatpush.bf16.msra.mxu3 %v5190_v56 }
 0x193   :  { %1559 = vmatpush.bf16.msra.mxu0 %v4852_v49 }
 0x194   :  { %1622 = vmatpush.bf16.msra.mxu1 %v4985_v43  ;;  %1634 = vmatpush.bf16.msrb.mxu2 %v5040_v51  ;;  %v6492_v43 = vld [vmem:[#allocation64_spill] sm:$0xff] }
 0x195   :  { %1699 = vmatpush.bf16.msra.mxu3 %v5199_v31 }
 0x197   :  { %1560 = vmatpush.bf16.msra.mxu0 %v4865_v6 }
 0x198   :  { %1623 = vmatpush.bf16.msra.mxu1 %v4995_v47  ;;  %1635 = vmatpush.bf16.msrb.mxu2 %v5046_v29  ;;  %v6493_v47 = vld [vmem:[#allocation34_spill] sm:$0xff] }
 0x199   :  { %1700 = vmatpush.bf16.msra.mxu3 %v5210_v60 }
 0x19b   :  { %1561 = vmatpush.bf16.msra.mxu0 %v4888_v15 }
 0x19c   :  { %1624 = vmatpush.bf16.msra.mxu1 %v5003_v53  ;;  %1636 = vmatpush.bf16.msrb.mxu2 %v5058_v14  ;;  %v6494_v53 = vld [vmem:[#allocation49_spill] sm:$0xff] }
 0x19d   :  { %1701 = vmatpush.bf16.msra.mxu3 %v5224_v38 }
 0x19e   :  { %1459 = vmatmul.bf16.vlgmr.msrb.gmra.mxu0 %v1070_v5  ;;  %1540 = vmatmul.bf16.vlgmr.msra.gmra.mxu2 %v1070_v5 }
 0x19f   :  { %1562 = vmatpush.bf16.msra.mxu0 %v4891_v22 }
 0x1a0   :  { %1625 = vmatpush.bf16.msra.mxu1 %v5009_v62  ;;  %1637 = vmatpush.bf16.msrb.mxu2 %v5073_v12  ;;  %v6495_v62 = vld [vmem:[#allocation51_spill] sm:$0xff] }
 0x1a1   :  { %1702 = vmatpush.bf16.msra.mxu3 %v5234_v42 }
 0x1a3   :  { %1563 = vmatpush.bf16.msra.mxu0 %v4894_v27 }
 0x1a4   :  { %1626 = vmatpush.bf16.msra.mxu1 %v5021_v2  ;;  %1638 = vmatpush.bf16.msrb.mxu2 %v5087_v7  ;;  %v6496_v2 = vld [vmem:[#allocation71_spill] sm:$0xff] }
 0x1a5   :  { %1703 = vmatpush.bf16.msra.mxu3 %v5239_v37 }
 0x1a7   :  { %1564 = vmatpush.bf16.msra.mxu0 %v6490_v59 }
 0x1a8   :  { %1672 = vmatpush.bf16.msrb.mxu1 %v5023_v17  ;;  %1639 = vmatpush.bf16.msrb.mxu2 %v6492_v43 }
 0x1a9   :  { %1704 = vmatpush.bf16.msra.mxu3 %v5249_v11  ;;  %v6519_v11 = vld [vmem:[#allocation26_spill] sm:$0xff] }
 0x1ab   :  { %1565 = vmatpush.bf16.msra.mxu0 %v6493_v47 }
 0x1ac   :  { %1673 = vmatpush.bf16.msrb.mxu1 %v5033_v35  ;;  %1640 = vmatpush.bf16.msrb.mxu2 %v6496_v2 }
 0x1ad   :  { %1705 = vmatpush.bf16.msra.mxu3 %v5255_v19 }
 0x1ae   :  { %1566 = vmatmul.bf16.vlgmr.msra.gmra.mxu0 %v1070_v5  ;;  %v6513_v5 = vld [vmem:[#allocation17_spill] sm:$0xff] }
 0x1af   :  { %1659 = vmatpush.bf16.msrb.mxu0 %v6495_v62 }
 0x1b0   :  { %1674 = vmatpush.bf16.msrb.mxu1 %v6491_v39  ;;  %1685 = vmatpush.bf16.msra.mxu2 %v6497_v28 }
 0x1b3   :  { %1660 = vmatpush.bf16.msrb.mxu0 %v6499_v58 }
 0x1b4   :  { %1675 = vmatpush.bf16.msrb.mxu1 %v6494_v53  ;;  %1686 = vmatpush.bf16.msra.mxu2 %v6500_v50 }
 0x1b7   :  { %1661 = vmatpush.bf16.msrb.mxu0 %v6502_v24 }
 0x1b8   :  { %1676 = vmatpush.bf16.msrb.mxu1 %v6498_v4  ;;  %1687 = vmatpush.bf16.msra.mxu2 %v6503_v25 }
 0x1bb   :  { %1662 = vmatpush.bf16.msrb.mxu0 %v6505_v46 }
 0x1bc   :  { %1677 = vmatpush.bf16.msrb.mxu1 %v6501_v0  ;;  %1688 = vmatpush.bf16.msra.mxu2 %v5182_v23 }
 0x1bf   :  { %1663 = vmatpush.bf16.msrb.mxu0 %v6507_v34  ;;  %v6526_v34 = vld [vmem:[#allocation38_spill] sm:$0xff] }
 0x1c0   :  { %1678 = vmatpush.bf16.msrb.mxu1 %v6504_v54  ;;  %1689 = vmatpush.bf16.msra.mxu2 %v5194_v41  ;;  %v6525_v41 = vld [vmem:[#allocation37_spill] sm:$0xff] }
 0x1c1   :  { %v631_v60 = vadd.f32 %v6526_v34, %v6525_v41 }
 0x1c3   :  { %1664 = vmatpush.bf16.msrb.mxu0 %v6508_v48  ;;  %v6524_v48 = vld [vmem:[#allocation81_spill] sm:$0xff] }
 0x1c4   :  { %1679 = vmatpush.bf16.msrb.mxu1 %v6506_v3  ;;  %1690 = vmatpush.bf16.msra.mxu2 %v6509_v57 }
 0x1c7   :  { %1665 = vmatpush.bf16.msrb.mxu0 %v6510_v30 }
 0x1c8   :  { %1691 = vmatpush.bf16.msra.mxu2 %v6511_v10  ;;  %v5344_v10 = vpop.f32.mrf.mxu1 }
 0x1c9   :  { %6520 = vst [vmem:[#allocation109_spill] sm:$0xff] %v5344_v10 }
 0x1cb   :  { %1666 = vmatpush.bf16.msrb.mxu0 %v6512_v45 }
 0x1cc   :  { %1692 = vmatpush.bf16.msra.mxu2 %v6514_v33 }
 0x1cf   :  { %1766 = vmatpush.bf16.msra.mxu0 %v6513_v5 }
 0x1d3   :  { %1767 = vmatpush.bf16.msra.mxu0 %v6515_v44  ;;  %v5347_v44 = vpop.f32.mrf.mxu0 }
 0x1d4   :  { %6521 = vst [vmem:[#allocation110_spill] sm:$0xff] %v5347_v44 }
 0x1d5   :  { %v1447_v19 = vpop.f32.mrf.mxu3 }
 0x1d7   :  { %1768 = vmatpush.bf16.msra.mxu0 %v6516_v61 }
 0x1db   :  { %1769 = vmatpush.bf16.msra.mxu0 %v6517_v1  ;;  %v1135_v1 = vld [vmem:[%s6211_s6] sm:$0x7] }
 0x1dc   :  { %v5352_v61 = vperm.slane %v1135_v1, 0  ;;  %v5355_v30 = vperm.slane %v1135_v1, 1  ;;  %v5363_v34 = vperm.slane %v1135_v1, 2 }
 0x1dd   :  { %v1449_v37 = vpop.f32.mrf.mxu3 }
 0x1de   :  { %6522 = vst [vmem:[#allocation111_spill] sm:$0xff] %v5352_v61 }
 0x1df   :  { %1770 = vmatpush.bf16.msra.mxu0 %v6518_v21  ;;  %6523 = vst [vmem:[#allocation112_spill] sm:$0xff] %v5355_v30 }
 0x1e0   :  { %6529 = vst [vmem:[#allocation37_spill] sm:$0xff] %v5363_v34 }
 0x1e3   :  { %1771 = vmatpush.bf16.msra.mxu0 %v6519_v11 }
 0x1e4   :  { %v1421_v5 = vpop.f32.mrf.mxu1 }
 0x1e7   :  { %1772 = vmatpush.bf16.msra.mxu0 %v4838_v9 }
 0x1eb   :  { %1773 = vmatpush.bf16.msra.mxu0 %v4844_v32 }
 0x1ec   :  { %v1423_v33 = vpop.f32.mrf.mxu1 }
 0x204   :  { %v1473_v45 = vpop.f32.mrf.mxu1 }
 0x20b   :  { %v1408_v11 = vpop.f32.mrf.mxu0 }
 0x20c   :  { %v1475_v21 = vpop.f32.mrf.mxu1  ;;  %v1409_v37 = vadd.f32 %v1408_v11, %v5352_v61 }
 0x20e   :  { %v1422_v9 = vadd.f32 %v1421_v5, %v1409_v37 }
 0x210   :  { %v3973_v10 = vmul.f32 -1.442695, %v1422_v9 }
 0x211   :  { %v1434_v32 = vpop.f32.mrf.mxu2 }
 0x212   :  { %4280 = vpow2.f32 %v3973_v10  ;;  %v1435_v33 = vadd.f32 %v1434_v32, %v5355_v30  ;;  %v1554_v42 = vpop.f32.mrf.mxu3 }
 0x213   :  { %v1410_v44 = vpop.f32.mrf.mxu0  ;;  %v1555_v38 = vadd.f32 %v1554_v42, %v6524_v48  ;;  %v6528_v48 = vld [vmem:[#allocation36_spill] sm:$0xff] }
 0x214   :  { %v1448_v57 = vadd.f32 %v1447_v19, %v1435_v33  ;;  %v6527_v33 = vld [vmem:[#allocation35_spill] sm:$0xff] }
 0x215   :  { %v1572_v11 = vadd.f32 %v1555_v38, %v631_v60  ;;  %v573_v41 = vadd.f32 %v6528_v48, %v6527_v33 }
 0x216   :  { %v3974_v21 = vmul.f32 -1.442695, %v1448_v57  ;;  %v6530_v57 = vld [vmem:[#allocation79_spill] sm:$0xff] }
 0x217   :  { %v3976_v10 = vmul.f32 -1.442695, %v1572_v11 }
 0x218   :  { %v4281_v23 = vpop.eup %4280  ;;  %4282 = vpow2.f32 %v3974_v21 }
 0x219   :  { %v1480_v5 = vadd.f32 1.0, %v4281_v23  ;;  %v1436_v37 = vpop.f32.mrf.mxu2 }
 0x21a   :  { %v1556_v61 = vpop.f32.mrf.mxu3 }
 0x21b   :  { %4284 = vrcp.f32 %v1480_v5  ;;  %v1460_v9 = vpop.f32.mrf.mxu0  ;;  %v1492_v61 = vand.u32 2147483648, %v1480_v5  ;;  %vm1486_vm9 = vweird.f32 %v1480_v5 }
 0x21c   :  { %4286 = vpow2.f32 %v3976_v10  ;;  %v1490_v10 = vand.u32 2147483647, %v1480_v5  ;;  %v1461_v48 = vadd.f32 %v1460_v9, %v5363_v34 }
 0x21e   :  { %v4283_v46 = vpop.eup %4282  ;;  %vm1491_vm11 = vcmp.eq.f32.partialorder %v1490_v10, 8.507059e+37 }
 0x21f   :  { %v1499_v32 = vadd.f32 1.0, %v4283_v46  ;;  %v5369_v46 = vld [vmem:[%s6213_s8] ss:$0 sm:$0xff] }
 0x220   :  { %6531 = vst [vmem:[#allocation38_spill] sm:$0xff] %v5369_v46 }
 0x221   :  { %v4285_v44 = vpop.eup %4284  ;;  %4288 = vrcp.f32 %v1499_v32  ;;  %v1541_v19 = vpop.f32.mrf.mxu2  ;;  %vm1505_vm15 = vweird.f32 %v1499_v32 }
 0x222   :  { %v1482_v42 = vmul.f32 %v4285_v44, %v1480_v5  ;;  %v1542_v60 = vadd.f32 %v1541_v19, %v6530_v57  ;;  %v4287_v37 = vpop.eup %4286  ;;  %vm1487_vm8 = vweird.f32 %v4285_v44  ;;  %v1474_v57 = vadd.f32 %v1473_v45, %v1461_v48 }
 0x223   :  { %v1462_v23 = vpop.f32.mrf.mxu0  ;;  %v5372_v19 = vadd.f32 1.0, %v4287_v37  ;;  %vm1488_vm10 = vmor %vm1486_vm9, %vm1487_vm8  ;;  %v1509_v5 = vand.u32 2147483647, %v1499_v32 }
 0x224   :  { %v1483_v38 = vsub.f32 1.0, %v1482_v42  ;;  %v1571_v21 = vadd.f32 %v1542_v60, %v573_v41  ;;  %v1493_v42 = vor.u32 1.1754944e-38, %v1492_v61  ;;  %v1067_v60 = vadd.f32 %v5369_v46, %v5325_v40 }
 0x225   :  { %vm1510_vm1 = vcmp.eq.f32.partialorder %v1509_v5, 8.507059e+37  ;;  %vm1601_vm5 = vweird.f32 %v5372_v19 }
 0x226   :  { %v1484_v11 = vmul.f32 %v4285_v44, %v1483_v38  ;;  %v3975_v1 = vmul.f32 -1.442695, %v1571_v21  ;;  %v1511_v21 = vand.u32 2147483648, %v1499_v32 }
 0x227   :  { %v4289_v30 = vpop.eup %4288 }
 0x228   :  { %v1501_v33 = vmul.f32 %v4289_v30, %v1499_v32  ;;  %v1485_v31 = vadd.f32 %v4285_v44, %v1484_v11  ;;  %4290 = vpow2.f32 %v3975_v1  ;;  %vm1506_vm14 = vweird.f32 %v4289_v30 }
 0x229   :  { %v1543_v41 = vpop.f32.mrf.mxu2  ;;  %4292 = vrcp.f32 %v5372_v19  ;;  %vm1507_vm0 = vmor %vm1505_vm15, %vm1506_vm14  ;;  %v1512_v40 = vor.u32 1.1754944e-38, %v1511_v21 }
 0x22a   :  { %v1502_v23 = vsub.f32 1.0, %v1501_v33  ;;  %v1489_v38 = vsel %vm1488_vm10, %v4285_v44, %v1485_v31 }
 0x22b   :  { %v1494_v25 = vsel %vm1491_vm11, %v1493_v42, %v1489_v38  ;;  %v1567_v24 = vpop.f32.mrf.mxu0 }
 0x22c   :  { %v1503_v9 = vmul.f32 %v4289_v30, %v1502_v23  ;;  %v1515_v11 = vmul.f32 %v1494_v25, %v1067_v60 }
 0x22e   :  { %v1504_v61 = vadd.f32 %v4289_v30, %v1503_v9  ;;  %v1516_v37 = vadd.f32 %v1515_v11, %v1474_v57  ;;  %v4291_v1 = vpop.eup %4290 }
 0x22f   :  { %v1576_v31 = vadd.f32 1.0, %v4291_v1  ;;  %v4293_v44 = vpop.eup %4292  ;;  %v5386_v1 = vld [vmem:[%s6212_s7 + $0x38] sm:$0xff] }
 0x230   :  { %v1508_v41 = vsel %vm1507_vm0, %v4289_v30, %v1504_v61  ;;  %4294 = vtanh.f32 %v1516_v37  ;;  %v1597_v25 = vmul.f32 %v4293_v44, %v5372_v19  ;;  %v6533_v37 = vld [vmem:[#allocation19_spill] sm:$0xff]  ;;  %vm1602_vm4 = vweird.f32 %v4293_v44 }
 0x231   :  { %v1513_v45 = vsel %vm1510_vm1, %v1512_v40, %v1508_v41  ;;  %4296 = vrcp.f32 %v1576_v31  ;;  %v1588_v21 = vand.u32 2147483648, %v1576_v31  ;;  %v1586_v5 = vand.u32 2147483647, %v1576_v31  ;;  %vm1603_vm6 = vmor %vm1601_vm5, %vm1602_vm4 }
 0x232   :  { %v1518_v48 = vsub.f32 1.0, %v1513_v45  ;;  %v1520_v60 = vmul.f32 0.0, %v1513_v45  ;;  %v1598_v38 = vsub.f32 1.0, %v1597_v25  ;;  %vm1582_vm13 = vweird.f32 %v1576_v31  ;;  %v6534_v25 = vld [vmem:[#allocation21_spill] sm:$0xff] }
 0x233   :  { %v1569_v10 = vpop.f32.mrf.mxu0  ;;  %v1589_v40 = vor.u32 1.1754944e-38, %v1588_v21  ;;  %v1568_v45 = vadd.f32 %v1567_v24, %v5242_v20  ;;  %vm1587_vm3 = vcmp.eq.f32.partialorder %v1586_v5, 8.507059e+37  ;;  %v5406_v5 = vld [vmem:[%s6212_s7 + $0x28] sm:$0xff] }
 0x234   :  { %v1599_v61 = vmul.f32 %v4293_v44, %v1598_v38  ;;  %v1607_v38 = vand.u32 2147483648, %v5372_v19 }
 0x236   :  { %v4295_v33 = vpop.eup %4294 }
 0x237   :  { %v1519_v42 = vmul.f32 %v4295_v33, %v1518_v48  ;;  %v4297_v32 = vpop.eup %4296  ;;  %v1600_v33 = vadd.f32 %v4293_v44, %v1599_v61  ;;  %v1608_v61 = vor.u32 1.1754944e-38, %v1607_v38  ;;  %v6540_v38 = vld [vmem:[#allocation29_spill] sm:$0xff] }
 0x238   :  { %v1578_v23 = vmul.f32 %v4297_v32, %v1576_v31  ;;  %vm1583_vm12 = vweird.f32 %v4297_v32  ;;  %v6536_v31 = vld [vmem:[#allocation87_spill] sm:$0xff] }
 0x239   :  { %v5378_v57 = vadd.f32 %v1520_v60, %v1519_v42  ;;  %vm1584_vm2 = vmor %vm1582_vm13, %vm1583_vm12  ;;  %v5394_v42 = vld [vmem:[%s6212_s7 + $0x30] sm:$0xff]  ;;  %v1604_v21 = vsel %vm1603_vm6, %v4293_v44, %v1600_v33  ;;  %v6539_v33 = vld [vmem:[#allocation27_spill] sm:$0xff] }
 0x23a   :  { %v1579_v30 = vsub.f32 1.0, %v1578_v23  ;;  %v6535_v60 = vld [vmem:[#allocation85_spill] sm:$0xff] }
 0x23b   :  { %6532 = vst [vmem:[#allocation35_spill] sm:$0xff] %v5378_v57  ;;  %v1618_v9 = vpack.c.bf16 %v5378_v57, %v5378_v57  ;;  %v689_v23 = vadd.f32 %v6536_v31, %v6535_v60  ;;  %v5421_v60 = vld [vmem:[%s6212_s7 + $0x18] sm:$0xff] }
 0x23c   :  { %v1580_v11 = vmul.f32 %v4297_v32, %v1579_v30 }
 0x23d   :  { %1627 = vmatmul.bf16.vlgmr.msra.gmra.mxu1 %v1618_v9  ;;  %1654 = vmatmul.bf16.vlgmr.msrb.gmra.mxu3 %v1618_v9 }
 0x23e   :  { %1779 = vmatpush.bf16.msra.mxu1 %v6533_v37  ;;  %1853 = vmatpush.bf16.msrb.mxu3 %v5386_v1  ;;  %v1581_v41 = vadd.f32 %v4297_v32, %v1580_v11  ;;  %v6537_v11 = vld [vmem:[#allocation23_spill] sm:$0xff] }
 0x240   :  { %v1585_v10 = vsel %vm1584_vm2, %v4297_v32, %v1581_v41  ;;  %v1605_v32 = vand.u32 2147483647, %v5372_v19  ;;  %v5413_v19 = vld [vmem:[%s6212_s7 + $0x20] sm:$0xff] }
 0x241   :  { %v1590_v48 = vsel %vm1587_vm3, %v1589_v40, %v1585_v10  ;;  %v6538_v40 = vld [vmem:[#allocation25_spill] sm:$0xff] }
 0x242   :  { %1780 = vmatpush.bf16.msra.mxu1 %v6534_v25  ;;  %1854 = vmatpush.bf16.msrb.mxu3 %v5394_v42  ;;  %v1611_v24 = vmul.f32 %v1590_v48, %v1568_v45  ;;  %vm1606_vm7 = vcmp.eq.f32.partialorder %v1605_v32, 8.507059e+37  ;;  %v6542_v32 = vld [vmem:[#allocation32_spill] sm:$0xff] }
 0x243   :  { %v1609_v41 = vsel %vm1606_vm7, %v1608_v61, %v1604_v21  ;;  %v6543_v21 = vld [vmem:[#allocation54_spill] sm:$0xff]  ;;  %v6544_v61 = vld [vmem:[#allocation59_spill] sm:$0xff] }
 0x244   :  { %v1612_v30 = vadd.f32 %v1611_v24, %v689_v23  ;;  %v1614_v44 = vsub.f32 1.0, %v1609_v41  ;;  %v1616_v48 = vmul.f32 %v1609_v41, %v5277_v16  ;;  %v5432_v16 = vld [vmem:[%s6212_s7 + $0x10] sm:$0xff]  ;;  %v5441_v24 = vld [vmem:[%s6212_s7 + $0x8] sm:$0xff] }
 0x245   :  { %v6545_v41 = vld [vmem:[#allocation61_spill] sm:$0xff] }
 0x246   :  { %1781 = vmatpush.bf16.msra.mxu1 %v6537_v11  ;;  %1855 = vmatpush.bf16.msrb.mxu3 %v5406_v5  ;;  %4298 = vtanh.f32 %v1612_v30  ;;  %v5450_v30 = vld [vmem:[%s6212_s7] sm:$0xff] }
 0x24a   :  { %1782 = vmatpush.bf16.msra.mxu1 %v6538_v40  ;;  %1856 = vmatpush.bf16.msrb.mxu3 %v5413_v19 }
 0x24c   :  { %v4299_v45 = vpop.eup %4298 }
 0x24d   :  { %1680 = vmatmul.bf16.vlgmr.msrb.gmra.mxu1 %v1618_v9  ;;  %1706 = vmatmul.bf16.vlgmr.msra.gmra.mxu3 %v1618_v9  ;;  %v1615_v10 = vmul.f32 %v4299_v45, %v1614_v44  ;;  %v6541_v9 = vld [vmem:[#allocation31_spill] sm:$0xff]  ;;  %v6547_v45 = vld [vmem:[#allocation92_spill] sm:$0xff] }
 0x24e   :  { %1783 = vmatpush.bf16.msra.mxu1 %v6539_v33  ;;  %1857 = vmatpush.bf16.msrb.mxu3 %v5421_v60  ;;  %v6546_v44 = vld [vmem:[#allocation83_spill] sm:$0xff] }
 0x24f   :  { %v5424_v31 = vadd.f32 %v1616_v48, %v1615_v10  ;;  %v6548_v10 = vld [vmem:[#allocation67_spill] sm:$0xff]  ;;  %v6549_v48 = vld [vmem:[#allocation88_spill] sm:$0xff] }
 0x251   :  { %v1632_v23 = vpack.c.bf16 %v5424_v31, %v5424_v31 }
 0x252   :  { %1784 = vmatpush.bf16.msra.mxu1 %v6540_v38  ;;  %1858 = vmatpush.bf16.msrb.mxu3 %v5432_v16 }
 0x253   :  { %1641 = vmatmul.bf16.vlgmr.msrb.gmra.mxu2 %v1632_v23  ;;  %1667 = vmatmul.bf16.vlgmr.msrb.gmra.mxu0 %v1632_v23 }
 0x254   :  { %1792 = vmatpush.bf16.msrb.mxu2 %v4846_v36  ;;  %1867 = vmatpush.bf16.msrb.mxu0 %v5031_v26 }
 0x256   :  { %1785 = vmatpush.bf16.msra.mxu1 %v6541_v9  ;;  %1859 = vmatpush.bf16.msrb.mxu3 %v5441_v24 }
 0x258   :  { %1793 = vmatpush.bf16.msrb.mxu2 %v4852_v49  ;;  %1868 = vmatpush.bf16.msrb.mxu0 %v5040_v51 }
 0x25a   :  { %1786 = vmatpush.bf16.msra.mxu1 %v6542_v32  ;;  %1860 = vmatpush.bf16.msrb.mxu3 %v5450_v30 }
 0x25c   :  { %1794 = vmatpush.bf16.msrb.mxu2 %v4865_v6  ;;  %1869 = vmatpush.bf16.msrb.mxu0 %v5046_v29 }
 0x25d   :  { %1787 = vmatmul.bf16.vlgmr.msra.gmra.mxu1 %v1632_v23 }
 0x25e   :  { %1880 = vmatpush.bf16.msrb.mxu1 %v6543_v21  ;;  %1906 = vmatpush.bf16.msra.mxu3 %v5023_v17 }
 0x260   :  { %1795 = vmatpush.bf16.msrb.mxu2 %v4888_v15  ;;  %1870 = vmatpush.bf16.msrb.mxu0 %v5058_v14 }
 0x262   :  { %1881 = vmatpush.bf16.msrb.mxu1 %v6544_v61  ;;  %1907 = vmatpush.bf16.msra.mxu3 %v5033_v35 }
 0x263   :  { %1693 = vmatmul.bf16.vlgmr.msra.gmra.mxu2 %v1632_v23  ;;  %1774 = vmatmul.bf16.vlgmr.msra.gmra.mxu0 %v1632_v23 }
 0x264   :  { %1796 = vmatpush.bf16.msrb.mxu2 %v4891_v22  ;;  %1871 = vmatpush.bf16.msrb.mxu0 %v5073_v12 }
 0x266   :  { %1882 = vmatpush.bf16.msrb.mxu1 %v5096_v63  ;;  %1908 = vmatpush.bf16.msra.mxu3 %v6491_v39 }
 0x268   :  { %1797 = vmatpush.bf16.msrb.mxu2 %v4894_v27  ;;  %1872 = vmatpush.bf16.msrb.mxu0 %v5087_v7 }
 0x26a   :  { %1883 = vmatpush.bf16.msrb.mxu1 %v5114_v52  ;;  %1909 = vmatpush.bf16.msra.mxu3 %v6494_v53 }
 0x26c   :  { %1798 = vmatpush.bf16.msrb.mxu2 %v6490_v59  ;;  %1873 = vmatpush.bf16.msrb.mxu0 %v6492_v43 }
 0x26e   :  { %1884 = vmatpush.bf16.msrb.mxu1 %v5134_v8  ;;  %1910 = vmatpush.bf16.msra.mxu3 %v6498_v4 }
 0x270   :  { %1799 = vmatpush.bf16.msrb.mxu2 %v6493_v47  ;;  %1874 = vmatpush.bf16.msrb.mxu0 %v6496_v2 }
 0x272   :  { %1885 = vmatpush.bf16.msrb.mxu1 %v5154_v18  ;;  %1911 = vmatpush.bf16.msra.mxu3 %v6501_v0  ;;  %v6556_v0 = vld [vmem:[#allocation101_spill] sm:$0xff]  ;;  %v6557_v18 = vld [vmem:[#allocation82_spill] sm:$0xff] }
 0x273   :  { %1800 = vmatmul.bf16.vlgmr.msrb.gmra.mxu2 %v1632_v23  ;;  %v6550_v23 = vld [vmem:[#allocation95_spill] sm:$0xff] }
 0x274   :  { %1893 = vmatpush.bf16.msra.mxu2 %v6495_v62  ;;  %1919 = vmatpush.bf16.msra.mxu0 %v6497_v28  ;;  %v6574_v28 = vld [vmem:[#allocation81_spill] sm:$0xff]  ;;  %v6575_v62 = vld [vmem:[#allocation40_spill] sm:$0xff] }
 0x276   :  { %1886 = vmatpush.bf16.msrb.mxu1 %v5167_v55  ;;  %1912 = vmatpush.bf16.msra.mxu3 %v6504_v54  ;;  %v6551_v54 = vld [vmem:[#allocation72_spill] sm:$0xff]  ;;  %v6553_v55 = vld [vmem:[#allocation98_spill] sm:$0xff] }
 0x278   :  { %1894 = vmatpush.bf16.msra.mxu2 %v6499_v58  ;;  %1920 = vmatpush.bf16.msra.mxu0 %v6500_v50 }
 0x27a   :  { %1887 = vmatpush.bf16.msrb.mxu1 %v5186_v13  ;;  %1913 = vmatpush.bf16.msra.mxu3 %v6506_v3  ;;  %v6552_v13 = vld [vmem:[#allocation91_spill] sm:$0xff]  ;;  %v6555_v3 = vld [vmem:[#allocation93_spill] sm:$0xff] }
 0x27c   :  { %1895 = vmatpush.bf16.msra.mxu2 %v6545_v41  ;;  %1921 = vmatpush.bf16.msra.mxu0 %v6546_v44 }
 0x27e   :  { %1932 = vmatpush.bf16.msra.mxu1 %v5190_v56  ;;  %v6554_v56 = vld [vmem:[#allocation77_spill] sm:$0xff] }
 0x280   :  { %1896 = vmatpush.bf16.msra.mxu2 %v6548_v10  ;;  %1922 = vmatpush.bf16.msra.mxu0 %v6549_v48  ;;  %v6559_v10 = vld [vmem:[#allocation102_spill] sm:$0xff] }
 0x281   :  { %v6560_v48 = vld [vmem:[#allocation86_spill] sm:$0xff] }
 0x282   :  { %1933 = vmatpush.bf16.msra.mxu1 %v6547_v45  ;;  %v6558_v45 = vld [vmem:[#allocation96_spill] sm:$0xff] }
 0x284   :  { %1897 = vmatpush.bf16.msra.mxu2 %v6551_v54  ;;  %1923 = vmatpush.bf16.msra.mxu0 %v6552_v13  ;;  %v6562_v54 = vld [vmem:[#allocation100_spill] sm:$0xff] }
 0x285   :  { %v6563_v13 = vld [vmem:[#allocation104_spill] sm:$0xff] }
 0x286   :  { %1934 = vmatpush.bf16.msra.mxu1 %v6550_v23  ;;  %v6561_v23 = vld [vmem:[#allocation17_spill] sm:$0xff] }
 0x288   :  { %1898 = vmatpush.bf16.msra.mxu2 %v6554_v56  ;;  %1924 = vmatpush.bf16.msra.mxu0 %v6555_v3  ;;  %v6565_v56 = vld [vmem:[#allocation105_spill] sm:$0xff]  ;;  %v6566_v3 = vld [vmem:[#allocation20_spill] sm:$0xff] }
 0x28a   :  { %1935 = vmatpush.bf16.msra.mxu1 %v6553_v55  ;;  %v6564_v55 = vld [vmem:[#allocation18_spill] sm:$0xff] }
 0x28c   :  { %1899 = vmatpush.bf16.msra.mxu2 %v6557_v18  ;;  %1925 = vmatpush.bf16.msra.mxu0 %v6558_v45  ;;  %v6568_v18 = vld [vmem:[#allocation24_spill] sm:$0xff]  ;;  %v6569_v45 = vld [vmem:[#allocation26_spill] sm:$0xff] }
 0x28e   :  { %1936 = vmatpush.bf16.msra.mxu1 %v6556_v0  ;;  %v6567_v0 = vld [vmem:[#allocation22_spill] sm:$0xff] }
 0x290   :  { %1900 = vmatpush.bf16.msra.mxu2 %v6560_v48  ;;  %1926 = vmatpush.bf16.msra.mxu0 %v6562_v54  ;;  %v6571_v48 = vld [vmem:[#allocation30_spill] sm:$0xff] }
 0x292   :  { %1937 = vmatpush.bf16.msra.mxu1 %v6559_v10  ;;  %v6570_v10 = vld [vmem:[#allocation28_spill] sm:$0xff] }
 0x294   :  { %2000 = vmatpush.bf16.msrb.mxu2 %v6561_v23 }
 0x296   :  { %1938 = vmatpush.bf16.msra.mxu1 %v6563_v13 }
 0x298   :  { %2001 = vmatpush.bf16.msrb.mxu2 %v6564_v55 }
 0x29a   :  { %1939 = vmatpush.bf16.msra.mxu1 %v6565_v56 }
 0x29c   :  { %2002 = vmatpush.bf16.msrb.mxu2 %v6566_v3  ;;  %v6572_v3 = vld [vmem:[#allocation112_spill] sm:$0xff] }
 0x2a0   :  { %2003 = vmatpush.bf16.msrb.mxu2 %v6567_v0 }
 0x2a4   :  { %2004 = vmatpush.bf16.msrb.mxu2 %v6568_v18 }
 0x2a8   :  { %2005 = vmatpush.bf16.msrb.mxu2 %v6569_v45  ;;  %v6573_v45 = vld [vmem:[#allocation111_spill] sm:$0xff] }
 0x2ac   :  { %2006 = vmatpush.bf16.msrb.mxu2 %v6570_v10 }
 0x2b0   :  { %2007 = vmatpush.bf16.msrb.mxu2 %v6571_v48 }
 0x2ba   :  { %v5513_v23 = vpop.f32.mrf.mxu1 }
 0x2c0   :  { %v1655_v54 = vpop.f32.mrf.mxu3 }
 0x2c2   :  { %v1630_v13 = vpop.f32.mrf.mxu1 }
 0x2c8   :  { %v1657_v44 = vpop.f32.mrf.mxu3 }
 0x2ca   :  { %v1681_v55 = vpop.f32.mrf.mxu1 }
 0x2d0   :  { %v5515_v41 = vpop.f32.mrf.mxu3  ;;  %v1668_v56 = vpop.f32.mrf.mxu0 }
 0x2d1   :  { %v1669_v4 = vadd.f32 %v1668_v56, %v6572_v3 }
 0x2d2   :  { %v1683_v0 = vpop.f32.mrf.mxu1 }
 0x2d3   :  { %v1682_v8 = vadd.f32 %v1681_v55, %v1669_v4  ;;  %v6577_v0 = vld [vmem:[#allocation39_spill] sm:$0xff] }
 0x2d5   :  { %v3978_v18 = vmul.f32 -1.442695, %v1682_v8  ;;  %v6576_v8 = vld [vmem:[#allocation79_spill] sm:$0xff] }
 0x2d6   :  { %v1642_v50 = vpop.f32.mrf.mxu2 }
 0x2d7   :  { %4300 = vpow2.f32 %v3978_v18  ;;  %v1643_v10 = vadd.f32 %v1642_v50, %v6573_v45 }
 0x2d8   :  { %v1709_v58 = vpop.f32.mrf.mxu3  ;;  %v1670_v48 = vpop.f32.mrf.mxu0 }
 0x2d9   :  { %v1656_v53 = vadd.f32 %v1655_v54, %v1643_v10 }
 0x2da   :  { %v1788_v52 = vpop.f32.mrf.mxu1 }
 0x2db   :  { %v1789_v13 = vadd.f32 %v1788_v52, %v6574_v28  ;;  %v3977_v44 = vmul.f32 -1.442695, %v1656_v53 }
 0x2dd   :  { %v1806_v2 = vadd.f32 %v1789_v13, %v6575_v62  ;;  %v4301_v47 = vpop.eup %4300  ;;  %4302 = vpow2.f32 %v3977_v44 }
 0x2de   :  { %v5521_v39 = vadd.f32 1.0, %v4301_v47  ;;  %v1644_v55 = vpop.f32.mrf.mxu2 }
 0x2df   :  { %v3980_v56 = vmul.f32 -1.442695, %v1806_v2 }
 0x2e0   :  { %4304 = vrcp.f32 %v5521_v39  ;;  %v1775_v18 = vpop.f32.mrf.mxu0  ;;  %vm1739_vm15 = vweird.f32 %v5521_v39 }
 0x2e1   :  { %4306 = vpow2.f32 %v3980_v56  ;;  %v1776_v4 = vadd.f32 %v1775_v18, %v6576_v8 }
 0x2e2   :  { %v1790_v58 = vpop.f32.mrf.mxu1 }
 0x2e3   :  { %v4303_v50 = vpop.eup %4302  ;;  %v1805_v54 = vadd.f32 %v1776_v4, %v6577_v0 }
 0x2e4   :  { %v1714_v52 = vadd.f32 1.0, %v4303_v50 }
 0x2e5   :  { %v3979_v53 = vmul.f32 -1.442695, %v1805_v54 }
 0x2e6   :  { %v4305_v10 = vpop.eup %4304  ;;  %4308 = vrcp.f32 %v1714_v52  ;;  %v1694_v62 = vpop.f32.mrf.mxu2  ;;  %v1726_v0 = vand.u32 2147483648, %v1714_v52  ;;  %vm1720_vm9 = vweird.f32 %v1714_v52 }
 0x2e7   :  { %v4307_v48 = vpop.eup %4306  ;;  %4310 = vpow2.f32 %v3979_v53  ;;  %v1735_v13 = vmul.f32 %v4305_v10, %v5521_v39  ;;  %v1724_v53 = vand.u32 2147483647, %v1714_v52  ;;  %vm1740_vm14 = vweird.f32 %v4305_v10 }
 0x2e8   :  { %v5526_v47 = vadd.f32 1.0, %v4307_v48  ;;  %v1777_v2 = vpop.f32.mrf.mxu0  ;;  %vm1741_vm0 = vmor %vm1739_vm15, %vm1740_vm14 }
 0x2e9   :  { %v1736_v18 = vsub.f32 1.0, %v1735_v13  ;;  %v1695_v2 = vadd.f32 %v1694_v62, %v5363_v34  ;;  %v1727_v13 = vor.u32 1.1754944e-38, %v1726_v0  ;;  %vm1725_vm11 = vcmp.eq.f32.partialorder %v1724_v53, 8.507059e+37 }
 0x2ea   :  { %4312 = vrcp.f32 %v5526_v47  ;;  %v1743_v0 = vand.u32 2147483647, %v5521_v39  ;;  %vm1835_vm5 = vweird.f32 %v5526_v47 }
 0x2eb   :  { %v1737_v48 = vmul.f32 %v4305_v10, %v1736_v18 }
 0x2ec   :  { %v4309_v44 = vpop.eup %4308  ;;  %vm1744_vm12 = vcmp.eq.f32.partialorder %v1743_v0, 8.507059e+37 }
 0x2ed   :  { %v4311_v56 = vpop.eup %4310  ;;  %v1716_v55 = vmul.f32 %v4309_v44, %v1714_v52  ;;  %vm1721_vm8 = vweird.f32 %v4309_v44  ;;  %v1738_v18 = vadd.f32 %v4305_v10, %v1737_v48 }
 0x2ee   :  { %v1810_v58 = vadd.f32 1.0, %v4311_v56  ;;  %v1696_v4 = vpop.f32.mrf.mxu2  ;;  %vm1722_vm10 = vmor %vm1720_vm9, %vm1721_vm8  ;;  %v1629_v56 = vadd.f32 %v5369_v46, %v5513_v23 }
 0x2ef   :  { %v1717_v50 = vsub.f32 1.0, %v1716_v55  ;;  %v1742_v53 = vsel %vm1741_vm0, %v4305_v10, %v1738_v18 }
 0x2f0   :  { %4314 = vrcp.f32 %v1810_v58  ;;  %v5530_v54 = vpop.eup %4312  ;;  %v1822_v46 = vand.u32 2147483648, %v1810_v58  ;;  %v1820_v48 = vand.u32 2147483647, %v1810_v58  ;;  %vm1816_vm13 = vweird.f32 %v1810_v58 }
 0x2f1   :  { %v1718_v28 = vmul.f32 %v4309_v44, %v1717_v50  ;;  %v1831_v3 = vmul.f32 %v5530_v54, %v5526_v47  ;;  %v1745_v50 = vand.u32 2147483648, %v5521_v39  ;;  %vm1836_vm4 = vweird.f32 %v5530_v54 }
 0x2f2   :  { %vm1821_vm3 = vcmp.eq.f32.partialorder %v1820_v48, 8.507059e+37  ;;  %vm1837_vm6 = vmor %vm1835_vm5, %vm1836_vm4 }
 0x2f3   :  { %v1719_v8 = vadd.f32 %v4309_v44, %v1718_v28  ;;  %v1708_v28 = vadd.f32 %v5515_v41, %v1695_v2  ;;  %v1832_v34 = vsub.f32 1.0, %v1831_v3  ;;  %v1823_v3 = vor.u32 1.1754944e-38, %v1822_v46 }
 0x2f4   :  { %v1839_v46 = vand.u32 2147483647, %v5526_v47 }
 0x2f5   :  { %v1723_v55 = vsel %vm1722_vm10, %v4309_v44, %v1719_v8  ;;  %v1746_v44 = vor.u32 1.1754944e-38, %v1745_v50 }
 0x2f6   :  { %v4315_v4 = vpop.eup %4314  ;;  %v1728_v45 = vsel %vm1725_vm11, %v1727_v13, %v1723_v55  ;;  %v1801_v63 = vpop.f32.mrf.mxu2  ;;  %v1833_v13 = vmul.f32 %v5530_v54, %v1832_v34  ;;  %v1841_v34 = vand.u32 2147483648, %v5526_v47  ;;  %vm1840_vm7 = vcmp.eq.f32.partialorder %v1839_v46, 8.507059e+37  ;;  %v6594_v46 = vld [vmem:[#allocation83_spill] sm:$0xff] }
 0x2f7   :  { %v1749_v52 = vmul.f32 %v1728_v45, %v1629_v56  ;;  %v1812_v62 = vmul.f32 %v4315_v4, %v1810_v58  ;;  %vm1817_vm1 = vweird.f32 %v4315_v4  ;;  %v1747_v41 = vsel %vm1744_vm12, %v1746_v44, %v1742_v53 }
 0x2f8   :  { %vm1818_vm2 = vmor %vm1816_vm13, %vm1817_vm1  ;;  %v1802_v39 = vadd.f32 %v1801_v63, %v5242_v20  ;;  %v1752_v10 = vsub.f32 1.0, %v1747_v41  ;;  %v1834_v50 = vadd.f32 %v5530_v54, %v1833_v13  ;;  %v1754_v58 = vmul.f32 %v1747_v41, %v5378_v57  ;;  %v6578_v63 = vld [vmem:[#allocation94_spill] sm:$0xff]  ;;  %v6581_v41 = vld [vmem:[#allocation63_spill] sm:$0xff] }
 0x2f9   :  { %v1750_v23 = vadd.f32 %v1749_v52, %v1708_v28  ;;  %v1813_v8 = vsub.f32 1.0, %v1812_v62  ;;  %v1842_v0 = vor.u32 1.1754944e-38, %v1841_v34  ;;  %v6591_v34 = vld [vmem:[#allocation75_spill] sm:$0xff]  ;;  %v6607_v57 = vld [vmem:[#allocation93_spill] sm:$0xff] }
 0x2fa   :  { %v1838_v52 = vsel %vm1837_vm6, %v5530_v54, %v1834_v50  ;;  %v6589_v50 = vld [vmem:[#allocation56_spill] sm:$0xff] }
 0x2fb   :  { %4316 = vtanh.f32 %v1750_v23  ;;  %v1814_v43 = vmul.f32 %v4315_v4, %v1813_v8  ;;  %v1843_v8 = vsel %vm1840_vm7, %v1842_v0, %v1838_v52  ;;  %v6598_v52 = vld [vmem:[#allocation88_spill] sm:$0xff] }
 0x2fc   :  { %v1848_v47 = vsub.f32 1.0, %v1843_v8  ;;  %v1850_v54 = vmul.f32 %v1843_v8, %v5424_v31  ;;  %v6580_v31 = vld [vmem:[#allocation64_spill] sm:$0xff] }
 0x2fd   :  { %v1815_v45 = vadd.f32 %v4315_v4, %v1814_v43  ;;  %v6599_v0 = vld [vmem:[#allocation84_spill] sm:$0xff] }
 0x2fe   :  { %v1803_v2 = vpop.f32.mrf.mxu2  ;;  %v6601_v8 = vld [vmem:[#allocation72_spill] sm:$0xff] }
 0x2ff   :  { %v1819_v56 = vsel %vm1818_vm2, %v4315_v4, %v1815_v45  ;;  %v6582_v45 = vld [vmem:[#allocation46_spill] sm:$0xff]  ;;  %v6584_v2 = vld [vmem:[#allocation71_spill] sm:$0xff] }
 0x300   :  { %v1824_v55 = vsel %vm1821_vm3, %v1823_v3, %v1819_v56  ;;  %v6583_v3 = vld [vmem:[#allocation34_spill] sm:$0xff]  ;;  %v6586_v56 = vld [vmem:[#allocation73_spill] sm:$0xff] }
 0x301   :  { %v4317_v18 = vpop.eup %4316  ;;  %v1845_v28 = vmul.f32 %v1824_v55, %v1802_v39  ;;  %v6585_v39 = vld [vmem:[#allocation51_spill] sm:$0xff]  ;;  %v6588_v55 = vld [vmem:[#allocation49_spill] sm:$0xff] }
 0x302   :  { %v1753_v43 = vmul.f32 %v4317_v18, %v1752_v10  ;;  %v6587_v10 = vld [vmem:[#allocation70_spill] sm:$0xff] }
 0x303   :  { %v1846_v4 = vadd.f32 %v1845_v28, %v6578_v63  ;;  %v6590_v18 = vld [vmem:[#allocation78_spill] sm:$0xff]  ;;  %v6592_v28 = vld [vmem:[#allocation52_spill] sm:$0xff]  ;;  %v6596_v63 = vld [vmem:[#allocation57_spill] sm:$0xff] }
 0x304   :  { %v5551_v62 = vadd.f32 %v1754_v58, %v1753_v43  ;;  %v6593_v43 = vld [vmem:[#allocation61_spill] sm:$0xff]  ;;  %v6595_v58 = vld [vmem:[#allocation80_spill] sm:$0xff] }
 0x305   :  { %4318 = vtanh.f32 %v1846_v4  ;;  %v6597_v4 = vld [vmem:[#allocation67_spill] sm:$0xff] }
 0x306   :  { %6579 = vst [vmem:[#allocation36_spill] sm:$0xff] %v5551_v62  ;;  %v1852_v23 = vpack.c.bf16 %v5551_v62, %v5551_v62 }
 0x308   :  { %1861 = vmatmul.bf16.vlgmr.msrb.gmra.mxu3 %v1852_v23  ;;  %1888 = vmatmul.bf16.vlgmr.msrb.gmra.mxu1 %v1852_v23 }
 0x309   :  { %2013 = vmatpush.bf16.msrb.mxu3 %v6533_v37  ;;  %2087 = vmatpush.bf16.msrb.mxu1 %v5386_v1 }
 0x30b   :  { %v4319_v44 = vpop.eup %4318 }
 0x30c   :  { %v1849_v53 = vmul.f32 %v4319_v44, %v1848_v47  ;;  %v6602_v47 = vld [vmem:[#allocation91_spill] sm:$0xff]  ;;  %v6603_v44 = vld [vmem:[#allocation89_spill] sm:$0xff] }
 0x30d   :  { %2014 = vmatpush.bf16.msrb.mxu3 %v6534_v25  ;;  %2088 = vmatpush.bf16.msrb.mxu1 %v5394_v42 }
 0x30e   :  { %v5560_v48 = vadd.f32 %v1850_v54, %v1849_v53  ;;  %v6604_v53 = vld [vmem:[#allocation90_spill] sm:$0xff]  ;;  %v6605_v54 = vld [vmem:[#allocation69_spill] sm:$0xff] }
 0x310   :  { %v1866_v13 = vpack.c.bf16 %v5560_v48, %v5560_v48 }
 0x311   :  { %2015 = vmatpush.bf16.msrb.mxu3 %v6537_v11  ;;  %2089 = vmatpush.bf16.msrb.mxu1 %v5406_v5 }
 0x312   :  { %1875 = vmatmul.bf16.vlgmr.msrb.gmra.mxu0 %v1866_v13  ;;  %1901 = vmatmul.bf16.vlgmr.msra.gmra.mxu2 %v1866_v13 }
 0x313   :  { %2026 = vmatpush.bf16.msrb.mxu0 %v4846_v36  ;;  %2101 = vmatpush.bf16.msra.mxu2 %v5031_v26 }
 0x315   :  { %2016 = vmatpush.bf16.msrb.mxu3 %v6538_v40  ;;  %2090 = vmatpush.bf16.msrb.mxu1 %v5413_v19 }
 0x317   :  { %2027 = vmatpush.bf16.msrb.mxu0 %v4852_v49  ;;  %2102 = vmatpush.bf16.msra.mxu2 %v5040_v51 }
 0x318   :  { %1914 = vmatmul.bf16.vlgmr.msra.gmra.mxu3 %v1852_v23  ;;  %1940 = vmatmul.bf16.vlgmr.msra.gmra.mxu1 %v1852_v23  ;;  %v6600_v23 = vld [vmem:[#allocation62_spill] sm:$0xff] }
 0x319   :  { %2017 = vmatpush.bf16.msrb.mxu3 %v6539_v33  ;;  %2091 = vmatpush.bf16.msrb.mxu1 %v5421_v60 }
 0x31b   :  { %2028 = vmatpush.bf16.msrb.mxu0 %v4865_v6  ;;  %2103 = vmatpush.bf16.msra.mxu2 %v5046_v29 }
 0x31d   :  { %2018 = vmatpush.bf16.msrb.mxu3 %v6540_v38  ;;  %2092 = vmatpush.bf16.msrb.mxu1 %v5432_v16 }
 0x31f   :  { %2029 = vmatpush.bf16.msrb.mxu0 %v4888_v15  ;;  %2104 = vmatpush.bf16.msra.mxu2 %v5058_v14 }
 0x321   :  { %2019 = vmatpush.bf16.msrb.mxu3 %v6541_v9  ;;  %2093 = vmatpush.bf16.msrb.mxu1 %v5441_v24 }
 0x322   :  { %1927 = vmatmul.bf16.vlgmr.msra.gmra.mxu0 %v1866_v13  ;;  %2008 = vmatmul.bf16.vlgmr.msrb.gmra.mxu2 %v1866_v13 }
 0x323   :  { %2030 = vmatpush.bf16.msrb.mxu0 %v4891_v22  ;;  %2105 = vmatpush.bf16.msra.mxu2 %v5073_v12 }
 0x325   :  { %2020 = vmatpush.bf16.msrb.mxu3 %v6542_v32  ;;  %2094 = vmatpush.bf16.msrb.mxu1 %v5450_v30 }
 0x327   :  { %2031 = vmatpush.bf16.msrb.mxu0 %v4894_v27  ;;  %2106 = vmatpush.bf16.msra.mxu2 %v5087_v7 }
 0x328   :  { %2021 = vmatmul.bf16.vlgmr.msrb.gmra.mxu3 %v1866_v13 }
 0x329   :  { %2114 = vmatpush.bf16.msra.mxu3 %v6543_v21  ;;  %2140 = vmatpush.bf16.msra.mxu1 %v5023_v17 }
 0x32b   :  { %2032 = vmatpush.bf16.msrb.mxu0 %v6490_v59  ;;  %2107 = vmatpush.bf16.msra.mxu2 %v6580_v31  ;;  %v6634_v59 = vld [vmem:[#allocation37_spill] sm:$0xff] }
 0x32d   :  { %2115 = vmatpush.bf16.msra.mxu3 %v6544_v61  ;;  %2141 = vmatpush.bf16.msra.mxu1 %v5033_v35 }
 0x32f   :  { %2033 = vmatpush.bf16.msrb.mxu0 %v6583_v3  ;;  %2108 = vmatpush.bf16.msra.mxu2 %v6584_v2  ;;  %v6631_v3 = vld [vmem:[#allocation79_spill] sm:$0xff] }
 0x331   :  { %2116 = vmatpush.bf16.msra.mxu3 %v6581_v41  ;;  %2142 = vmatpush.bf16.msra.mxu1 %v6582_v45 }
 0x332   :  { %2034 = vmatmul.bf16.vlgmr.msrb.gmra.mxu0 %v1866_v13  ;;  %v6606_v13 = vld [vmem:[#allocation77_spill] sm:$0xff] }
 0x333   :  { %2127 = vmatpush.bf16.msra.mxu0 %v6585_v39  ;;  %2153 = vmatpush.bf16.msrb.mxu2 %v6586_v56 }
 0x335   :  { %2117 = vmatpush.bf16.msra.mxu3 %v6587_v10  ;;  %2143 = vmatpush.bf16.msra.mxu1 %v6588_v55 }
 0x337   :  { %2128 = vmatpush.bf16.msra.mxu0 %v6589_v50  ;;  %2154 = vmatpush.bf16.msrb.mxu2 %v6590_v18  ;;  %v6627_v18 = vld [vmem:[#allocation111_spill] sm:$0xff] }
 0x339   :  { %2118 = vmatpush.bf16.msra.mxu3 %v6591_v34  ;;  %2144 = vmatpush.bf16.msra.mxu1 %v6592_v28 }
 0x33b   :  { %2129 = vmatpush.bf16.msra.mxu0 %v6593_v43  ;;  %2155 = vmatpush.bf16.msrb.mxu2 %v6594_v46  ;;  %v6610_v46 = vld [vmem:[#allocation96_spill] sm:$0xff]  ;;  %v6611_v43 = vld [vmem:[#allocation95_spill] sm:$0xff] }
 0x33d   :  { %2119 = vmatpush.bf16.msra.mxu3 %v6595_v58  ;;  %2145 = vmatpush.bf16.msra.mxu1 %v6596_v63 }
 0x33f   :  { %2130 = vmatpush.bf16.msra.mxu0 %v6597_v4  ;;  %2156 = vmatpush.bf16.msrb.mxu2 %v6598_v52  ;;  %v6608_v4 = vld [vmem:[#allocation92_spill] sm:$0xff]  ;;  %v6609_v52 = vld [vmem:[#allocation82_spill] sm:$0xff] }
 0x341   :  { %2120 = vmatpush.bf16.msra.mxu3 %v6599_v0  ;;  %2146 = vmatpush.bf16.msra.mxu1 %v6600_v23 }
 0x343   :  { %2131 = vmatpush.bf16.msra.mxu0 %v6601_v8  ;;  %2157 = vmatpush.bf16.msrb.mxu2 %v6602_v47  ;;  %v6612_v8 = vld [vmem:[#allocation86_spill] sm:$0xff]  ;;  %v6613_v47 = vld [vmem:[#allocation100_spill] sm:$0xff] }
 0x345   :  { %2121 = vmatpush.bf16.msra.mxu3 %v6603_v44  ;;  %2147 = vmatpush.bf16.msra.mxu1 %v6605_v54  ;;  %v6614_v44 = vld [vmem:[#allocation17_spill] sm:$0xff]  ;;  %v6616_v54 = vld [vmem:[#allocation18_spill] sm:$0xff] }
 0x347   :  { %2132 = vmatpush.bf16.msra.mxu0 %v6606_v13  ;;  %2158 = vmatpush.bf16.msrb.mxu2 %v6607_v57  ;;  %v6617_v13 = vld [vmem:[#allocation101_spill] sm:$0xff]  ;;  %v6618_v57 = vld [vmem:[#allocation20_spill] sm:$0xff] }
 0x349   :  { %2166 = vmatpush.bf16.msrb.mxu3 %v6604_v53  ;;  %v6615_v53 = vld [vmem:[#allocation98_spill] sm:$0xff] }
 0x34b   :  { %2133 = vmatpush.bf16.msra.mxu0 %v6609_v52  ;;  %2159 = vmatpush.bf16.msrb.mxu2 %v6610_v46  ;;  %v6620_v52 = vld [vmem:[#allocation22_spill] sm:$0xff]  ;;  %v6621_v46 = vld [vmem:[#allocation104_spill] sm:$0xff] }
 0x34d   :  { %2167 = vmatpush.bf16.msrb.mxu3 %v6608_v4  ;;  %v6619_v4 = vld [vmem:[#allocation102_spill] sm:$0xff] }
 0x34f   :  { %2134 = vmatpush.bf16.msra.mxu0 %v6612_v8  ;;  %2160 = vmatpush.bf16.msrb.mxu2 %v6613_v47  ;;  %v6623_v8 = vld [vmem:[#allocation105_spill] sm:$0xff]  ;;  %v6624_v47 = vld [vmem:[#allocation26_spill] sm:$0xff] }
 0x351   :  { %2168 = vmatpush.bf16.msrb.mxu3 %v6611_v43  ;;  %v6622_v43 = vld [vmem:[#allocation24_spill] sm:$0xff] }
 0x353   :  { %2234 = vmatpush.bf16.msrb.mxu0 %v6614_v44  ;;  %v6625_v44 = vld [vmem:[#allocation28_spill] sm:$0xff] }
 0x355   :  { %2169 = vmatpush.bf16.msrb.mxu3 %v6615_v53  ;;  %v6626_v53 = vld [vmem:[#allocation30_spill] sm:$0xff] }
 0x357   :  { %2235 = vmatpush.bf16.msrb.mxu0 %v6616_v54 }
 0x359   :  { %2170 = vmatpush.bf16.msrb.mxu3 %v6617_v13 }
 0x35b   :  { %2236 = vmatpush.bf16.msrb.mxu0 %v6618_v57 }
 0x35d   :  { %2171 = vmatpush.bf16.msrb.mxu3 %v6619_v4 }
 0x35f   :  { %2237 = vmatpush.bf16.msrb.mxu0 %v6620_v52 }
 0x361   :  { %2172 = vmatpush.bf16.msrb.mxu3 %v6621_v46 }
 0x363   :  { %2238 = vmatpush.bf16.msrb.mxu0 %v6622_v43 }
 0x365   :  { %2173 = vmatpush.bf16.msrb.mxu3 %v6623_v8  ;;  %v6628_v8 = vld [vmem:[#allocation112_spill] sm:$0xff] }
 0x367   :  { %2239 = vmatpush.bf16.msrb.mxu0 %v6624_v47 }
 0x36b   :  { %2240 = vmatpush.bf16.msrb.mxu0 %v6625_v44 }
 0x36f   :  { %2241 = vmatpush.bf16.msrb.mxu0 %v6626_v53 }
 0x385   :  { %v1889_v54 = vpop.f32.mrf.mxu1 }
 0x38b   :  { %v1862_v13 = vpop.f32.mrf.mxu3 }
 0x38d   :  { %v1891_v23 = vpop.f32.mrf.mxu1 }
 0x38f   :  { %v1876_v57 = vpop.f32.mrf.mxu0 }
 0x390   :  { %v1877_v4 = vadd.f32 %v1876_v57, %v6627_v18  ;;  %v6630_v18 = vld [vmem:[#allocation42_spill] sm:$0xff] }
 0x392   :  { %v1890_v0 = vadd.f32 %v1889_v54, %v1877_v4  ;;  %v6629_v54 = vld [vmem:[#allocation41_spill] sm:$0xff] }
 0x393   :  { %v1864_v52 = vpop.f32.mrf.mxu3 }
 0x394   :  { %v3981_v50 = vmul.f32 -1.442695, %v1890_v0 }
 0x395   :  { %v1902_v46 = vpop.f32.mrf.mxu2  ;;  %v1941_v63 = vpop.f32.mrf.mxu1 }
 0x396   :  { %4320 = vpow2.f32 %v3981_v50  ;;  %v1903_v56 = vadd.f32 %v1902_v46, %v6628_v8  ;;  %v578_v50 = vadd.f32 %v6630_v18, %v6629_v54 }
 0x397   :  { %v1878_v43 = vpop.f32.mrf.mxu0 }
 0x39b   :  { %v1915_v47 = vpop.f32.mrf.mxu3 }
 0x39c   :  { %v4321_v2 = vpop.eup %4320  ;;  %v1916_v44 = vadd.f32 %v1915_v47, %v1903_v56 }
 0x39d   :  { %v1948_v58 = vadd.f32 1.0, %v4321_v2  ;;  %v1904_v53 = vpop.f32.mrf.mxu2  ;;  %v1943_v39 = vpop.f32.mrf.mxu1 }
 0x39e   :  { %v3982_v28 = vmul.f32 -1.442695, %v1916_v44  ;;  %v6632_v53 = vld [vmem:[#allocation43_spill] sm:$0xff] }
 0x39f   :  { %4322 = vrcp.f32 %v1948_v58  ;;  %v1928_v23 = vpop.f32.mrf.mxu0  ;;  %v1960_v39 = vand.u32 2147483648, %v1948_v58  ;;  %v1958_v44 = vand.u32 2147483647, %v1948_v58  ;;  %vm1954_vm9 = vweird.f32 %v1948_v58 }
 0x3a0   :  { %4324 = vpow2.f32 %v3982_v28  ;;  %v1929_v18 = vadd.f32 %v1928_v23, %v6634_v59 }
 0x3a1   :  { %vm1959_vm11 = vcmp.eq.f32.partialorder %v1958_v44, 8.507059e+37 }
 0x3a3   :  { %v1917_v57 = vpop.f32.mrf.mxu3 }
 0x3a4   :  { %v6633_v57 = vld [vmem:[#allocation44_spill] sm:$0xff] }
 0x3a5   :  { %v4323_v4 = vpop.eup %4322  ;;  %v2009_v52 = vpop.f32.mrf.mxu2  ;;  %v636_v34 = vadd.f32 %v6633_v57, %v6632_v53 }
 0x3a6   :  { %v4325_v0 = vpop.eup %4324  ;;  %v1950_v43 = vmul.f32 %v4323_v4, %v1948_v58  ;;  %v2010_v46 = vadd.f32 %v2009_v52, %v6631_v3  ;;  %vm1955_vm8 = vweird.f32 %v4323_v4  ;;  %v6635_v52 = vld [vmem:[#allocation81_spill] sm:$0xff]  ;;  %v1942_v58 = vadd.f32 %v1941_v63, %v1929_v18 }
 0x3a7   :  { %v1967_v8 = vadd.f32 1.0, %v4325_v0  ;;  %v1930_v31 = vpop.f32.mrf.mxu0  ;;  %vm1956_vm10 = vmor %vm1954_vm9, %vm1955_vm8 }
 0x3a8   :  { %v1951_v56 = vsub.f32 1.0, %v1950_v43  ;;  %v2039_v2 = vadd.f32 %v2010_v46, %v578_v50  ;;  %v1961_v31 = vor.u32 1.1754944e-38, %v1960_v39  ;;  %v6636_v43 = vld [vmem:[#allocation38_spill] sm:$0xff] }
 0x3a9   :  { %4326 = vrcp.f32 %v1967_v8  ;;  %v1863_v46 = vadd.f32 %v6636_v43, %v1862_v13  ;;  %v1977_v13 = vand.u32 2147483647, %v1967_v8  ;;  %vm1973_vm15 = vweird.f32 %v1967_v8 }
 0x3aa   :  { %v1952_v47 = vmul.f32 %v4323_v4, %v1951_v56  ;;  %v3983_v28 = vmul.f32 -1.442695, %v2039_v2 }
 0x3ab   :  { %v2022_v55 = vpop.f32.mrf.mxu3  ;;  %vm1978_vm1 = vcmp.eq.f32.partialorder %v1977_v13, 8.507059e+37 }
 0x3ac   :  { %v1953_v54 = vadd.f32 %v4323_v4, %v1952_v47  ;;  %4328 = vpow2.f32 %v3983_v28  ;;  %v2023_v0 = vadd.f32 %v2022_v55, %v6635_v52  ;;  %v1979_v55 = vand.u32 2147483648, %v1967_v8 }
 0x3ad   :  { %v2011_v50 = vpop.f32.mrf.mxu2 }
 0x3ae   :  { %v1957_v56 = vsel %vm1956_vm10, %v4323_v4, %v1953_v54  ;;  %v2040_v3 = vadd.f32 %v2023_v0, %v636_v34  ;;  %v1980_v4 = vor.u32 1.1754944e-38, %v1979_v55 }
 0x3af   :  { %v4327_v2 = vpop.eup %4326  ;;  %v1962_v7 = vsel %vm1959_vm11, %v1961_v31, %v1957_v56  ;;  %v2035_v10 = vpop.f32.mrf.mxu0 }
 0x3b0   :  { %v1969_v53 = vmul.f32 %v4327_v2, %v1967_v8  ;;  %v1983_v57 = vmul.f32 %v1962_v7, %v1863_v46  ;;  %v3984_v45 = vmul.f32 -1.442695, %v2040_v3  ;;  %vm1974_vm14 = vweird.f32 %v4327_v2 }
 0x3b1   :  { %vm1975_vm0 = vmor %vm1973_vm15, %vm1974_vm14 }
 0x3b2   :  { %v4329_v23 = vpop.eup %4328  ;;  %v1970_v47 = vsub.f32 1.0, %v1969_v53  ;;  %v1984_v28 = vadd.f32 %v1983_v57, %v1942_v58  ;;  %4330 = vpow2.f32 %v3984_v45 }
 0x3b3   :  { %v2044_v59 = vadd.f32 1.0, %v4329_v23  ;;  %v2024_v39 = vpop.f32.mrf.mxu3 }
 0x3b4   :  { %v1971_v50 = vmul.f32 %v4327_v2, %v1970_v47  ;;  %4332 = vtanh.f32 %v1984_v28 }
 0x3b5   :  { %4334 = vrcp.f32 %v2044_v59  ;;  %v2056_v8 = vand.u32 2147483648, %v2044_v59  ;;  %v2054_v57 = vand.u32 2147483647, %v2044_v59  ;;  %vm2050_vm13 = vweird.f32 %v2044_v59 }
 0x3b6   :  { %v1972_v34 = vadd.f32 %v4327_v2, %v1971_v50  ;;  %v2036_v50 = vadd.f32 %v2035_v10, %v5242_v20 }
 0x3b7   :  { %v2037_v44 = vpop.f32.mrf.mxu0  ;;  %v2057_v55 = vor.u32 1.1754944e-38, %v2056_v8  ;;  %vm2055_vm3 = vcmp.eq.f32.partialorder %v2054_v57, 8.507059e+37  ;;  %v6646_v8 = vld [vmem:[#allocation64_spill] sm:$0xff] }
 0x3b8   :  { %v4331_v63 = vpop.eup %4330  ;;  %v1976_v7 = vsel %vm1975_vm0, %v4327_v2, %v1972_v34  ;;  %v6638_v34 = vld [vmem:[#allocation97_spill] sm:$0xff]  ;;  %v6648_v57 = vld [vmem:[#allocation52_spill] sm:$0xff] }
 0x3b9   :  { %v1981_v3 = vsel %vm1978_vm1, %v1980_v4, %v1976_v7  ;;  %v2063_v18 = vadd.f32 1.0, %v4331_v63  ;;  %v6639_v4 = vld [vmem:[#allocation99_spill] sm:$0xff] }
 0x3ba   :  { %v4333_v54 = vpop.eup %4332  ;;  %v1986_v45 = vsub.f32 1.0, %v1981_v3  ;;  %v1988_v43 = vmul.f32 %v1981_v3, %v5551_v62  ;;  %v694_v44 = vadd.f32 %v6639_v4, %v6638_v34  ;;  %v6657_v34 = vld [vmem:[#allocation62_spill] sm:$0xff]  ;;  %v6658_v4 = vld [vmem:[#allocation61_spill] sm:$0xff] }
 0x3bb   :  { %v4335_v0 = vpop.eup %4334  ;;  %4336 = vrcp.f32 %v2063_v18  ;;  %vm2069_vm5 = vweird.f32 %v2063_v18  ;;  %v6675_v62 = vld [vmem:[#allocation86_spill] sm:$0xff] }
 0x3bc   :  { %v1987_v31 = vmul.f32 %v4333_v54, %v1986_v45  ;;  %v2046_v46 = vmul.f32 %v4335_v0, %v2044_v59  ;;  %vm2051_vm12 = vweird.f32 %v4335_v0  ;;  %v2075_v59 = vand.u32 2147483648, %v2063_v18 }
 0x3bd   :  { %vm2052_vm2 = vmor %vm2050_vm13, %vm2051_vm12  ;;  %v2073_v54 = vand.u32 2147483647, %v2063_v18 }
 0x3be   :  { %v5651_v56 = vadd.f32 %v1988_v43, %v1987_v31  ;;  %v2047_v53 = vsub.f32 1.0, %v2046_v46  ;;  %v2076_v10 = vor.u32 1.1754944e-38, %v2075_v59  ;;  %v6662_v59 = vld [vmem:[#allocation69_spill] sm:$0xff] }
 0x3bf   :  { %vm2074_vm7 = vcmp.eq.f32.partialorder %v2073_v54, 8.507059e+37  ;;  %v6664_v54 = vld [vmem:[#allocation92_spill] sm:$0xff] }
 0x3c0   :  { %6637 = vst [vmem:[#allocation19_spill] sm:$0xff] %v5651_v56  ;;  %v2048_v58 = vmul.f32 %v4335_v0, %v2047_v53  ;;  %v2086_v2 = vpack.c.bf16 %v5651_v56, %v5651_v56 }
 0x3c1   :  { %v4337_v23 = vpop.eup %4336 }
 0x3c2   :  { %v2065_v47 = vmul.f32 %v4337_v23, %v2063_v18  ;;  %v2049_v28 = vadd.f32 %v4335_v0, %v2048_v58  ;;  %2095 = vmatmul.bf16.vlgmr.msrb.gmra.mxu1 %v2086_v2  ;;  %2122 = vmatmul.bf16.vlgmr.msra.gmra.mxu3 %v2086_v2  ;;  %vm2070_vm4 = vweird.f32 %v4337_v23  ;;  %v6647_v58 = vld [vmem:[#allocation34_spill] sm:$0xff] }
 0x3c3   :  { %2247 = vmatpush.bf16.msrb.mxu1 %v6533_v37  ;;  %2321 = vmatpush.bf16.msra.mxu3 %v5386_v1  ;;  %vm2071_vm6 = vmor %vm2069_vm5, %vm2070_vm4 }
 0x3c4   :  { %v2066_v39 = vsub.f32 1.0, %v2065_v47  ;;  %v2053_v13 = vsel %vm2052_vm2, %v4335_v0, %v2049_v28  ;;  %v6651_v47 = vld [vmem:[#allocation71_spill] sm:$0xff]  ;;  %v6652_v28 = vld [vmem:[#allocation73_spill] sm:$0xff] }
 0x3c5   :  { %v2058_v63 = vsel %vm2055_vm3, %v2057_v55, %v2053_v13  ;;  %v6653_v55 = vld [vmem:[#allocation57_spill] sm:$0xff]  ;;  %v6656_v13 = vld [vmem:[#allocation78_spill] sm:$0xff] }
 0x3c6   :  { %v2067_v7 = vmul.f32 %v4337_v23, %v2066_v39  ;;  %v2079_v3 = vmul.f32 %v2058_v63, %v2036_v50  ;;  %v6654_v39 = vld [vmem:[#allocation56_spill] sm:$0xff]  ;;  %v6660_v63 = vld [vmem:[#allocation90_spill] sm:$0xff] }
 0x3c7   :  { %2248 = vmatpush.bf16.msrb.mxu1 %v6534_v25  ;;  %2322 = vmatpush.bf16.msra.mxu3 %v5394_v42  ;;  %v6655_v50 = vld [vmem:[#allocation84_spill] sm:$0xff] }
 0x3c8   :  { %v2068_v1 = vadd.f32 %v4337_v23, %v2067_v7  ;;  %v2080_v45 = vadd.f32 %v2079_v3, %v694_v44  ;;  %v6659_v44 = vld [vmem:[#allocation89_spill] sm:$0xff]  ;;  %v6661_v7 = vld [vmem:[#allocation83_spill] sm:$0xff] }
 0x3c9   :  { %v6663_v3 = vld [vmem:[#allocation67_spill] sm:$0xff] }
 0x3ca   :  { %v2072_v0 = vsel %vm2071_vm6, %v4337_v23, %v2068_v1  ;;  %4338 = vtanh.f32 %v2080_v45  ;;  %v6650_v23 = vld [vmem:[#allocation80_spill] sm:$0xff] }
 0x3cb   :  { %2249 = vmatpush.bf16.msrb.mxu1 %v6537_v11  ;;  %2323 = vmatpush.bf16.msra.mxu3 %v5406_v5  ;;  %v2077_v31 = vsel %vm2074_vm7, %v2076_v10, %v2072_v0  ;;  %v6665_v1 = vld [vmem:[#allocation88_spill] sm:$0xff]  ;;  %v6667_v10 = vld [vmem:[#allocation95_spill] sm:$0xff] }
 0x3cc   :  { %v2082_v43 = vsub.f32 1.0, %v2077_v31  ;;  %v2084_v18 = vmul.f32 %v2077_v31, %v5560_v48  ;;  %v6645_v48 = vld [vmem:[#allocation75_spill] sm:$0xff]  ;;  %v6666_v45 = vld [vmem:[#allocation72_spill] sm:$0xff]  ;;  %v6669_v31 = vld [vmem:[#allocation77_spill] sm:$0xff] }
 0x3cd   :  { %v6668_v0 = vld [vmem:[#allocation91_spill] sm:$0xff] }
 0x3cf   :  { %2250 = vmatpush.bf16.msrb.mxu1 %v6538_v40  ;;  %2324 = vmatpush.bf16.msra.mxu3 %v5413_v19  ;;  %v6640_v19 = vld [vmem:[#allocation46_spill] sm:$0xff] }
 0x3d0   :  { %v4339_v46 = vpop.eup %4338 }
 0x3d1   :  { %v2083_v42 = vmul.f32 %v4339_v46, %v2082_v43  ;;  %v6670_v43 = vld [vmem:[#allocation98_spill] sm:$0xff]  ;;  %v6671_v46 = vld [vmem:[#allocation93_spill] sm:$0xff] }
 0x3d2   :  { %2148 = vmatmul.bf16.vlgmr.msra.gmra.mxu1 %v2086_v2  ;;  %2174 = vmatmul.bf16.vlgmr.msrb.gmra.mxu3 %v2086_v2  ;;  %v6649_v2 = vld [vmem:[#allocation51_spill] sm:$0xff] }
 0x3d3   :  { %v5667_v53 = vadd.f32 %v2084_v18, %v2083_v42  ;;  %2251 = vmatpush.bf16.msrb.mxu1 %v6539_v33  ;;  %2325 = vmatpush.bf16.msra.mxu3 %v5421_v60  ;;  %v6641_v60 = vld [vmem:[#allocation70_spill] sm:$0xff]  ;;  %v6673_v18 = vld [vmem:[#allocation101_spill] sm:$0xff] }
 0x3d4   :  { %v6672_v42 = vld [vmem:[#allocation82_spill] sm:$0xff] }
 0x3d5   :  { %v2100_v5 = vpack.c.bf16 %v5667_v53, %v5667_v53 }
 0x3d7   :  { %2109 = vmatmul.bf16.vlgmr.msra.gmra.mxu2 %v2100_v5  ;;  %2135 = vmatmul.bf16.vlgmr.msra.gmra.mxu0 %v2100_v5 }
 0x3d8   :  { %2252 = vmatpush.bf16.msrb.mxu1 %v6540_v38  ;;  %2260 = vmatpush.bf16.msra.mxu2 %v4846_v36 }
 0x3d9   :  { %2335 = vmatpush.bf16.msra.mxu0 %v5031_v26  ;;  %2326 = vmatpush.bf16.msra.mxu3 %v5432_v16  ;;  %v6642_v16 = vld [vmem:[#allocation60_spill] sm:$0xff] }
 0x3dc   :  { %2253 = vmatpush.bf16.msrb.mxu1 %v6541_v9  ;;  %2261 = vmatpush.bf16.msra.mxu2 %v4852_v49 }
 0x3dd   :  { %2336 = vmatpush.bf16.msra.mxu0 %v5040_v51  ;;  %2327 = vmatpush.bf16.msra.mxu3 %v5441_v24  ;;  %v6643_v24 = vld [vmem:[#allocation33_spill] sm:$0xff] }
 0x3e0   :  { %2254 = vmatpush.bf16.msrb.mxu1 %v6542_v32  ;;  %2262 = vmatpush.bf16.msra.mxu2 %v4865_v6 }
 0x3e1   :  { %2337 = vmatpush.bf16.msra.mxu0 %v5046_v29  ;;  %2328 = vmatpush.bf16.msra.mxu3 %v5450_v30  ;;  %v6644_v30 = vld [vmem:[#allocation49_spill] sm:$0xff] }
 0x3e3   :  { %2255 = vmatmul.bf16.vlgmr.msrb.gmra.mxu1 %v2100_v5 }
 0x3e4   :  { %2348 = vmatpush.bf16.msra.mxu1 %v6543_v21  ;;  %2263 = vmatpush.bf16.msra.mxu2 %v4888_v15 }
 0x3e5   :  { %2374 = vmatpush.bf16.msrb.mxu3 %v5023_v17  ;;  %2338 = vmatpush.bf16.msra.mxu0 %v5058_v14 }
 0x3e7   :  { %2161 = vmatmul.bf16.vlgmr.msrb.gmra.mxu2 %v2100_v5  ;;  %2242 = vmatmul.bf16.vlgmr.msrb.gmra.mxu0 %v2100_v5 }
 0x3e8   :  { %2349 = vmatpush.bf16.msra.mxu1 %v6544_v61  ;;  %2264 = vmatpush.bf16.msra.mxu2 %v4891_v22 }
 0x3e9   :  { %2375 = vmatpush.bf16.msrb.mxu3 %v5033_v35  ;;  %2339 = vmatpush.bf16.msra.mxu0 %v5073_v12 }
 0x3ec   :  { %2350 = vmatpush.bf16.msra.mxu1 %v6581_v41  ;;  %2265 = vmatpush.bf16.msra.mxu2 %v4894_v27 }
 0x3ed   :  { %2376 = vmatpush.bf16.msrb.mxu3 %v6640_v19  ;;  %2340 = vmatpush.bf16.msra.mxu0 %v6642_v16 }
 0x3f0   :  { %2351 = vmatpush.bf16.msra.mxu1 %v6641_v60  ;;  %2266 = vmatpush.bf16.msra.mxu2 %v6643_v24 }
 0x3f1   :  { %2377 = vmatpush.bf16.msrb.mxu3 %v6644_v30  ;;  %2341 = vmatpush.bf16.msra.mxu0 %v6646_v8 }
 0x3f4   :  { %2352 = vmatpush.bf16.msra.mxu1 %v6645_v48  ;;  %2267 = vmatpush.bf16.msra.mxu2 %v6647_v58 }
 0x3f5   :  { %2378 = vmatpush.bf16.msrb.mxu3 %v6648_v57  ;;  %2342 = vmatpush.bf16.msra.mxu0 %v6651_v47 }
 0x3f7   :  { %2268 = vmatmul.bf16.vlgmr.msra.gmra.mxu2 %v2100_v5  ;;  %v6674_v5 = vld [vmem:[#allocation96_spill] sm:$0xff] }
 0x3f8   :  { %2361 = vmatpush.bf16.msrb.mxu2 %v6649_v2  ;;  %2353 = vmatpush.bf16.msra.mxu1 %v6650_v23 }
 0x3f9   :  { %2387 = vmatpush.bf16.msrb.mxu0 %v6652_v28  ;;  %2379 = vmatpush.bf16.msrb.mxu3 %v6653_v55 }
 0x3fc   :  { %2362 = vmatpush.bf16.msrb.mxu2 %v6654_v39  ;;  %2354 = vmatpush.bf16.msra.mxu1 %v6655_v50 }
 0x3fd   :  { %2388 = vmatpush.bf16.msrb.mxu0 %v6656_v13  ;;  %2380 = vmatpush.bf16.msrb.mxu3 %v6657_v34 }
 0x400   :  { %2363 = vmatpush.bf16.msrb.mxu2 %v6658_v4  ;;  %2355 = vmatpush.bf16.msra.mxu1 %v6659_v44 }
 0x401   :  { %2389 = vmatpush.bf16.msrb.mxu0 %v6661_v7  ;;  %2381 = vmatpush.bf16.msrb.mxu3 %v6662_v59  ;;  %v6677_v59 = vld [vmem:[#allocation102_spill] sm:$0xff] }
 0x404   :  { %2400 = vmatpush.bf16.msrb.mxu1 %v6660_v63  ;;  %2364 = vmatpush.bf16.msrb.mxu2 %v6663_v3  ;;  %v6679_v63 = vld [vmem:[#allocation18_spill] sm:$0xff] }
 0x405   :  { %2390 = vmatpush.bf16.msrb.mxu0 %v6665_v1 }
 0x408   :  { %2401 = vmatpush.bf16.msrb.mxu1 %v6664_v54  ;;  %2365 = vmatpush.bf16.msrb.mxu2 %v6666_v45  ;;  %v6676_v54 = vld [vmem:[#allocation17_spill] sm:$0xff] }
 0x409   :  { %2391 = vmatpush.bf16.msrb.mxu0 %v6668_v0 }
 0x40c   :  { %2402 = vmatpush.bf16.msrb.mxu1 %v6667_v10  ;;  %2366 = vmatpush.bf16.msrb.mxu2 %v6669_v31  ;;  %v6678_v10 = vld [vmem:[#allocation100_spill] sm:$0xff] }
 0x40d   :  { %2392 = vmatpush.bf16.msrb.mxu0 %v6671_v46  ;;  %v6680_v31 = vld [vmem:[#allocation104_spill] sm:$0xff]  ;;  %v6682_v46 = vld [vmem:[#allocation105_spill] sm:$0xff] }
 0x410   :  { %2403 = vmatpush.bf16.msrb.mxu1 %v6670_v43  ;;  %2367 = vmatpush.bf16.msrb.mxu2 %v6672_v42  ;;  %v6681_v43 = vld [vmem:[#allocation20_spill] sm:$0xff]  ;;  %v6683_v42 = vld [vmem:[#allocation22_spill] sm:$0xff] }
 0x411   :  { %2393 = vmatpush.bf16.msrb.mxu0 %v6674_v5  ;;  %v6685_v5 = vld [vmem:[#allocation26_spill] sm:$0xff] }
 0x414   :  { %2404 = vmatpush.bf16.msrb.mxu1 %v6673_v18  ;;  %2368 = vmatpush.bf16.msrb.mxu2 %v6675_v62  ;;  %v6684_v18 = vld [vmem:[#allocation24_spill] sm:$0xff] }
 0x415   :  { %2394 = vmatpush.bf16.msrb.mxu0 %v6678_v10  ;;  %v6686_v62 = vld [vmem:[#allocation28_spill] sm:$0xff] }
 0x418   :  { %2468 = vmatpush.bf16.msra.mxu2 %v6676_v54  ;;  %2405 = vmatpush.bf16.msrb.mxu1 %v6677_v59  ;;  %v6687_v54 = vld [vmem:[#allocation30_spill] sm:$0xff] }
 0x41c   :  { %2469 = vmatpush.bf16.msra.mxu2 %v6679_v63  ;;  %2406 = vmatpush.bf16.msrb.mxu1 %v6680_v31 }
 0x420   :  { %2470 = vmatpush.bf16.msra.mxu2 %v6681_v43  ;;  %2407 = vmatpush.bf16.msrb.mxu1 %v6682_v46  ;;  %v6688_v43 = vld [vmem:[#allocation112_spill] sm:$0xff] }
 0x424   :  { %2471 = vmatpush.bf16.msra.mxu2 %v6683_v42 }
 0x428   :  { %2472 = vmatpush.bf16.msra.mxu2 %v6684_v18 }
 0x42c   :  { %2473 = vmatpush.bf16.msra.mxu2 %v6685_v5  ;;  %v6689_v5 = vld [vmem:[#allocation111_spill] sm:$0xff] }
 0x430   :  { %2474 = vmatpush.bf16.msra.mxu2 %v6686_v62 }
 0x434   :  { %2475 = vmatpush.bf16.msra.mxu2 %v6687_v54 }
 0x43f   :  { %v5743_v59 = vpop.f32.mrf.mxu1 }
 0x445   :  { %v2123_v10 = vpop.f32.mrf.mxu3 }
 0x447   :  { %v2098_v63 = vpop.f32.mrf.mxu1 }
 0x44d   :  { %v2125_v44 = vpop.f32.mrf.mxu3 }
 0x44f   :  { %v2149_v31 = vpop.f32.mrf.mxu1 }
 0x454   :  { %v2136_v0 = vpop.f32.mrf.mxu0 }
 0x455   :  { %v2137_v45 = vadd.f32 %v2136_v0, %v6688_v43  ;;  %v5746_v46 = vpop.f32.mrf.mxu3  ;;  %v6690_v43 = vld [vmem:[#allocation47_spill] sm:$0xff] }
 0x457   :  { %v2150_v42 = vadd.f32 %v2149_v31, %v2137_v45  ;;  %v2151_v34 = vpop.f32.mrf.mxu1 }
 0x459   :  { %v3986_v18 = vmul.f32 -1.442695, %v2150_v42  ;;  %v6691_v42 = vld [vmem:[#allocation79_spill] sm:$0xff] }
 0x45a   :  { %v2110_v50 = vpop.f32.mrf.mxu2 }
 0x45b   :  { %4340 = vpow2.f32 %v3986_v18  ;;  %v2111_v62 = vadd.f32 %v2110_v50, %v6689_v5  ;;  %v6693_v5 = vld [vmem:[#allocation37_spill] sm:$0xff] }
 0x45c   :  { %v2138_v1 = vpop.f32.mrf.mxu0 }
 0x45d   :  { %v2124_v54 = vadd.f32 %v2123_v10, %v2111_v62  ;;  %v2177_v3 = vpop.f32.mrf.mxu3  ;;  %v6692_v62 = vld [vmem:[#allocation45_spill] sm:$0xff] }
 0x45f   :  { %v3985_v55 = vmul.f32 -1.442695, %v2124_v54 }
 0x460   :  { %v2256_v23 = vpop.f32.mrf.mxu1 }
 0x461   :  { %v4341_v63 = vpop.eup %4340  ;;  %4342 = vpow2.f32 %v3985_v55  ;;  %v2257_v44 = vadd.f32 %v2256_v23, %v6635_v52 }
 0x462   :  { %v5750_v7 = vadd.f32 1.0, %v4341_v63  ;;  %v2112_v0 = vpop.f32.mrf.mxu2 }
 0x463   :  { %v2274_v45 = vadd.f32 %v2257_v44, %v6690_v43 }
 0x464   :  { %v2243_v34 = vpop.f32.mrf.mxu0  ;;  %4344 = vrcp.f32 %v5750_v7  ;;  %vm2207_vm15 = vweird.f32 %v5750_v7  ;;  %v2211_v39 = vand.u32 2147483647, %v5750_v7 }
 0x465   :  { %v3988_v31 = vmul.f32 -1.442695, %v2274_v45  ;;  %v2244_v50 = vadd.f32 %v2243_v34, %v6691_v42 }
 0x466   :  { %vm2212_vm12 = vcmp.eq.f32.partialorder %v2211_v39, 8.507059e+37 }
 0x467   :  { %v4343_v1 = vpop.eup %4342  ;;  %4346 = vpow2.f32 %v3988_v31  ;;  %v2273_v3 = vadd.f32 %v2244_v50, %v6692_v62 }
 0x468   :  { %v2182_v54 = vadd.f32 1.0, %v4343_v1  ;;  %v2258_v10 = vpop.f32.mrf.mxu1 }
 0x469   :  { %v3987_v55 = vmul.f32 -1.442695, %v2273_v3 }
 0x46a   :  { %4348 = vrcp.f32 %v2182_v54  ;;  %v2162_v23 = vpop.f32.mrf.mxu2  ;;  %v4345_v18 = vpop.eup %4344  ;;  %v2194_v3 = vand.u32 2147483648, %v2182_v54  ;;  %vm2188_vm9 = vweird.f32 %v2182_v54 }
 0x46b   :  { %4350 = vpow2.f32 %v3987_v55  ;;  %v2203_v43 = vmul.f32 %v4345_v18, %v5750_v7  ;;  %v2192_v55 = vand.u32 2147483647, %v2182_v54  ;;  %vm2208_vm14 = vweird.f32 %v4345_v18 }
 0x46c   :  { %v2245_v63 = vpop.f32.mrf.mxu0  ;;  %vm2209_vm0 = vmor %vm2207_vm15, %vm2208_vm14 }
 0x46d   :  { %v4347_v0 = vpop.eup %4346  ;;  %v2204_v52 = vsub.f32 1.0, %v2203_v43  ;;  %v2195_v43 = vor.u32 1.1754944e-38, %v2194_v3  ;;  %vm2193_vm11 = vcmp.eq.f32.partialorder %v2192_v55, 8.507059e+37 }
 0x46e   :  { %v5757_v44 = vadd.f32 1.0, %v4347_v0  ;;  %v2163_v0 = vadd.f32 %v2162_v23, %v6693_v5  ;;  %v2213_v23 = vand.u32 2147483648, %v5750_v7 }
 0x46f   :  { %v2205_v42 = vmul.f32 %v4345_v18, %v2204_v52 }
 0x470   :  { %v4349_v45 = vpop.eup %4348  ;;  %4352 = vrcp.f32 %v5757_v44  ;;  %v2176_v5 = vadd.f32 %v5746_v46, %v2163_v0  ;;  %vm2303_vm5 = vweird.f32 %v5757_v44 }
 0x471   :  { %v4351_v34 = vpop.eup %4350  ;;  %v2184_v31 = vmul.f32 %v4349_v45, %v2182_v54  ;;  %vm2189_vm8 = vweird.f32 %v4349_v45 }
 0x472   :  { %v2278_v50 = vadd.f32 1.0, %v4351_v34  ;;  %v2164_v1 = vpop.f32.mrf.mxu2  ;;  %vm2190_vm10 = vmor %vm2188_vm9, %vm2189_vm8  ;;  %v5768_v34 = vld [vmem:[%s6213_s8] ss:$0 sm:$0xff] }
 0x473   :  { %v2185_v62 = vsub.f32 1.0, %v2184_v31  ;;  %6694 = vst [vmem:[#allocation21_spill] sm:$0xff] %v5768_v34  ;;  %v2097_v31 = vadd.f32 %v5768_v34, %v5743_v59 }
 0x474   :  { %4354 = vrcp.f32 %v2278_v50  ;;  %v2290_v34 = vand.u32 2147483648, %v2278_v50  ;;  %vm2284_vm13 = vweird.f32 %v2278_v50 }
 0x475   :  { %v2186_v10 = vmul.f32 %v4349_v45, %v2185_v62  ;;  %v2206_v62 = vadd.f32 %v4345_v18, %v2205_v42  ;;  %v2288_v42 = vand.u32 2147483647, %v2278_v50 }
 0x476   :  { %v5760_v63 = vpop.eup %4352 }
 0x477   :  { %v2187_v4 = vadd.f32 %v4349_v45, %v2186_v10  ;;  %v2299_v57 = vmul.f32 %v5760_v63, %v5757_v44  ;;  %v2210_v55 = vsel %vm2209_vm0, %v4345_v18, %v2206_v62  ;;  %vm2289_vm3 = vcmp.eq.f32.partialorder %v2288_v42, 8.507059e+37 }
 0x478   :  { %vm2304_vm4 = vweird.f32 %v5760_v63 }
 0x479   :  { %v2191_v1 = vsel %vm2190_vm10, %v4349_v45, %v2187_v4  ;;  %v2300_v13 = vsub.f32 1.0, %v2299_v57  ;;  %v2214_v45 = vor.u32 1.1754944e-38, %v2213_v23  ;;  %v2291_v57 = vor.u32 1.1754944e-38, %v2290_v34  ;;  %vm2305_vm6 = vmor %vm2303_vm5, %vm2304_vm4 }
 0x47a   :  { %v4355_v52 = vpop.eup %4354  ;;  %v2196_v54 = vsel %vm2193_vm11, %v2195_v43, %v2191_v1  ;;  %v2269_v10 = vpop.f32.mrf.mxu2  ;;  %v2307_v34 = vand.u32 2147483647, %v5757_v44 }
 0x47b   :  { %v2217_v3 = vmul.f32 %v2196_v54, %v2097_v31  ;;  %v2280_v48 = vmul.f32 %v4355_v52, %v2278_v50  ;;  %vm2285_vm1 = vweird.f32 %v4355_v52  ;;  %v2301_v43 = vmul.f32 %v5760_v63, %v2300_v13 }
 0x47c   :  { %v2215_v46 = vsel %vm2212_vm12, %v2214_v45, %v2210_v55  ;;  %vm2286_vm2 = vmor %vm2284_vm13, %vm2285_vm1  ;;  %v2270_v7 = vadd.f32 %v2269_v10, %v5242_v20  ;;  %v2309_v13 = vand.u32 2147483648, %v5757_v44  ;;  %vm2308_vm7 = vcmp.eq.f32.partialorder %v2307_v34, 8.507059e+37  ;;  %v5794_v44 = vld [vmem:[%s6212_s7 + $0x38] sm:$0xff]  ;;  %v6704_v34 = vld [vmem:[#allocation80_spill] sm:$0xff] }
 0x47d   :  { %v2218_v59 = vadd.f32 %v2217_v3, %v2176_v5  ;;  %v2281_v4 = vsub.f32 1.0, %v2280_v48  ;;  %v2220_v48 = vsub.f32 1.0, %v2215_v46  ;;  %v2302_v1 = vadd.f32 %v5760_v63, %v2301_v43  ;;  %v5802_v43 = vld [vmem:[%s6212_s7 + $0x30] sm:$0xff] }
 0x47e   :  { %v2222_v50 = vmul.f32 %v2215_v46, %v5651_v56  ;;  %v2310_v3 = vor.u32 1.1754944e-38, %v2309_v13  ;;  %v6700_v13 = vld [vmem:[#allocation75_spill] sm:$0xff]  ;;  %v6716_v56 = vld [vmem:[#allocation93_spill] sm:$0xff] }
 0x47f   :  { %4356 = vtanh.f32 %v2218_v59  ;;  %v2282_v30 = vmul.f32 %v4355_v52, %v2281_v4  ;;  %v2306_v10 = vsel %vm2305_vm6, %v5760_v63, %v2302_v1  ;;  %v6698_v1 = vld [vmem:[#allocation56_spill] sm:$0xff] }
 0x480   :  { %v2311_v4 = vsel %vm2308_vm7, %v2310_v3, %v2306_v10  ;;  %v6707_v10 = vld [vmem:[#allocation88_spill] sm:$0xff] }
 0x481   :  { %v2283_v0 = vadd.f32 %v4355_v52, %v2282_v30  ;;  %v2316_v45 = vsub.f32 1.0, %v2311_v4  ;;  %v2318_v42 = vmul.f32 %v2311_v4, %v5667_v53  ;;  %v5813_v53 = vld [vmem:[%s6212_s7 + $0x28] sm:$0xff] }
 0x482   :  { %v2271_v31 = vpop.f32.mrf.mxu2  ;;  %v6708_v3 = vld [vmem:[#allocation84_spill] sm:$0xff] }
 0x483   :  { %v2287_v5 = vsel %vm2286_vm2, %v4355_v52, %v2283_v0  ;;  %v6695_v52 = vld [vmem:[#allocation103_spill] sm:$0xff]  ;;  %v5831_v31 = vld [vmem:[%s6212_s7 + $0x18] sm:$0xff]  ;;  %v6710_v4 = vld [vmem:[#allocation72_spill] sm:$0xff] }
 0x484   :  { %v2292_v18 = vsel %vm2289_vm3, %v2291_v57, %v2287_v5  ;;  %v5822_v57 = vld [vmem:[%s6212_s7 + $0x20] sm:$0xff]  ;;  %v5849_v5 = vld [vmem:[%s6212_s7 + $0x8] sm:$0xff] }
 0x485   :  { %v4357_v23 = vpop.eup %4356  ;;  %v2313_v39 = vmul.f32 %v2292_v18, %v2270_v7  ;;  %v5840_v7 = vld [vmem:[%s6212_s7 + $0x10] sm:$0xff] }
 0x486   :  { %v2221_v30 = vmul.f32 %v4357_v23, %v2220_v48  ;;  %v5858_v48 = vld [vmem:[%s6212_s7] sm:$0xff]  ;;  %v6697_v18 = vld [vmem:[#allocation49_spill] sm:$0xff]  ;;  %v6699_v23 = vld [vmem:[#allocation78_spill] sm:$0xff] }
 0x487   :  { %v2314_v54 = vadd.f32 %v2313_v39, %v6695_v52  ;;  %v6701_v39 = vld [vmem:[#allocation52_spill] sm:$0xff]  ;;  %v6705_v52 = vld [vmem:[#allocation57_spill] sm:$0xff] }
 0x488   :  { %v5785_v62 = vadd.f32 %v2222_v50, %v2221_v30  ;;  %v6702_v30 = vld [vmem:[#allocation61_spill] sm:$0xff]  ;;  %v6703_v50 = vld [vmem:[#allocation83_spill] sm:$0xff] }
 0x489   :  { %4358 = vtanh.f32 %v2314_v54  ;;  %v6706_v54 = vld [vmem:[#allocation67_spill] sm:$0xff] }
 0x48a   :  { %6696 = vst [vmem:[#allocation85_spill] sm:$0xff] %v5785_v62  ;;  %v2320_v59 = vpack.c.bf16 %v5785_v62, %v5785_v62 }
 0x48c   :  { %2329 = vmatmul.bf16.vlgmr.msra.gmra.mxu3 %v2320_v59  ;;  %2356 = vmatmul.bf16.vlgmr.msra.gmra.mxu1 %v2320_v59 }
 0x48d   :  { %2481 = vmatpush.bf16.msra.mxu3 %v6533_v37  ;;  %2555 = vmatpush.bf16.msra.mxu1 %v5794_v44 }
 0x48f   :  { %v4359_v63 = vpop.eup %4358 }
 0x490   :  { %v2317_v55 = vmul.f32 %v4359_v63, %v2316_v45  ;;  %v6711_v45 = vld [vmem:[#allocation91_spill] sm:$0xff]  ;;  %v6712_v63 = vld [vmem:[#allocation89_spill] sm:$0xff] }
 0x491   :  { %2482 = vmatpush.bf16.msra.mxu3 %v6534_v25  ;;  %2556 = vmatpush.bf16.msra.mxu1 %v5802_v43 }
 0x492   :  { %v5805_v46 = vadd.f32 %v2318_v42, %v2317_v55  ;;  %v6713_v55 = vld [vmem:[#allocation90_spill] sm:$0xff]  ;;  %v6714_v42 = vld [vmem:[#allocation69_spill] sm:$0xff] }
 0x494   :  { %v2334_v0 = vpack.c.bf16 %v5805_v46, %v5805_v46 }
 0x495   :  { %2483 = vmatpush.bf16.msra.mxu3 %v6537_v11  ;;  %2557 = vmatpush.bf16.msra.mxu1 %v5813_v53 }
 0x496   :  { %2343 = vmatmul.bf16.vlgmr.msra.gmra.mxu0 %v2334_v0  ;;  %2369 = vmatmul.bf16.vlgmr.msrb.gmra.mxu2 %v2334_v0 }
 0x497   :  { %2494 = vmatpush.bf16.msra.mxu0 %v4846_v36  ;;  %2569 = vmatpush.bf16.msrb.mxu2 %v5031_v26 }
 0x499   :  { %2484 = vmatpush.bf16.msra.mxu3 %v6538_v40  ;;  %2558 = vmatpush.bf16.msra.mxu1 %v5822_v57 }
 0x49b   :  { %2495 = vmatpush.bf16.msra.mxu0 %v4852_v49  ;;  %2570 = vmatpush.bf16.msrb.mxu2 %v5040_v51 }
 0x49c   :  { %2382 = vmatmul.bf16.vlgmr.msrb.gmra.mxu3 %v2320_v59  ;;  %2408 = vmatmul.bf16.vlgmr.msrb.gmra.mxu1 %v2320_v59  ;;  %v6709_v59 = vld [vmem:[#allocation62_spill] sm:$0xff] }
 0x49d   :  { %2485 = vmatpush.bf16.msra.mxu3 %v6539_v33  ;;  %2559 = vmatpush.bf16.msra.mxu1 %v5831_v31 }
 0x49f   :  { %2496 = vmatpush.bf16.msra.mxu0 %v4865_v6  ;;  %2571 = vmatpush.bf16.msrb.mxu2 %v5046_v29 }
 0x4a1   :  { %2486 = vmatpush.bf16.msra.mxu3 %v6540_v38  ;;  %2560 = vmatpush.bf16.msra.mxu1 %v5840_v7 }
 0x4a3   :  { %2497 = vmatpush.bf16.msra.mxu0 %v4888_v15  ;;  %2572 = vmatpush.bf16.msrb.mxu2 %v5058_v14 }
 0x4a5   :  { %2487 = vmatpush.bf16.msra.mxu3 %v6541_v9  ;;  %2561 = vmatpush.bf16.msra.mxu1 %v5849_v5 }
 0x4a6   :  { %2395 = vmatmul.bf16.vlgmr.msrb.gmra.mxu0 %v2334_v0  ;;  %2476 = vmatmul.bf16.vlgmr.msra.gmra.mxu2 %v2334_v0 }
 0x4a7   :  { %2498 = vmatpush.bf16.msra.mxu0 %v4891_v22  ;;  %2573 = vmatpush.bf16.msrb.mxu2 %v5073_v12 }
 0x4a9   :  { %2488 = vmatpush.bf16.msra.mxu3 %v6542_v32  ;;  %2562 = vmatpush.bf16.msra.mxu1 %v5858_v48 }
 0x4ab   :  { %2499 = vmatpush.bf16.msra.mxu0 %v4894_v27  ;;  %2574 = vmatpush.bf16.msrb.mxu2 %v6642_v16 }
 0x4ac   :  { %2489 = vmatmul.bf16.vlgmr.msra.gmra.mxu3 %v2334_v0 }
 0x4ad   :  { %2582 = vmatpush.bf16.msrb.mxu3 %v6543_v21  ;;  %2608 = vmatpush.bf16.msrb.mxu1 %v5023_v17 }
 0x4af   :  { %2500 = vmatpush.bf16.msra.mxu0 %v6643_v24  ;;  %2575 = vmatpush.bf16.msrb.mxu2 %v6646_v8  ;;  %v6743_v24 = vld [vmem:[#allocation37_spill] sm:$0xff] }
 0x4b1   :  { %2583 = vmatpush.bf16.msrb.mxu3 %v6544_v61  ;;  %2609 = vmatpush.bf16.msrb.mxu1 %v5033_v35 }
 0x4b3   :  { %2501 = vmatpush.bf16.msra.mxu0 %v6647_v58  ;;  %2576 = vmatpush.bf16.msrb.mxu2 %v6651_v47  ;;  %v6740_v58 = vld [vmem:[#allocation79_spill] sm:$0xff] }
 0x4b5   :  { %2584 = vmatpush.bf16.msrb.mxu3 %v6581_v41  ;;  %2610 = vmatpush.bf16.msrb.mxu1 %v6640_v19 }
 0x4b6   :  { %2502 = vmatmul.bf16.vlgmr.msra.gmra.mxu0 %v2334_v0  ;;  %v6715_v0 = vld [vmem:[#allocation77_spill] sm:$0xff] }
 0x4b7   :  { %2595 = vmatpush.bf16.msrb.mxu0 %v6649_v2  ;;  %2621 = vmatpush.bf16.msra.mxu2 %v6652_v28 }
 0x4b9   :  { %2585 = vmatpush.bf16.msrb.mxu3 %v6641_v60  ;;  %2611 = vmatpush.bf16.msrb.mxu1 %v6697_v18 }
 0x4bb   :  { %2596 = vmatpush.bf16.msrb.mxu0 %v6698_v1  ;;  %2622 = vmatpush.bf16.msra.mxu2 %v6699_v23  ;;  %v6736_v23 = vld [vmem:[#allocation111_spill] sm:$0xff] }
 0x4bd   :  { %2586 = vmatpush.bf16.msrb.mxu3 %v6700_v13  ;;  %2612 = vmatpush.bf16.msrb.mxu1 %v6701_v39 }
 0x4bf   :  { %2597 = vmatpush.bf16.msrb.mxu0 %v6702_v30  ;;  %2623 = vmatpush.bf16.msra.mxu2 %v6703_v50  ;;  %v6719_v50 = vld [vmem:[#allocation96_spill] sm:$0xff]  ;;  %v6720_v30 = vld [vmem:[#allocation95_spill] sm:$0xff] }
 0x4c1   :  { %2587 = vmatpush.bf16.msrb.mxu3 %v6704_v34  ;;  %2613 = vmatpush.bf16.msrb.mxu1 %v6705_v52 }
 0x4c3   :  { %2598 = vmatpush.bf16.msrb.mxu0 %v6706_v54  ;;  %2624 = vmatpush.bf16.msra.mxu2 %v6707_v10  ;;  %v6717_v54 = vld [vmem:[#allocation92_spill] sm:$0xff]  ;;  %v6718_v10 = vld [vmem:[#allocation82_spill] sm:$0xff] }
 0x4c5   :  { %2588 = vmatpush.bf16.msrb.mxu3 %v6708_v3  ;;  %2614 = vmatpush.bf16.msrb.mxu1 %v6709_v59 }
 0x4c7   :  { %2599 = vmatpush.bf16.msrb.mxu0 %v6710_v4  ;;  %2625 = vmatpush.bf16.msra.mxu2 %v6711_v45  ;;  %v6721_v4 = vld [vmem:[#allocation86_spill] sm:$0xff]  ;;  %v6722_v45 = vld [vmem:[#allocation100_spill] sm:$0xff] }
 0x4c9   :  { %2589 = vmatpush.bf16.msrb.mxu3 %v6712_v63  ;;  %2615 = vmatpush.bf16.msrb.mxu1 %v6714_v42  ;;  %v6723_v63 = vld [vmem:[#allocation17_spill] sm:$0xff]  ;;  %v6725_v42 = vld [vmem:[#allocation18_spill] sm:$0xff] }
 0x4cb   :  { %2600 = vmatpush.bf16.msrb.mxu0 %v6715_v0  ;;  %2626 = vmatpush.bf16.msra.mxu2 %v6716_v56  ;;  %v6726_v0 = vld [vmem:[#allocation101_spill] sm:$0xff]  ;;  %v6727_v56 = vld [vmem:[#allocation20_spill] sm:$0xff] }
 0x4cd   :  { %2634 = vmatpush.bf16.msra.mxu3 %v6713_v55  ;;  %v6724_v55 = vld [vmem:[#allocation98_spill] sm:$0xff] }
 0x4cf   :  { %2601 = vmatpush.bf16.msrb.mxu0 %v6718_v10  ;;  %2627 = vmatpush.bf16.msra.mxu2 %v6719_v50  ;;  %v6729_v10 = vld [vmem:[#allocation22_spill] sm:$0xff]  ;;  %v6730_v50 = vld [vmem:[#allocation104_spill] sm:$0xff] }
 0x4d1   :  { %2635 = vmatpush.bf16.msra.mxu3 %v6717_v54  ;;  %v6728_v54 = vld [vmem:[#allocation102_spill] sm:$0xff] }
 0x4d3   :  { %2602 = vmatpush.bf16.msrb.mxu0 %v6721_v4  ;;  %2628 = vmatpush.bf16.msra.mxu2 %v6722_v45  ;;  %v6732_v4 = vld [vmem:[#allocation105_spill] sm:$0xff]  ;;  %v6733_v45 = vld [vmem:[#allocation26_spill] sm:$0xff] }
 0x4d5   :  { %2636 = vmatpush.bf16.msra.mxu3 %v6720_v30  ;;  %v6731_v30 = vld [vmem:[#allocation24_spill] sm:$0xff] }
 0x4d7   :  { %2702 = vmatpush.bf16.msra.mxu0 %v6723_v63  ;;  %v6734_v63 = vld [vmem:[#allocation28_spill] sm:$0xff] }
 0x4d9   :  { %2637 = vmatpush.bf16.msra.mxu3 %v6724_v55  ;;  %v6735_v55 = vld [vmem:[#allocation30_spill] sm:$0xff] }
 0x4db   :  { %2703 = vmatpush.bf16.msra.mxu0 %v6725_v42 }
 0x4dd   :  { %2638 = vmatpush.bf16.msra.mxu3 %v6726_v0 }
 0x4df   :  { %2704 = vmatpush.bf16.msra.mxu0 %v6727_v56 }
 0x4e1   :  { %2639 = vmatpush.bf16.msra.mxu3 %v6728_v54 }
 0x4e3   :  { %2705 = vmatpush.bf16.msra.mxu0 %v6729_v10 }
 0x4e5   :  { %2640 = vmatpush.bf16.msra.mxu3 %v6730_v50 }
 0x4e7   :  { %2706 = vmatpush.bf16.msra.mxu0 %v6731_v30 }
 0x4e9   :  { %2641 = vmatpush.bf16.msra.mxu3 %v6732_v4  ;;  %v6737_v4 = vld [vmem:[#allocation112_spill] sm:$0xff] }
 0x4eb   :  { %2707 = vmatpush.bf16.msra.mxu0 %v6733_v45 }
 0x4ef   :  { %2708 = vmatpush.bf16.msra.mxu0 %v6734_v63 }
 0x4f3   :  { %2709 = vmatpush.bf16.msra.mxu0 %v6735_v55 }
 0x509   :  { %v2357_v42 = vpop.f32.mrf.mxu1 }
 0x50f   :  { %v2330_v0 = vpop.f32.mrf.mxu3 }
 0x511   :  { %v2359_v59 = vpop.f32.mrf.mxu1 }
 0x513   :  { %v2344_v56 = vpop.f32.mrf.mxu0 }
 0x514   :  { %v2345_v54 = vadd.f32 %v2344_v56, %v6736_v23  ;;  %v6739_v23 = vld [vmem:[#allocation50_spill] sm:$0xff] }
 0x516   :  { %v2358_v3 = vadd.f32 %v2357_v42, %v2345_v54  ;;  %v6738_v42 = vld [vmem:[#allocation48_spill] sm:$0xff] }
 0x517   :  { %v2332_v10 = vpop.f32.mrf.mxu3 }
 0x518   :  { %v3989_v1 = vmul.f32 -1.442695, %v2358_v3 }
 0x519   :  { %v2370_v50 = vpop.f32.mrf.mxu2  ;;  %v2409_v52 = vpop.f32.mrf.mxu1 }
 0x51a   :  { %4360 = vpow2.f32 %v3989_v1  ;;  %v2371_v28 = vadd.f32 %v2370_v50, %v6737_v4  ;;  %v583_v1 = vadd.f32 %v6739_v23, %v6738_v42 }
 0x51b   :  { %v2346_v30 = vpop.f32.mrf.mxu0 }
 0x51f   :  { %v2383_v45 = vpop.f32.mrf.mxu3 }
 0x520   :  { %v4361_v47 = vpop.eup %4360  ;;  %v2384_v63 = vadd.f32 %v2383_v45, %v2371_v28 }
 0x521   :  { %v2416_v34 = vadd.f32 1.0, %v4361_v47  ;;  %v2372_v55 = vpop.f32.mrf.mxu2  ;;  %v2411_v2 = vpop.f32.mrf.mxu1 }
 0x522   :  { %v3990_v39 = vmul.f32 -1.442695, %v2384_v63  ;;  %v6741_v55 = vld [vmem:[#allocation53_spill] sm:$0xff] }
 0x523   :  { %4362 = vrcp.f32 %v2416_v34  ;;  %v2396_v59 = vpop.f32.mrf.mxu0  ;;  %v2428_v2 = vand.u32 2147483648, %v2416_v34  ;;  %v2426_v63 = vand.u32 2147483647, %v2416_v34  ;;  %vm2422_vm9 = vweird.f32 %v2416_v34 }
 0x524   :  { %4364 = vpow2.f32 %v3990_v39  ;;  %v2397_v23 = vadd.f32 %v2396_v59, %v6743_v24 }
 0x525   :  { %vm2427_vm11 = vcmp.eq.f32.partialorder %v2426_v63, 8.507059e+37 }
 0x527   :  { %v2385_v56 = vpop.f32.mrf.mxu3 }
 0x528   :  { %v6742_v56 = vld [vmem:[#allocation55_spill] sm:$0xff] }
 0x529   :  { %v4363_v54 = vpop.eup %4362  ;;  %v2477_v10 = vpop.f32.mrf.mxu2  ;;  %v641_v13 = vadd.f32 %v6742_v56, %v6741_v55 }
 0x52a   :  { %v4365_v3 = vpop.eup %4364  ;;  %v2418_v30 = vmul.f32 %v4363_v54, %v2416_v34  ;;  %v2478_v50 = vadd.f32 %v2477_v10, %v6740_v58  ;;  %vm2423_vm8 = vweird.f32 %v4363_v54  ;;  %v6744_v10 = vld [vmem:[#allocation81_spill] sm:$0xff]  ;;  %v2410_v34 = vadd.f32 %v2409_v52, %v2397_v23 }
 0x52b   :  { %v2435_v4 = vadd.f32 1.0, %v4365_v3  ;;  %v2398_v8 = vpop.f32.mrf.mxu0  ;;  %vm2424_vm10 = vmor %vm2422_vm9, %vm2423_vm8 }
 0x52c   :  { %v2419_v28 = vsub.f32 1.0, %v2418_v30  ;;  %v2507_v47 = vadd.f32 %v2478_v50, %v583_v1  ;;  %v2429_v8 = vor.u32 1.1754944e-38, %v2428_v2  ;;  %v6745_v30 = vld [vmem:[#allocation21_spill] sm:$0xff] }
 0x52d   :  { %4366 = vrcp.f32 %v2435_v4  ;;  %v2331_v50 = vadd.f32 %v6745_v30, %v2330_v0  ;;  %v2445_v0 = vand.u32 2147483647, %v2435_v4  ;;  %vm2441_vm15 = vweird.f32 %v2435_v4 }
 0x52e   :  { %v2420_v45 = vmul.f32 %v4363_v54, %v2419_v28  ;;  %v3991_v39 = vmul.f32 -1.442695, %v2507_v47 }
 0x52f   :  { %v2490_v18 = vpop.f32.mrf.mxu3  ;;  %vm2446_vm1 = vcmp.eq.f32.partialorder %v2445_v0, 8.507059e+37 }
 0x530   :  { %v2421_v42 = vadd.f32 %v4363_v54, %v2420_v45  ;;  %4368 = vpow2.f32 %v3991_v39  ;;  %v2491_v3 = vadd.f32 %v2490_v18, %v6744_v10  ;;  %v2447_v18 = vand.u32 2147483648, %v2435_v4 }
 0x531   :  { %v2479_v1 = vpop.f32.mrf.mxu2 }
 0x532   :  { %v2425_v28 = vsel %vm2424_vm10, %v4363_v54, %v2421_v42  ;;  %v2508_v58 = vadd.f32 %v2491_v3, %v641_v13  ;;  %v2448_v54 = vor.u32 1.1754944e-38, %v2447_v18 }
 0x533   :  { %v4367_v47 = vpop.eup %4366  ;;  %v2430_v16 = vsel %vm2427_vm11, %v2429_v8, %v2425_v28  ;;  %v2503_v60 = vpop.f32.mrf.mxu0 }
 0x534   :  { %v2437_v55 = vmul.f32 %v4367_v47, %v2435_v4  ;;  %v2451_v56 = vmul.f32 %v2430_v16, %v2331_v50  ;;  %v3992_v19 = vmul.f32 -1.442695, %v2508_v58  ;;  %vm2442_vm14 = vweird.f32 %v4367_v47 }
 0x535   :  { %vm2443_vm0 = vmor %vm2441_vm15, %vm2442_vm14  ;;  %v2504_v0 = vadd.f32 %v2503_v60, %v5242_v20 }
 0x536   :  { %v4369_v59 = vpop.eup %4368  ;;  %v2438_v45 = vsub.f32 1.0, %v2437_v55  ;;  %v2452_v39 = vadd.f32 %v2451_v56, %v2410_v34  ;;  %4370 = vpow2.f32 %v3992_v19 }
 0x537   :  { %v2512_v24 = vadd.f32 1.0, %v4369_v59  ;;  %v2492_v2 = vpop.f32.mrf.mxu3 }
 0x538   :  { %v2439_v1 = vmul.f32 %v4367_v47, %v2438_v45  ;;  %4372 = vtanh.f32 %v2452_v39 }
 0x539   :  { %4374 = vrcp.f32 %v2512_v24  ;;  %v2524_v4 = vand.u32 2147483648, %v2512_v24  ;;  %v2522_v59 = vand.u32 2147483647, %v2512_v24  ;;  %vm2518_vm13 = vweird.f32 %v2512_v24 }
 0x53a   :  { %v2440_v13 = vadd.f32 %v4367_v47, %v2439_v1 }
 0x53b   :  { %v2505_v63 = vpop.f32.mrf.mxu0  ;;  %v2525_v2 = vor.u32 1.1754944e-38, %v2524_v4  ;;  %vm2523_vm3 = vcmp.eq.f32.partialorder %v2522_v59, 8.507059e+37 }
 0x53c   :  { %v4371_v52 = vpop.eup %4370  ;;  %v2444_v16 = vsel %vm2443_vm0, %v4367_v47, %v2440_v13  ;;  %v6747_v63 = vld [vmem:[#allocation107_spill] sm:$0xff] }
 0x53d   :  { %v2449_v58 = vsel %vm2446_vm1, %v2448_v54, %v2444_v16  ;;  %v2531_v23 = vadd.f32 1.0, %v4371_v52  ;;  %v6746_v54 = vld [vmem:[#allocation106_spill] sm:$0xff] }
 0x53e   :  { %v4373_v42 = vpop.eup %4372  ;;  %v2454_v19 = vsub.f32 1.0, %v2449_v58  ;;  %v2456_v50 = vmul.f32 %v2449_v58, %v5785_v62  ;;  %v699_v52 = vadd.f32 %v6747_v63, %v6746_v54  ;;  %v6756_v54 = vld [vmem:[#allocation52_spill] sm:$0xff]  ;;  %v6757_v63 = vld [vmem:[#allocation51_spill] sm:$0xff] }
 0x53f   :  { %v4375_v3 = vpop.eup %4374  ;;  %4376 = vrcp.f32 %v2531_v23  ;;  %vm2537_vm5 = vweird.f32 %v2531_v23  ;;  %v6774_v62 = vld [vmem:[#allocation72_spill] sm:$0xff] }
 0x540   :  { %v2455_v8 = vmul.f32 %v4373_v42, %v2454_v19  ;;  %v2514_v28 = vmul.f32 %v4375_v3, %v2512_v24  ;;  %vm2519_vm12 = vweird.f32 %v4375_v3  ;;  %v2543_v24 = vand.u32 2147483648, %v2531_v23 }
 0x541   :  { %vm2520_vm2 = vmor %vm2518_vm13, %vm2519_vm12  ;;  %v2541_v19 = vand.u32 2147483647, %v2531_v23 }
 0x542   :  { %v5926_v55 = vadd.f32 %v2456_v50, %v2455_v8  ;;  %v2515_v34 = vsub.f32 1.0, %v2514_v28  ;;  %v2544_v60 = vor.u32 1.1754944e-38, %v2543_v24  ;;  %v6761_v24 = vld [vmem:[#allocation57_spill] sm:$0xff] }
 0x543   :  { %vm2542_vm7 = vcmp.eq.f32.partialorder %v2541_v19, 8.507059e+37  ;;  %v6763_v19 = vld [vmem:[#allocation84_spill] sm:$0xff] }
 0x544   :  { %v2516_v56 = vmul.f32 %v4375_v3, %v2515_v34  ;;  %v2554_v47 = vpack.c.bf16 %v5926_v55, %v5926_v55 }
 0x545   :  { %v4377_v45 = vpop.eup %4376 }
 0x546   :  { %v2533_v39 = vmul.f32 %v4377_v45, %v2531_v23  ;;  %v2517_v18 = vadd.f32 %v4375_v3, %v2516_v56  ;;  %2563 = vmatmul.bf16.vlgmr.msra.gmra.mxu1 %v2554_v47  ;;  %2590 = vmatmul.bf16.vlgmr.msrb.gmra.mxu3 %v2554_v47  ;;  %vm2538_vm4 = vweird.f32 %v4377_v45 }
 0x547   :  { %2715 = vmatpush.bf16.msra.mxu1 %v6533_v37  ;;  %2789 = vmatpush.bf16.msrb.mxu3 %v5794_v44  ;;  %vm2539_vm6 = vmor %vm2537_vm5, %vm2538_vm4 }
 0x548   :  { %v2534_v1 = vsub.f32 1.0, %v2533_v39  ;;  %v2521_v13 = vsel %vm2520_vm2, %v4375_v3, %v2517_v18  ;;  %v6750_v39 = vld [vmem:[#allocation60_spill] sm:$0xff]  ;;  %v6751_v18 = vld [vmem:[#allocation33_spill] sm:$0xff] }
 0x549   :  { %v2526_v16 = vsel %vm2523_vm3, %v2525_v2, %v2521_v13  ;;  %v6752_v2 = vld [vmem:[#allocation49_spill] sm:$0xff]  ;;  %v6755_v13 = vld [vmem:[#allocation34_spill] sm:$0xff] }
 0x54a   :  { %v2535_v58 = vmul.f32 %v4377_v45, %v2534_v1  ;;  %v2547_v42 = vmul.f32 %v2526_v16, %v2504_v0  ;;  %v6753_v1 = vld [vmem:[#allocation75_spill] sm:$0xff]  ;;  %v6754_v0 = vld [vmem:[#allocation64_spill] sm:$0xff] }
 0x54b   :  { %2716 = vmatpush.bf16.msra.mxu1 %v6534_v25  ;;  %2790 = vmatpush.bf16.msrb.mxu3 %v5802_v43  ;;  %v6759_v16 = vld [vmem:[#allocation71_spill] sm:$0xff] }
 0x54c   :  { %v2536_v8 = vadd.f32 %v4377_v45, %v2535_v58  ;;  %v2548_v50 = vadd.f32 %v2547_v42, %v699_v52  ;;  %v6758_v52 = vld [vmem:[#allocation80_spill] sm:$0xff]  ;;  %v6760_v58 = vld [vmem:[#allocation73_spill] sm:$0xff] }
 0x54d   :  { %v6762_v42 = vld [vmem:[#allocation56_spill] sm:$0xff] }
 0x54e   :  { %v2540_v3 = vsel %vm2539_vm6, %v4377_v45, %v2536_v8  ;;  %4378 = vtanh.f32 %v2548_v50  ;;  %v6764_v8 = vld [vmem:[#allocation78_spill] sm:$0xff] }
 0x54f   :  { %2717 = vmatpush.bf16.msra.mxu1 %v6537_v11  ;;  %2791 = vmatpush.bf16.msrb.mxu3 %v5813_v53  ;;  %v2545_v28 = vsel %vm2542_vm7, %v2544_v60, %v2540_v3  ;;  %v6765_v50 = vld [vmem:[#allocation62_spill] sm:$0xff]  ;;  %v6766_v60 = vld [vmem:[#allocation61_spill] sm:$0xff] }
 0x550   :  { %v2550_v34 = vsub.f32 1.0, %v2545_v28  ;;  %v2552_v23 = vmul.f32 %v2545_v28, %v5805_v46  ;;  %v6748_v46 = vld [vmem:[#allocation46_spill] sm:$0xff]  ;;  %v6767_v3 = vld [vmem:[#allocation89_spill] sm:$0xff] }
 0x551   :  { %v6768_v28 = vld [vmem:[#allocation90_spill] sm:$0xff] }
 0x553   :  { %2718 = vmatpush.bf16.msra.mxu1 %v6538_v40  ;;  %2792 = vmatpush.bf16.msrb.mxu3 %v5822_v57 }
 0x554   :  { %v4379_v4 = vpop.eup %4378 }
 0x555   :  { %v2551_v56 = vmul.f32 %v4379_v4, %v2550_v34  ;;  %v6769_v34 = vld [vmem:[#allocation83_spill] sm:$0xff]  ;;  %v6770_v4 = vld [vmem:[#allocation69_spill] sm:$0xff] }
 0x556   :  { %2616 = vmatmul.bf16.vlgmr.msrb.gmra.mxu1 %v2554_v47  ;;  %2642 = vmatmul.bf16.vlgmr.msra.gmra.mxu3 %v2554_v47  ;;  %v6749_v47 = vld [vmem:[#allocation70_spill] sm:$0xff] }
 0x557   :  { %v5942_v59 = vadd.f32 %v2552_v23, %v2551_v56  ;;  %2719 = vmatpush.bf16.msra.mxu1 %v6539_v33  ;;  %2793 = vmatpush.bf16.msrb.mxu3 %v5831_v31  ;;  %v6771_v56 = vld [vmem:[#allocation67_spill] sm:$0xff]  ;;  %v6772_v23 = vld [vmem:[#allocation92_spill] sm:$0xff] }
 0x559   :  { %v2568_v45 = vpack.c.bf16 %v5942_v59, %v5942_v59 }
 0x55b   :  { %2577 = vmatmul.bf16.vlgmr.msrb.gmra.mxu2 %v2568_v45  ;;  %2603 = vmatmul.bf16.vlgmr.msrb.gmra.mxu0 %v2568_v45 }
 0x55c   :  { %2720 = vmatpush.bf16.msra.mxu1 %v6540_v38  ;;  %2728 = vmatpush.bf16.msrb.mxu2 %v4846_v36 }
 0x55d   :  { %2803 = vmatpush.bf16.msrb.mxu0 %v5031_v26  ;;  %2794 = vmatpush.bf16.msrb.mxu3 %v5840_v7 }
 0x560   :  { %2721 = vmatpush.bf16.msra.mxu1 %v6541_v9  ;;  %2729 = vmatpush.bf16.msrb.mxu2 %v4852_v49 }
 0x561   :  { %2804 = vmatpush.bf16.msrb.mxu0 %v5040_v51  ;;  %2795 = vmatpush.bf16.msrb.mxu3 %v5849_v5 }
 0x564   :  { %2722 = vmatpush.bf16.msra.mxu1 %v6542_v32  ;;  %2730 = vmatpush.bf16.msrb.mxu2 %v4865_v6 }
 0x565   :  { %2805 = vmatpush.bf16.msrb.mxu0 %v5046_v29  ;;  %2796 = vmatpush.bf16.msrb.mxu3 %v5858_v48 }
 0x567   :  { %2723 = vmatmul.bf16.vlgmr.msra.gmra.mxu1 %v2568_v45 }
 0x568   :  { %2816 = vmatpush.bf16.msrb.mxu1 %v6543_v21  ;;  %2731 = vmatpush.bf16.msrb.mxu2 %v4888_v15 }
 0x569   :  { %2842 = vmatpush.bf16.msra.mxu3 %v5023_v17  ;;  %2806 = vmatpush.bf16.msrb.mxu0 %v5058_v14 }
 0x56b   :  { %2629 = vmatmul.bf16.vlgmr.msra.gmra.mxu2 %v2568_v45  ;;  %2710 = vmatmul.bf16.vlgmr.msra.gmra.mxu0 %v2568_v45 }
 0x56c   :  { %2817 = vmatpush.bf16.msrb.mxu1 %v6544_v61  ;;  %2732 = vmatpush.bf16.msrb.mxu2 %v4891_v22 }
 0x56d   :  { %2843 = vmatpush.bf16.msra.mxu3 %v5033_v35  ;;  %2807 = vmatpush.bf16.msrb.mxu0 %v5073_v12 }
 0x570   :  { %2818 = vmatpush.bf16.msrb.mxu1 %v6581_v41  ;;  %2733 = vmatpush.bf16.msrb.mxu2 %v4894_v27 }
 0x571   :  { %2844 = vmatpush.bf16.msra.mxu3 %v6748_v46  ;;  %2808 = vmatpush.bf16.msrb.mxu0 %v6750_v39 }
 0x574   :  { %2819 = vmatpush.bf16.msrb.mxu1 %v6749_v47  ;;  %2734 = vmatpush.bf16.msrb.mxu2 %v6751_v18 }
 0x575   :  { %2845 = vmatpush.bf16.msra.mxu3 %v6752_v2  ;;  %2809 = vmatpush.bf16.msrb.mxu0 %v6754_v0 }
 0x578   :  { %2820 = vmatpush.bf16.msrb.mxu1 %v6753_v1  ;;  %2735 = vmatpush.bf16.msrb.mxu2 %v6755_v13 }
 0x579   :  { %2846 = vmatpush.bf16.msra.mxu3 %v6756_v54  ;;  %2810 = vmatpush.bf16.msrb.mxu0 %v6759_v16 }
 0x57b   :  { %2736 = vmatmul.bf16.vlgmr.msrb.gmra.mxu2 %v2568_v45  ;;  %v6773_v45 = vld [vmem:[#allocation88_spill] sm:$0xff] }
 0x57c   :  { %2829 = vmatpush.bf16.msra.mxu2 %v6757_v63  ;;  %2821 = vmatpush.bf16.msrb.mxu1 %v6758_v52  ;;  %v6780_v52 = vld [vmem:[#allocation82_spill] sm:$0xff] }
 0x57d   :  { %2855 = vmatpush.bf16.msra.mxu0 %v6760_v58  ;;  %2847 = vmatpush.bf16.msra.mxu3 %v6761_v24  ;;  %v6777_v24 = vld [vmem:[#allocation77_spill] sm:$0xff] }
 0x580   :  { %2830 = vmatpush.bf16.msra.mxu2 %v6762_v42  ;;  %2822 = vmatpush.bf16.msrb.mxu1 %v6763_v19  ;;  %v6775_v19 = vld [vmem:[#allocation95_spill] sm:$0xff] }
 0x581   :  { %2856 = vmatpush.bf16.msra.mxu0 %v6764_v8  ;;  %2848 = vmatpush.bf16.msra.mxu3 %v6765_v50  ;;  %v6776_v50 = vld [vmem:[#allocation91_spill] sm:$0xff] }
 0x584   :  { %2831 = vmatpush.bf16.msra.mxu2 %v6766_v60  ;;  %2823 = vmatpush.bf16.msrb.mxu1 %v6767_v3  ;;  %v6778_v3 = vld [vmem:[#allocation98_spill] sm:$0xff] }
 0x585   :  { %2857 = vmatpush.bf16.msra.mxu0 %v6769_v34  ;;  %2849 = vmatpush.bf16.msra.mxu3 %v6770_v4  ;;  %v6781_v4 = vld [vmem:[#allocation101_spill] sm:$0xff] }
 0x588   :  { %2868 = vmatpush.bf16.msra.mxu1 %v6768_v28  ;;  %2832 = vmatpush.bf16.msra.mxu2 %v6771_v56  ;;  %v6779_v28 = vld [vmem:[#allocation93_spill] sm:$0xff]  ;;  %v6782_v56 = vld [vmem:[#allocation96_spill] sm:$0xff] }
 0x589   :  { %2858 = vmatpush.bf16.msra.mxu0 %v6773_v45  ;;  %v6784_v45 = vld [vmem:[#allocation17_spill] sm:$0xff] }
 0x58c   :  { %2869 = vmatpush.bf16.msra.mxu1 %v6772_v23  ;;  %2833 = vmatpush.bf16.msra.mxu2 %v6774_v62  ;;  %v6783_v23 = vld [vmem:[#allocation86_spill] sm:$0xff] }
 0x58d   :  { %2859 = vmatpush.bf16.msra.mxu0 %v6776_v50  ;;  %v6785_v62 = vld [vmem:[#allocation102_spill] sm:$0xff] }
 0x58e   :  { %v6787_v50 = vld [vmem:[#allocation18_spill] sm:$0xff] }
 0x590   :  { %2870 = vmatpush.bf16.msra.mxu1 %v6775_v19  ;;  %2834 = vmatpush.bf16.msra.mxu2 %v6777_v24  ;;  %v6786_v19 = vld [vmem:[#allocation100_spill] sm:$0xff] }
 0x591   :  { %2860 = vmatpush.bf16.msra.mxu0 %v6779_v28  ;;  %v6788_v24 = vld [vmem:[#allocation104_spill] sm:$0xff]  ;;  %v6790_v28 = vld [vmem:[#allocation105_spill] sm:$0xff] }
 0x594   :  { %2871 = vmatpush.bf16.msra.mxu1 %v6778_v3  ;;  %2835 = vmatpush.bf16.msra.mxu2 %v6780_v52  ;;  %v6789_v3 = vld [vmem:[#allocation20_spill] sm:$0xff]  ;;  %v6791_v52 = vld [vmem:[#allocation22_spill] sm:$0xff] }
 0x595   :  { %2861 = vmatpush.bf16.msra.mxu0 %v6782_v56  ;;  %v6793_v56 = vld [vmem:[#allocation26_spill] sm:$0xff] }
 0x598   :  { %2872 = vmatpush.bf16.msra.mxu1 %v6781_v4  ;;  %2836 = vmatpush.bf16.msra.mxu2 %v6783_v23  ;;  %v6792_v4 = vld [vmem:[#allocation24_spill] sm:$0xff] }
 0x599   :  { %2862 = vmatpush.bf16.msra.mxu0 %v6786_v19  ;;  %v6794_v23 = vld [vmem:[#allocation28_spill] sm:$0xff] }
 0x59c   :  { %2936 = vmatpush.bf16.msrb.mxu2 %v6784_v45  ;;  %2873 = vmatpush.bf16.msra.mxu1 %v6785_v62  ;;  %v6795_v45 = vld [vmem:[#allocation30_spill] sm:$0xff] }
 0x5a0   :  { %2937 = vmatpush.bf16.msrb.mxu2 %v6787_v50  ;;  %2874 = vmatpush.bf16.msra.mxu1 %v6788_v24 }
 0x5a4   :  { %2938 = vmatpush.bf16.msrb.mxu2 %v6789_v3  ;;  %2875 = vmatpush.bf16.msra.mxu1 %v6790_v28  ;;  %v6796_v3 = vld [vmem:[#allocation112_spill] sm:$0xff] }
 0x5a8   :  { %2939 = vmatpush.bf16.msrb.mxu2 %v6791_v52 }
 0x5ac   :  { %2940 = vmatpush.bf16.msrb.mxu2 %v6792_v4 }
 0x5b0   :  { %2941 = vmatpush.bf16.msrb.mxu2 %v6793_v56  ;;  %v6797_v56 = vld [vmem:[#allocation111_spill] sm:$0xff] }
 0x5b4   :  { %2942 = vmatpush.bf16.msrb.mxu2 %v6794_v23 }
 0x5b8   :  { %2943 = vmatpush.bf16.msrb.mxu2 %v6795_v45 }
 0x5c3   :  { %v6018_v62 = vpop.f32.mrf.mxu1 }
 0x5c9   :  { %v2591_v19 = vpop.f32.mrf.mxu3 }
 0x5cb   :  { %v2566_v50 = vpop.f32.mrf.mxu1 }
 0x5d1   :  { %v2593_v34 = vpop.f32.mrf.mxu3 }
 0x5d3   :  { %v2617_v24 = vpop.f32.mrf.mxu1 }
 0x5d8   :  { %v2604_v60 = vpop.f32.mrf.mxu0 }
 0x5d9   :  { %v2605_v54 = vadd.f32 %v2604_v60, %v6796_v3  ;;  %v6021_v28 = vpop.f32.mrf.mxu3  ;;  %v6798_v3 = vld [vmem:[#allocation65_spill] sm:$0xff] }
 0x5db   :  { %v2618_v52 = vadd.f32 %v2617_v24, %v2605_v54  ;;  %v2619_v1 = vpop.f32.mrf.mxu1 }
 0x5dd   :  { %v3994_v4 = vmul.f32 -1.442695, %v2618_v52  ;;  %v6799_v52 = vld [vmem:[#allocation79_spill] sm:$0xff] }
 0x5de   :  { %v2578_v8 = vpop.f32.mrf.mxu2 }
 0x5df   :  { %4380 = vpow2.f32 %v3994_v4  ;;  %v2579_v23 = vadd.f32 %v2578_v8, %v6797_v56  ;;  %v6801_v56 = vld [vmem:[#allocation37_spill] sm:$0xff] }
 0x5e0   :  { %v2606_v42 = vpop.f32.mrf.mxu0 }
 0x5e1   :  { %v2592_v45 = vadd.f32 %v2591_v19, %v2579_v23  ;;  %v2645_v2 = vpop.f32.mrf.mxu3 }
 0x5e2   :  { %v6800_v2 = vld [vmem:[#allocation58_spill] sm:$0xff] }
 0x5e3   :  { %v3993_v47 = vmul.f32 -1.442695, %v2592_v45 }
 0x5e4   :  { %v2724_v58 = vpop.f32.mrf.mxu1 }
 0x5e5   :  { %v4381_v50 = vpop.eup %4380  ;;  %4382 = vpow2.f32 %v3993_v47  ;;  %v2725_v34 = vadd.f32 %v2724_v58, %v6744_v10 }
 0x5e6   :  { %v6025_v63 = vadd.f32 1.0, %v4381_v50  ;;  %v2580_v60 = vpop.f32.mrf.mxu2 }
 0x5e7   :  { %v2742_v54 = vadd.f32 %v2725_v34, %v6798_v3 }
 0x5e8   :  { %v2711_v1 = vpop.f32.mrf.mxu0  ;;  %4384 = vrcp.f32 %v6025_v63  ;;  %vm2675_vm15 = vweird.f32 %v6025_v63 }
 0x5e9   :  { %v3996_v24 = vmul.f32 -1.442695, %v2742_v54  ;;  %v2712_v8 = vadd.f32 %v2711_v1, %v6799_v52 }
 0x5eb   :  { %v4383_v42 = vpop.eup %4382  ;;  %4386 = vpow2.f32 %v3996_v24  ;;  %v2741_v19 = vadd.f32 %v2712_v8, %v6800_v2 }
 0x5ec   :  { %v2650_v4 = vadd.f32 1.0, %v4383_v42  ;;  %v2726_v23 = vpop.f32.mrf.mxu1 }
 0x5ed   :  { %v3995_v47 = vmul.f32 -1.442695, %v2741_v19 }
 0x5ee   :  { %4388 = vrcp.f32 %v2650_v4  ;;  %v2630_v58 = vpop.f32.mrf.mxu2  ;;  %v4385_v45 = vpop.eup %4384  ;;  %v2662_v19 = vand.u32 2147483648, %v2650_v4  ;;  %vm2656_vm9 = vweird.f32 %v2650_v4 }
 0x5ef   :  { %4390 = vpow2.f32 %v3995_v47  ;;  %v2671_v3 = vmul.f32 %v4385_v45, %v6025_v63  ;;  %v2660_v47 = vand.u32 2147483647, %v2650_v4  ;;  %vm2676_vm14 = vweird.f32 %v4385_v45 }
 0x5f0   :  { %v2713_v50 = vpop.f32.mrf.mxu0  ;;  %vm2677_vm0 = vmor %vm2675_vm15, %vm2676_vm14 }
 0x5f1   :  { %v4387_v60 = vpop.eup %4386  ;;  %v2672_v10 = vsub.f32 1.0, %v2671_v3  ;;  %v2663_v3 = vor.u32 1.1754944e-38, %v2662_v19  ;;  %vm2661_vm11 = vcmp.eq.f32.partialorder %v2660_v47, 8.507059e+37  ;;  %v2679_v19 = vand.u32 2147483647, %v6025_v63 }
 0x5f2   :  { %v6032_v34 = vadd.f32 1.0, %v4387_v60  ;;  %v2631_v60 = vadd.f32 %v2630_v58, %v6801_v56 }
 0x5f3   :  { %v2673_v52 = vmul.f32 %v4385_v45, %v2672_v10  ;;  %vm2680_vm12 = vcmp.eq.f32.partialorder %v2679_v19, 8.507059e+37 }
 0x5f4   :  { %v4389_v54 = vpop.eup %4388  ;;  %4392 = vrcp.f32 %v6032_v34  ;;  %v2644_v58 = vadd.f32 %v6021_v28, %v2631_v60  ;;  %vm2771_vm5 = vweird.f32 %v6032_v34 }
 0x5f5   :  { %v4391_v1 = vpop.eup %4390  ;;  %v2652_v24 = vmul.f32 %v4389_v54, %v2650_v4  ;;  %vm2657_vm8 = vweird.f32 %v4389_v54  ;;  %v2674_v10 = vadd.f32 %v4385_v45, %v2673_v52 }
 0x5f6   :  { %v2746_v8 = vadd.f32 1.0, %v4391_v1  ;;  %v2632_v42 = vpop.f32.mrf.mxu2  ;;  %vm2658_vm10 = vmor %vm2656_vm9, %vm2657_vm8  ;;  %v2565_v1 = vadd.f32 %v6745_v30, %v6018_v62 }
 0x5f7   :  { %v2653_v2 = vsub.f32 1.0, %v2652_v24 }
 0x5f8   :  { %4394 = vrcp.f32 %v2746_v8  ;;  %v2758_v47 = vand.u32 2147483648, %v2746_v8  ;;  %v2756_v52 = vand.u32 2147483647, %v2746_v8  ;;  %vm2752_vm13 = vweird.f32 %v2746_v8 }
 0x5f9   :  { %v2654_v23 = vmul.f32 %v4389_v54, %v2653_v2  ;;  %v2681_v2 = vand.u32 2147483648, %v6025_v63 }
 0x5fa   :  { %v6035_v50 = vpop.eup %4392  ;;  %vm2757_vm3 = vcmp.eq.f32.partialorder %v2756_v52, 8.507059e+37 }
 0x5fb   :  { %v2655_v16 = vadd.f32 %v4389_v54, %v2654_v23  ;;  %v2767_v13 = vmul.f32 %v6035_v50, %v6032_v34  ;;  %vm2772_vm4 = vweird.f32 %v6035_v50 }
 0x5fc   :  { %vm2773_vm6 = vmor %vm2771_vm5, %vm2772_vm4 }
 0x5fd   :  { %v2659_v24 = vsel %vm2658_vm10, %v4389_v54, %v2655_v16  ;;  %v2768_v56 = vsub.f32 1.0, %v2767_v13  ;;  %v2682_v16 = vor.u32 1.1754944e-38, %v2681_v2  ;;  %v2678_v54 = vsel %vm2677_vm0, %v4385_v45, %v2674_v10 }
 0x5fe   :  { %v4395_v42 = vpop.eup %4394  ;;  %v2664_v46 = vsel %vm2661_vm11, %v2663_v3, %v2659_v24  ;;  %v2737_v41 = vpop.f32.mrf.mxu2  ;;  %v2759_v13 = vor.u32 1.1754944e-38, %v2758_v47 }
 0x5ff   :  { %v2685_v4 = vmul.f32 %v2664_v46, %v2565_v1  ;;  %v2748_v23 = vmul.f32 %v4395_v42, %v2746_v8  ;;  %vm2753_vm1 = vweird.f32 %v4395_v42  ;;  %v2769_v3 = vmul.f32 %v6035_v50, %v2768_v56 }
 0x600   :  { %v2683_v46 = vsel %vm2680_vm12, %v2682_v16, %v2678_v54  ;;  %vm2754_vm2 = vmor %vm2752_vm13, %vm2753_vm1  ;;  %v2738_v63 = vadd.f32 %v2737_v41, %v5242_v20  ;;  %v2777_v56 = vand.u32 2147483648, %v6032_v34  ;;  %v6802_v41 = vld [vmem:[#allocation108_spill] sm:$0xff] }
 0x601   :  { %v2686_v62 = vadd.f32 %v2685_v4, %v2644_v58  ;;  %v2749_v30 = vsub.f32 1.0, %v2748_v23  ;;  %v2688_v45 = vsub.f32 1.0, %v2683_v46  ;;  %v2770_v2 = vadd.f32 %v6035_v50, %v2769_v3 }
 0x602   :  { %v2690_v8 = vmul.f32 %v2683_v46, %v5926_v55  ;;  %v2775_v4 = vand.u32 2147483647, %v6032_v34  ;;  %v6837_v46 = vld [vmem:[#allocation98_spill] sm:$0xff] }
 0x603   :  { %4396 = vtanh.f32 %v2686_v62  ;;  %v2750_v0 = vmul.f32 %v4395_v42, %v2749_v30  ;;  %v2774_v19 = vsel %vm2773_vm6, %v6035_v50, %v2770_v2  ;;  %v2778_v62 = vor.u32 1.1754944e-38, %v2777_v56 }
 0x604   :  { %vm2776_vm7 = vcmp.eq.f32.partialorder %v2775_v4, 8.507059e+37 }
 0x605   :  { %v2751_v28 = vadd.f32 %v4395_v42, %v2750_v0  ;;  %v2779_v16 = vsel %vm2776_vm7, %v2778_v62, %v2774_v19  ;;  %v6843_v19 = vld [vmem:[#allocation112_spill] sm:$0xff] }
 0x606   :  { %v2739_v60 = vpop.f32.mrf.mxu2  ;;  %v2784_v34 = vsub.f32 1.0, %v2779_v16  ;;  %v2786_v52 = vmul.f32 %v2779_v16, %v5942_v59  ;;  %v6834_v59 = vld [vmem:[#allocation95_spill] sm:$0xff] }
 0x607   :  { %v2755_v1 = vsel %vm2754_vm2, %v4395_v42, %v2751_v28  ;;  %v6838_v28 = vld [vmem:[#allocation101_spill] sm:$0xff]  ;;  %v6840_v60 = vld [vmem:[#allocation104_spill] sm:$0xff] }
 0x608   :  { %v2760_v24 = vsel %vm2757_vm3, %v2759_v13, %v2755_v1  ;;  %v6839_v13 = vld [vmem:[#allocation102_spill] sm:$0xff] }
 0x609   :  { %v4397_v10 = vpop.eup %4396  ;;  %v2781_v58 = vmul.f32 %v2760_v24, %v2738_v63  ;;  %v6841_v63 = vld [vmem:[#allocation105_spill] sm:$0xff] }
 0x60a   :  { %v2689_v0 = vmul.f32 %v4397_v10, %v2688_v45  ;;  %v6842_v10 = vld [vmem:[#allocation111_spill] sm:$0xff] }
 0x60b   :  { %v2782_v42 = vadd.f32 %v2781_v58, %v6802_v41 }
 0x60c   :  { %v6055_v23 = vadd.f32 %v2690_v8, %v2689_v0 }
 0x60d   :  { %4398 = vtanh.f32 %v2782_v42 }
 0x60e   :  { %v2788_v30 = vpack.c.bf16 %v6055_v23, %v6055_v23 }
 0x610   :  { %2797 = vmatmul.bf16.vlgmr.msrb.gmra.mxu3 %v2788_v30  ;;  %2824 = vmatmul.bf16.vlgmr.msrb.gmra.mxu1 %v2788_v30 }
 0x611   :  { %2949 = vmatpush.bf16.msrb.mxu3 %v6533_v37  ;;  %3023 = vmatpush.bf16.msrb.mxu1 %v5794_v44  ;;  %v6816_v37 = vld [vmem:[#allocation61_spill] sm:$0xff] }
 0x612   :  { %v6826_v44 = vld [vmem:[#allocation89_spill] sm:$0xff] }
 0x613   :  { %v4399_v54 = vpop.eup %4398 }
 0x614   :  { %v2785_v47 = vmul.f32 %v4399_v54, %v2784_v34 }
 0x615   :  { %2950 = vmatpush.bf16.msrb.mxu3 %v6534_v25  ;;  %3024 = vmatpush.bf16.msrb.mxu1 %v5802_v43  ;;  %v6817_v25 = vld [vmem:[#allocation83_spill] sm:$0xff]  ;;  %v6827_v43 = vld [vmem:[#allocation90_spill] sm:$0xff] }
 0x616   :  { %v6065_v50 = vadd.f32 %v2786_v52, %v2785_v47 }
 0x618   :  { %v2802_v3 = vpack.c.bf16 %v6065_v50, %v6065_v50 }
 0x619   :  { %2951 = vmatpush.bf16.msrb.mxu3 %v6537_v11  ;;  %3025 = vmatpush.bf16.msrb.mxu1 %v5813_v53  ;;  %v6818_v11 = vld [vmem:[#allocation80_spill] sm:$0xff]  ;;  %v6828_v53 = vld [vmem:[#allocation69_spill] sm:$0xff] }
 0x61a   :  { %2811 = vmatmul.bf16.vlgmr.msrb.gmra.mxu0 %v2802_v3  ;;  %2837 = vmatmul.bf16.vlgmr.msra.gmra.mxu2 %v2802_v3 }
 0x61b   :  { %2962 = vmatpush.bf16.msrb.mxu0 %v4846_v36  ;;  %3037 = vmatpush.bf16.msra.mxu2 %v5031_v26  ;;  %v6803_v36 = vld [vmem:[#allocation64_spill] sm:$0xff]  ;;  %v6810_v26 = vld [vmem:[#allocation70_spill] sm:$0xff] }
 0x61d   :  { %2952 = vmatpush.bf16.msrb.mxu3 %v6538_v40  ;;  %3026 = vmatpush.bf16.msrb.mxu1 %v5822_v57  ;;  %v6819_v40 = vld [vmem:[#allocation57_spill] sm:$0xff] }
 0x61e   :  { %v6829_v57 = vld [vmem:[#allocation77_spill] sm:$0xff] }
 0x61f   :  { %2963 = vmatpush.bf16.msrb.mxu0 %v4852_v49  ;;  %3038 = vmatpush.bf16.msra.mxu2 %v5040_v51  ;;  %v6804_v49 = vld [vmem:[#allocation63_spill] sm:$0xff]  ;;  %v6813_v51 = vld [vmem:[#allocation78_spill] sm:$0xff] }
 0x620   :  { %2850 = vmatmul.bf16.vlgmr.msra.gmra.mxu3 %v2788_v30  ;;  %2876 = vmatmul.bf16.vlgmr.msra.gmra.mxu1 %v2788_v30 }
 0x621   :  { %2953 = vmatpush.bf16.msrb.mxu3 %v6539_v33  ;;  %3027 = vmatpush.bf16.msrb.mxu1 %v5831_v31  ;;  %v6820_v33 = vld [vmem:[#allocation67_spill] sm:$0xff]  ;;  %v6830_v31 = vld [vmem:[#allocation93_spill] sm:$0xff] }
 0x623   :  { %2964 = vmatpush.bf16.msrb.mxu0 %v4865_v6  ;;  %3039 = vmatpush.bf16.msra.mxu2 %v5046_v29  ;;  %v6805_v6 = vld [vmem:[#allocation46_spill] sm:$0xff]  ;;  %v6814_v29 = vld [vmem:[#allocation75_spill] sm:$0xff] }
 0x625   :  { %2954 = vmatpush.bf16.msrb.mxu3 %v6540_v38  ;;  %3028 = vmatpush.bf16.msrb.mxu1 %v5840_v7  ;;  %v6821_v38 = vld [vmem:[#allocation88_spill] sm:$0xff] }
 0x626   :  { %v6831_v7 = vld [vmem:[#allocation92_spill] sm:$0xff] }
 0x627   :  { %2965 = vmatpush.bf16.msrb.mxu0 %v4888_v15  ;;  %3040 = vmatpush.bf16.msra.mxu2 %v5058_v14  ;;  %v6806_v15 = vld [vmem:[#allocation34_spill] sm:$0xff]  ;;  %v6812_v14 = vld [vmem:[#allocation56_spill] sm:$0xff] }
 0x629   :  { %2955 = vmatpush.bf16.msrb.mxu3 %v6541_v9  ;;  %3029 = vmatpush.bf16.msrb.mxu1 %v5849_v5  ;;  %v6822_v9 = vld [vmem:[#allocation84_spill] sm:$0xff]  ;;  %v6832_v5 = vld [vmem:[#allocation82_spill] sm:$0xff] }
 0x62a   :  { %2863 = vmatmul.bf16.vlgmr.msra.gmra.mxu0 %v2802_v3  ;;  %2944 = vmatmul.bf16.vlgmr.msrb.gmra.mxu2 %v2802_v3 }
 0x62b   :  { %2966 = vmatpush.bf16.msrb.mxu0 %v4891_v22  ;;  %3041 = vmatpush.bf16.msra.mxu2 %v5073_v12  ;;  %v6807_v22 = vld [vmem:[#allocation71_spill] sm:$0xff]  ;;  %v6815_v12 = vld [vmem:[#allocation52_spill] sm:$0xff] }
 0x62d   :  { %2956 = vmatpush.bf16.msrb.mxu3 %v6542_v32  ;;  %3030 = vmatpush.bf16.msrb.mxu1 %v5858_v48  ;;  %v6823_v32 = vld [vmem:[#allocation62_spill] sm:$0xff]  ;;  %v6833_v48 = vld [vmem:[#allocation96_spill] sm:$0xff] }
 0x62f   :  { %2967 = vmatpush.bf16.msrb.mxu0 %v4894_v27  ;;  %3042 = vmatpush.bf16.msra.mxu2 %v6750_v39  ;;  %v6808_v27 = vld [vmem:[#allocation51_spill] sm:$0xff]  ;;  %v6835_v39 = vld [vmem:[#allocation86_spill] sm:$0xff] }
 0x630   :  { %2957 = vmatmul.bf16.vlgmr.msrb.gmra.mxu3 %v2802_v3 }
 0x631   :  { %3050 = vmatpush.bf16.msra.mxu3 %v6543_v21  ;;  %3076 = vmatpush.bf16.msra.mxu1 %v5023_v17  ;;  %v6809_v17 = vld [vmem:[#allocation73_spill] sm:$0xff]  ;;  %v6824_v21 = vld [vmem:[#allocation72_spill] sm:$0xff] }
 0x633   :  { %2968 = vmatpush.bf16.msrb.mxu0 %v6751_v18  ;;  %3043 = vmatpush.bf16.msra.mxu2 %v6803_v36  ;;  %v6836_v18 = vld [vmem:[#allocation100_spill] sm:$0xff] }
 0x635   :  { %3051 = vmatpush.bf16.msra.mxu3 %v6544_v61  ;;  %3077 = vmatpush.bf16.msra.mxu1 %v5033_v35  ;;  %v6811_v35 = vld [vmem:[#allocation49_spill] sm:$0xff]  ;;  %v6825_v61 = vld [vmem:[#allocation91_spill] sm:$0xff] }
 0x637   :  { %2969 = vmatpush.bf16.msrb.mxu0 %v6806_v15  ;;  %3044 = vmatpush.bf16.msra.mxu2 %v6807_v22 }
 0x639   :  { %3052 = vmatpush.bf16.msra.mxu3 %v6804_v49  ;;  %3078 = vmatpush.bf16.msra.mxu1 %v6805_v6 }
 0x63a   :  { %2970 = vmatmul.bf16.vlgmr.msrb.gmra.mxu0 %v2802_v3 }
 0x63b   :  { %3063 = vmatpush.bf16.msra.mxu0 %v6808_v27  ;;  %3089 = vmatpush.bf16.msrb.mxu2 %v6809_v17  ;;  %v6844_v27 = vld [vmem:[#allocation66_spill] sm:$0xff]  ;;  %v6845_v17 = vld [vmem:[#allocation68_spill] sm:$0xff] }
 0x63d   :  { %3053 = vmatpush.bf16.msra.mxu3 %v6810_v26  ;;  %3079 = vmatpush.bf16.msra.mxu1 %v6811_v35  ;;  %v588_v26 = vadd.f32 %v6845_v17, %v6844_v27 }
 0x63f   :  { %3064 = vmatpush.bf16.msra.mxu0 %v6812_v14  ;;  %3090 = vmatpush.bf16.msrb.mxu2 %v6813_v51  ;;  %v6846_v14 = vld [vmem:[#allocation79_spill] sm:$0xff] }
 0x641   :  { %3054 = vmatpush.bf16.msra.mxu3 %v6814_v29  ;;  %3080 = vmatpush.bf16.msra.mxu1 %v6815_v12 }
 0x643   :  { %3065 = vmatpush.bf16.msra.mxu0 %v6816_v37  ;;  %3091 = vmatpush.bf16.msrb.mxu2 %v6817_v25 }
 0x645   :  { %3055 = vmatpush.bf16.msra.mxu3 %v6818_v11  ;;  %3081 = vmatpush.bf16.msra.mxu1 %v6819_v40 }
 0x647   :  { %3066 = vmatpush.bf16.msra.mxu0 %v6820_v33  ;;  %3092 = vmatpush.bf16.msrb.mxu2 %v6821_v38 }
 0x649   :  { %3056 = vmatpush.bf16.msra.mxu3 %v6822_v9  ;;  %3082 = vmatpush.bf16.msra.mxu1 %v6823_v32  ;;  %v6847_v9 = vld [vmem:[#allocation74_spill] sm:$0xff]  ;;  %v6848_v32 = vld [vmem:[#allocation76_spill] sm:$0xff] }
 0x64b   :  { %3067 = vmatpush.bf16.msra.mxu0 %v6824_v21  ;;  %3093 = vmatpush.bf16.msrb.mxu2 %v6825_v61  ;;  %v646_v21 = vadd.f32 %v6848_v32, %v6847_v9 }
 0x64d   :  { %3057 = vmatpush.bf16.msra.mxu3 %v6826_v44  ;;  %3083 = vmatpush.bf16.msra.mxu1 %v6828_v53  ;;  %v6849_v44 = vld [vmem:[#allocation37_spill] sm:$0xff] }
 0x64f   :  { %3068 = vmatpush.bf16.msra.mxu0 %v6829_v57  ;;  %3094 = vmatpush.bf16.msrb.mxu2 %v6830_v31  ;;  %v6850_v57 = vld [vmem:[#allocation81_spill] sm:$0xff] }
 0x651   :  { %3102 = vmatpush.bf16.msrb.mxu3 %v6827_v43 }
 0x653   :  { %3069 = vmatpush.bf16.msra.mxu0 %v6832_v5  ;;  %3095 = vmatpush.bf16.msrb.mxu2 %v6833_v48  ;;  %v6149_v48 = vld [vmem:[%s6213_s8] ss:$0 sm:$0xff] }
 0x655   :  { %3103 = vmatpush.bf16.msrb.mxu3 %v6831_v7 }
 0x657   :  { %3070 = vmatpush.bf16.msra.mxu0 %v6835_v39  ;;  %3096 = vmatpush.bf16.msrb.mxu2 %v6836_v18 }
 0x659   :  { %3104 = vmatpush.bf16.msrb.mxu3 %v6834_v59 }
 0x65d   :  { %3105 = vmatpush.bf16.msrb.mxu3 %v6837_v46 }
 0x661   :  { %3106 = vmatpush.bf16.msrb.mxu3 %v6838_v28 }
 0x665   :  { %3107 = vmatpush.bf16.msrb.mxu3 %v6839_v13 }
 0x669   :  { %3108 = vmatpush.bf16.msrb.mxu3 %v6840_v60 }
 0x66d   :  { %3109 = vmatpush.bf16.msrb.mxu3 %v6841_v63 }
 0x68d   :  { %v2825_v1 = vpop.f32.mrf.mxu1 }
 0x693   :  { %v2798_v45 = vpop.f32.mrf.mxu3 }
 0x694   :  { %v2799_v59 = vadd.f32 %v6149_v48, %v2798_v45 }
 0x695   :  { %v2827_v24 = vpop.f32.mrf.mxu1 }
 0x697   :  { %v2812_v2 = vpop.f32.mrf.mxu0 }
 0x698   :  { %v2813_v56 = vadd.f32 %v2812_v2, %v6842_v10 }
 0x69a   :  { %v2826_v58 = vadd.f32 %v2825_v1, %v2813_v56 }
 0x69b   :  { %v2800_v0 = vpop.f32.mrf.mxu3 }
 0x69c   :  { %v3997_v8 = vmul.f32 -1.442695, %v2826_v58 }
 0x69d   :  { %v2838_v4 = vpop.f32.mrf.mxu2  ;;  %v2877_v41 = vpop.f32.mrf.mxu1 }
 0x69e   :  { %4400 = vpow2.f32 %v3997_v8  ;;  %v2839_v62 = vadd.f32 %v2838_v4, %v6843_v19 }
 0x69f   :  { %v2814_v42 = vpop.f32.mrf.mxu0 }
 0x6a3   :  { %v2851_v30 = vpop.f32.mrf.mxu3 }
 0x6a4   :  { %v4401_v16 = vpop.eup %4400  ;;  %v2852_v34 = vadd.f32 %v2851_v30, %v2839_v62 }
 0x6a5   :  { %v2884_v54 = vadd.f32 1.0, %v4401_v16  ;;  %v2840_v47 = vpop.f32.mrf.mxu2  ;;  %v2879_v52 = vpop.f32.mrf.mxu1 }
 0x6a6   :  { %v3998_v3 = vmul.f32 -1.442695, %v2852_v34 }
 0x6a7   :  { %4402 = vrcp.f32 %v2884_v54  ;;  %v2864_v36 = vpop.f32.mrf.mxu0  ;;  %v2896_v11 = vand.u32 2147483648, %v2884_v54  ;;  %v2894_v33 = vand.u32 2147483647, %v2884_v54  ;;  %vm2890_vm9 = vweird.f32 %v2884_v54 }
 0x6a8   :  { %4404 = vpow2.f32 %v3998_v3  ;;  %v2865_v43 = vadd.f32 %v2864_v36, %v6849_v44 }
 0x6a9   :  { %v2897_v7 = vor.u32 1.1754944e-38, %v2896_v11  ;;  %vm2895_vm11 = vcmp.eq.f32.partialorder %v2894_v33, 8.507059e+37  ;;  %v6851_v33 = vld [vmem:[#allocation110_spill] sm:$0xff] }
 0x6aa   :  { %v2878_v63 = vadd.f32 %v2877_v41, %v2865_v43 }
 0x6ab   :  { %v2853_v49 = vpop.f32.mrf.mxu3 }
 0x6ad   :  { %v4403_v6 = vpop.eup %4402  ;;  %v2945_v15 = vpop.f32.mrf.mxu2 }
 0x6ae   :  { %v4405_v22 = vpop.eup %4404  ;;  %v2886_v35 = vmul.f32 %v4403_v6, %v2884_v54  ;;  %v2946_v51 = vadd.f32 %v2945_v15, %v6846_v14  ;;  %vm2891_vm8 = vweird.f32 %v4403_v6 }
 0x6af   :  { %v2903_v29 = vadd.f32 1.0, %v4405_v22  ;;  %v2866_v12 = vpop.f32.mrf.mxu0  ;;  %vm2892_vm10 = vmor %vm2890_vm9, %vm2891_vm8 }
 0x6b0   :  { %v2887_v37 = vsub.f32 1.0, %v2886_v35  ;;  %v2975_v25 = vadd.f32 %v2946_v51, %v588_v26 }
 0x6b1   :  { %4406 = vrcp.f32 %v2903_v29  ;;  %v2915_v0 = vand.u32 2147483648, %v2903_v29  ;;  %v2913_v45 = vand.u32 2147483647, %v2903_v29  ;;  %vm2909_vm15 = vweird.f32 %v2903_v29 }
 0x6b2   :  { %v2888_v40 = vmul.f32 %v4403_v6, %v2887_v37  ;;  %v3999_v38 = vmul.f32 -1.442695, %v2975_v25 }
 0x6b3   :  { %v2958_v61 = vpop.f32.mrf.mxu3  ;;  %v2916_v30 = vor.u32 1.1754944e-38, %v2915_v0  ;;  %vm2914_vm1 = vcmp.eq.f32.partialorder %v2913_v45, 8.507059e+37 }
 0x6b4   :  { %v2889_v53 = vadd.f32 %v4403_v6, %v2888_v40  ;;  %4408 = vpow2.f32 %v3999_v38  ;;  %v2959_v31 = vadd.f32 %v2958_v61, %v6850_v57  ;;  %v6852_v38 = vld [vmem:[#allocation109_spill] sm:$0xff] }
 0x6b5   :  { %v2947_v5 = vpop.f32.mrf.mxu2  ;;  %v704_v9 = vadd.f32 %v6852_v38, %v6851_v33  ;;  %v4248_v33 = vld [vmem:[#allocation11 + $0x64] sm:$0xf0]  ;;  %v4247_v38 = vld [vmem:[#allocation11 + $0x64] sm:$0xf] }
 0x6b6   :  { %v2893_v39 = vsel %vm2892_vm10, %v4403_v6, %v2889_v53  ;;  %v2976_v18 = vadd.f32 %v2959_v31, %v646_v21 }
 0x6b7   :  { %v4407_v46 = vpop.eup %4406  ;;  %v2898_v28 = vsel %vm2895_vm11, %v2897_v7, %v2893_v39  ;;  %v2971_v13 = vpop.f32.mrf.mxu0 }
 0x6b8   :  { %v2905_v60 = vmul.f32 %v4407_v46, %v2903_v29  ;;  %v2919_v1 = vmul.f32 %v2898_v28, %v2799_v59  ;;  %v4000_v24 = vmul.f32 -1.442695, %v2976_v18  ;;  %vm2910_vm14 = vweird.f32 %v4407_v46 }
 0x6b9   :  { %vm2911_vm0 = vmor %vm2909_vm15, %vm2910_vm14  ;;  %v2972_v11 = vadd.f32 %v2971_v13, %v5242_v20 }
 0x6ba   :  { %v4409_v2 = vpop.eup %4408  ;;  %v2906_v56 = vsub.f32 1.0, %v2905_v60  ;;  %v2920_v58 = vadd.f32 %v2919_v1, %v2878_v63  ;;  %4410 = vpow2.f32 %v4000_v24 }
 0x6bb   :  { %v2980_v8 = vadd.f32 1.0, %v4409_v2  ;;  %v2960_v4 = vpop.f32.mrf.mxu3  ;;  %v4234_v2 = vld [vmem:[#allocation9 + $0x38] sm:$0xff] }
 0x6bc   :  { %v2907_v42 = vmul.f32 %v4407_v46, %v2906_v56  ;;  %4412 = vtanh.f32 %v2920_v58  ;;  %3236 = vmatpush.bf16.msrb.mxu0 %v4234_v2  ;;  %v4233_v58 = vld [vmem:[#allocation9 + $0x30] sm:$0xff]  ;;  %v4232_v4 = vld [vmem:[#allocation9 + $0x28] sm:$0xff] }
 0x6bd   :  { %4414 = vrcp.f32 %v2980_v8  ;;  %v2992_v17 = vand.u32 2147483648, %v2980_v8  ;;  %v2990_v35 = vand.u32 2147483647, %v2980_v8  ;;  %vm2986_vm13 = vweird.f32 %v2980_v8  ;;  %v4244_v2 = vld [vmem:[#allocation11 + $0x44] sm:$0xf0] }
 0x6be   :  { %v2908_v62 = vadd.f32 %v4407_v46, %v2907_v42 }
 0x6bf   :  { %v2973_v16 = vpop.f32.mrf.mxu0  ;;  %v2993_v37 = vor.u32 1.1754944e-38, %v2992_v17  ;;  %vm2991_vm3 = vcmp.eq.f32.partialorder %v2990_v35, 8.507059e+37 }
 0x6c0   :  { %v4411_v41 = vpop.eup %4410  ;;  %v2912_v34 = vsel %vm2911_vm0, %v4407_v46, %v2908_v62  ;;  %3237 = vmatpush.bf16.msrb.mxu0 %v4233_v58  ;;  %v4231_v16 = vld [vmem:[#allocation9 + $0x20] sm:$0xff] }
 0x6c1   :  { %v2917_v54 = vsel %vm2914_vm1, %v2916_v30, %v2912_v34  ;;  %v2999_v47 = vadd.f32 1.0, %v4411_v41  ;;  %v4243_v58 = vld [vmem:[#allocation11 + $0x44] sm:$0xf] }
 0x6c2   :  { %v4413_v52 = vpop.eup %4412  ;;  %v2922_v3 = vsub.f32 1.0, %v2917_v54  ;;  %v2924_v6 = vmul.f32 %v2917_v54, %v6055_v23 }
 0x6c3   :  { %v4415_v36 = vpop.eup %4414  ;;  %4416 = vrcp.f32 %v2999_v47  ;;  %v3011_v61 = vand.u32 2147483648, %v2999_v47  ;;  %v3009_v53 = vand.u32 2147483647, %v2999_v47  ;;  %vm3005_vm5 = vweird.f32 %v2999_v47 }
 0x6c4   :  { %v2923_v49 = vmul.f32 %v4413_v52, %v2922_v3  ;;  %v2982_v15 = vmul.f32 %v4415_v36, %v2980_v8  ;;  %vm2987_vm12 = vweird.f32 %v4415_v36  ;;  %3238 = vmatpush.bf16.msrb.mxu0 %v4232_v4  ;;  %v4230_v52 = vld [vmem:[#allocation9 + $0x18] sm:$0xff] }
 0x6c5   :  { %vm2988_vm2 = vmor %vm2986_vm13, %vm2987_vm12  ;;  %v3012_v7 = vor.u32 1.1754944e-38, %v3011_v61  ;;  %vm3010_vm7 = vcmp.eq.f32.partialorder %v3009_v53, 8.507059e+37  ;;  %v6174_v61 = vpop.permute.xlu2 %1525 }
 0x6c6   :  { %v6153_v22 = vadd.f32 %v2924_v6, %v2923_v49  ;;  %v2983_v27 = vsub.f32 1.0, %v2982_v15  ;;  %v4229_v6 = vld [vmem:[#allocation9 + $0x10] sm:$0xff]  ;;  %v4228_v15 = vld [vmem:[#allocation9 + $0x8] sm:$0xff]  ;;  %vm1527_vm12 = vcmp.eq.s32.totalorder %v6174_v61, 1 }
 0x6c8   :  { %v2984_v26 = vmul.f32 %v4415_v36, %v2983_v27  ;;  %v3022_v14 = vpack.c.bf16 %v6153_v22, %v6153_v22  ;;  %3239 = vmatpush.bf16.msrb.mxu0 %v4231_v16 }
 0x6c9   :  { %v4417_v51 = vpop.eup %4416 }
 0x6ca   :  { %v3001_v29 = vmul.f32 %v4417_v51, %v2999_v47  ;;  %v2985_v12 = vadd.f32 %v4415_v36, %v2984_v26  ;;  %3031 = vmatmul.bf16.vlgmr.msrb.gmra.mxu1 %v3022_v14  ;;  %3058 = vmatmul.bf16.vlgmr.msra.gmra.mxu3 %v3022_v14  ;;  %vm3006_vm4 = vweird.f32 %v4417_v51 }
 0x6cb   :  { %vm3007_vm6 = vmor %vm3005_vm5, %vm3006_vm4 }
 0x6cc   :  { %v3002_v25 = vsub.f32 1.0, %v3001_v29  ;;  %v2989_v40 = vsel %vm2988_vm2, %v4415_v36, %v2985_v12  ;;  %3240 = vmatpush.bf16.msrb.mxu0 %v4230_v52  ;;  %v4241_v52 = vld [vmem:[#allocation11 + $0x34] sm:$0xf] }
 0x6cd   :  { %v2994_v32 = vsel %vm2991_vm3, %v2993_v37, %v2989_v40  ;;  %v4249_v37 = vld [vmem:[#allocation11 + $0x74] sm:$0xf] }
 0x6ce   :  { %v3003_v21 = vmul.f32 %v4417_v51, %v3002_v25  ;;  %v3015_v43 = vmul.f32 %v2994_v32, %v2972_v11  ;;  %v4095_v25 = vld [vmem:[#allocation11 + $0x78] sm:$0xf0]  ;;  %v4085_v11 = vld [vmem:[#allocation11 + $0x60] sm:$0xf] }
 0x6cf   :  { %v4098_v40 = vor.u32 %v4249_v37, %v4095_v25 }
 0x6d0   :  { %v3004_v57 = vadd.f32 %v4417_v51, %v3003_v21  ;;  %v3016_v31 = vadd.f32 %v3015_v43, %v704_v9  ;;  %3241 = vmatpush.bf16.msrb.mxu0 %v4229_v6  ;;  %v4087_v9 = vld [vmem:[#allocation11 + $0x68] sm:$0xf0]  ;;  %v4086_v21 = vor.u32 %v4248_v33, %v4085_v11  ;;  %v6853_v11 = vld [vmem:[#allocation35_spill] sm:$0xff] }
 0x6d1   :  { %v4090_v53 = vor.u32 %v4247_v38, %v4087_v9  ;;  %v6854_v38 = vld [vmem:[#allocation36_spill] sm:$0xff] }
 0x6d2   :  { %v3008_v5 = vsel %vm3007_vm6, %v4417_v51, %v3004_v57  ;;  %4418 = vtanh.f32 %v3016_v31  ;;  %v4250_v51 = vld [vmem:[#allocation11 + $0x74] sm:$0xf0]  ;;  %v4077_v57 = vld [vmem:[#allocation11 + $0x50] sm:$0xf] }
 0x6d3   :  { %v3013_v20 = vsel %vm3010_vm7, %v3012_v7, %v3008_v5  ;;  %v4246_v31 = vld [vmem:[#allocation11 + $0x54] sm:$0xf0]  ;;  %v6176_v7 = vpop.permute.xlu0 %1759 }
 0x6d4   :  { %v3018_v59 = vsub.f32 1.0, %v3013_v20  ;;  %v3020_v46 = vmul.f32 %v3013_v20, %v6065_v50  ;;  %3242 = vmatpush.bf16.msrb.mxu0 %v4228_v15  ;;  %vm1761_vm13 = vcmp.eq.s32.totalorder %v6176_v7, 1 }
 0x6d8   :  { %v4419_v39 = vpop.eup %4418 }
 0x6d9   :  { %v3019_v18 = vmul.f32 %v4419_v39, %v3018_v59  ;;  %v4245_v59 = vld [vmem:[#allocation11 + $0x54] sm:$0xf]  ;;  %v4079_v39 = vld [vmem:[#allocation11 + $0x58] sm:$0xf0] }
 0x6da   :  { %3084 = vmatmul.bf16.vlgmr.msra.gmra.mxu1 %v3022_v14  ;;  %3110 = vmatmul.bf16.vlgmr.msrb.gmra.mxu3 %v3022_v14  ;;  %v4093_v14 = vld [vmem:[#allocation11 + $0x70] sm:$0xf] }
 0x6db   :  { %v3021_v28 = vadd.f32 %v3020_v46, %v3019_v18  ;;  %v4094_v12 = vor.u32 %v4250_v51, %v4093_v14  ;;  %v4240_v14 = vld [vmem:[#allocation11 + $0x24] sm:$0xf0] }
 0x6dd   :  { %v3036_v13 = vpack.c.bf16 %v3021_v28, %v3021_v28  ;;  %3347 = vmatpush.bf16.msrb.mxu1 %v4094_v12  ;;  %v4078_v28 = vor.u32 %v4246_v31, %v4077_v57  ;;  %v4055_v12 = vld [vmem:[#allocation11 + $0x28] sm:$0xf0]  ;;  %v6856_v31 = vld [vmem:[#allocation85_spill] sm:$0xff] }
 0x6df   :  { %3045 = vmatmul.bf16.vlgmr.msra.gmra.mxu2 %v3036_v13  ;;  %3071 = vmatmul.bf16.vlgmr.msra.gmra.mxu0 %v3036_v13 }
 0x6e0   :  { %3360 = vmatpush.bf16.msra.mxu2 %v4098_v40  ;;  %v1528_v40 = vsel %vm1527_vm12, %v6853_v11, 0.0 }
 0x6e1   :  { %3348 = vmatpush.bf16.msrb.mxu1 %v4086_v21 }
 0x6e4   :  { %3361 = vmatpush.bf16.msra.mxu2 %v4090_v53 }
 0x6e5   :  { %3349 = vmatpush.bf16.msrb.mxu1 %v4078_v28 }
 0x6ef   :  { %3097 = vmatmul.bf16.vlgmr.msrb.gmra.mxu2 %v3036_v13 }
 0x747   :  { %v6161_v60 = vpop.f32.mrf.mxu1 }
 0x74d   :  { %v3059_v63 = vpop.f32.mrf.mxu3 }
 0x74f   :  { %v3034_v1 = vpop.f32.mrf.mxu1 }
 0x750   :  { %v4082_v1 = vor.u32 %v4245_v59, %v4079_v39 }
 0x752   :  { %3362 = vmatpush.bf16.msra.mxu2 %v4082_v1  ;;  %v4237_v1 = vld [vmem:[#allocation11 + $0x14] sm:$0xf] }
 0x755   :  { %v3061_v24 = vpop.f32.mrf.mxu3 }
 0x756   :  { %v4069_v24 = vld [vmem:[#allocation11 + $0x40] sm:$0xf] }
 0x757   :  { %v3085_v56 = vpop.f32.mrf.mxu1 }
 0x75c   :  { %v3072_v0 = vpop.f32.mrf.mxu0 }
 0x75d   :  { %v3073_v50 = vadd.f32 %v3072_v0, %v6843_v19  ;;  %v6164_v8 = vpop.f32.mrf.mxu3  ;;  %v4071_v0 = vld [vmem:[#allocation11 + $0x48] sm:$0xf0] }
 0x75e   :  { %v4074_v16 = vor.u32 %v4243_v58, %v4071_v0  ;;  %v4037_v58 = vld [vmem:[#allocation11] sm:$0xf]  ;;  %v4235_v0 = vld [vmem:[#allocation11 + $0x4] sm:$0xf] }
 0x75f   :  { %v3086_v42 = vadd.f32 %v3085_v56, %v3073_v50  ;;  %v3087_v45 = vpop.f32.mrf.mxu1 }
 0x760   :  { %v4070_v45 = vor.u32 %v4244_v2, %v4069_v24  ;;  %3363 = vmatpush.bf16.msra.mxu2 %v4074_v16  ;;  %v4047_v2 = vld [vmem:[#allocation11 + $0x18] sm:$0xf0] }
 0x761   :  { %v4002_v62 = vmul.f32 -1.442695, %v3086_v42 }
 0x762   :  { %v3046_v30 = vpop.f32.mrf.mxu2  ;;  %3350 = vmatpush.bf16.msrb.mxu1 %v4070_v45 }
 0x763   :  { %4420 = vpow2.f32 %v4002_v62  ;;  %v3047_v41 = vadd.f32 %v3046_v30, %v6842_v10  ;;  %v4227_v10 = vld [vmem:[#allocation9] sm:$0xff]  ;;  %v3033_v62 = vadd.f32 %v6149_v48, %v6161_v60  ;;  %v2462_v60 = vpop.permute.xlu0 %2461 }
 0x764   :  { %v3074_v34 = vpop.f32.mrf.mxu0  ;;  %3243 = vmatpush.bf16.msrb.mxu0 %v4227_v10  ;;  %vm2463_vm4 = vcmp.eq.s32.totalorder %v2462_v60, 1 }
 0x765   :  { %v3060_v54 = vadd.f32 %v3059_v63, %v3047_v41  ;;  %v3113_v47 = vpop.f32.mrf.mxu3  ;;  %v4061_v41 = vld [vmem:[#allocation11 + $0x30] sm:$0xf]  ;;  %v4242_v34 = vld [vmem:[#allocation11 + $0x34] sm:$0xf0] }
 0x767   :  { %v4001_v3 = vmul.f32 -1.442695, %v3060_v54  ;;  %v1994_v54 = vpop.permute.xlu1 %1993 }
 0x768   :  { %vm1995_vm2 = vcmp.eq.s32.totalorder %v1994_v54, 1 }
 0x769   :  { %v4421_v19 = vpop.eup %4420  ;;  %4422 = vpow2.f32 %v4001_v3  ;;  %v4063_v3 = vld [vmem:[#allocation11 + $0x38] sm:$0xf0] }
 0x76a   :  { %v6167_v36 = vadd.f32 1.0, %v4421_v19  ;;  %v3048_v49 = vpop.f32.mrf.mxu2  ;;  %v2228_v19 = vpop.permute.xlu2 %2227  ;;  %v4066_v10 = vor.u32 %v4241_v52, %v4063_v3 }
 0x76b   :  { %vm2229_vm3 = vcmp.eq.s32.totalorder %v2228_v19, 1  ;;  %v3164_v57 = vpop.permute.xlu0 %3163 }
 0x76c   :  { %4424 = vrcp.f32 %v6167_v36  ;;  %v3149_v49 = vand.u32 2147483648, %v6167_v36  ;;  %vm3143_vm15 = vweird.f32 %v6167_v36  ;;  %v3147_v15 = vand.u32 2147483647, %v6167_v36  ;;  %3364 = vmatpush.bf16.msra.mxu2 %v4066_v10 }
 0x76d   :  { %vm3165_vm7 = vcmp.eq.s32.totalorder %v3164_v57, 1 }
 0x76e   :  { %v3150_v37 = vor.u32 1.1754944e-38, %v3149_v49  ;;  %vm3148_vm1 = vcmp.eq.f32.partialorder %v3147_v15, 8.507059e+37 }
 0x76f   :  { %v4423_v27 = vpop.eup %4422  ;;  %v2696_v33 = vpop.permute.xlu1 %2695 }
 0x770   :  { %v3118_v17 = vadd.f32 1.0, %v4423_v27  ;;  %v4062_v27 = vor.u32 %v4242_v34, %v4061_v41  ;;  %vm2697_vm5 = vcmp.eq.s32.totalorder %v2696_v33, 1 }
 0x772   :  { %4426 = vrcp.f32 %v3118_v17  ;;  %v3098_v26 = vpop.f32.mrf.mxu2  ;;  %v6170_v35 = vpop.eup %4424  ;;  %v3130_v46 = vand.u32 2147483648, %v3118_v17  ;;  %v3128_v63 = vand.u32 2147483647, %v3118_v17  ;;  %vm3124_vm9 = vweird.f32 %v3118_v17  ;;  %3351 = vmatpush.bf16.msrb.mxu1 %v4062_v27 }
 0x773   :  { %v3139_v29 = vmul.f32 %v6170_v35, %v6167_v36  ;;  %v3099_v50 = vadd.f32 %v3098_v26, %v6849_v44  ;;  %vm3144_vm14 = vweird.f32 %v6170_v35  ;;  %v4053_v26 = vld [vmem:[#allocation11 + $0x20] sm:$0xf]  ;;  %v2930_v21 = vpop.permute.xlu2 %2929 }
 0x774   :  { %v3131_v42 = vor.u32 1.1754944e-38, %v3130_v46  ;;  %vm3129_vm11 = vcmp.eq.f32.partialorder %v3128_v63, 8.507059e+37  ;;  %vm3145_vm0 = vmor %vm3143_vm15, %vm3144_vm14  ;;  %vm2931_vm6 = vcmp.eq.s32.totalorder %v2930_v21, 1  ;;  %v4238_v63 = vld [vmem:[#allocation11 + $0x14] sm:$0xf0] }
 0x775   :  { %v3140_v5 = vsub.f32 1.0, %v3139_v29  ;;  %v3112_v6 = vadd.f32 %v6164_v8, %v3099_v50  ;;  %v4239_v29 = vld [vmem:[#allocation11 + $0x24] sm:$0xf]  ;;  %v4054_v8 = vor.u32 %v4240_v14, %v4053_v26 }
 0x776   :  { %v4058_v36 = vor.u32 %v4239_v29, %v4055_v12 }
 0x777   :  { %v3141_v56 = vmul.f32 %v6170_v35, %v3140_v5  ;;  %3352 = vmatpush.bf16.msrb.mxu1 %v4054_v8 }
 0x778   :  { %v4427_v32 = vpop.eup %4426  ;;  %3365 = vmatpush.bf16.msra.mxu2 %v4058_v36 }
 0x779   :  { %v3120_v43 = vmul.f32 %v4427_v32, %v3118_v17  ;;  %vm3125_vm8 = vweird.f32 %v4427_v32  ;;  %v3142_v44 = vadd.f32 %v6170_v35, %v3141_v56  ;;  %v4050_v56 = vor.u32 %v4237_v1, %v4047_v2 }
 0x77a   :  { %v3100_v20 = vpop.f32.mrf.mxu2  ;;  %vm3126_vm10 = vmor %vm3124_vm9, %vm3125_vm8 }
 0x77b   :  { %v3121_v18 = vsub.f32 1.0, %v3120_v43  ;;  %v3146_v51 = vsel %vm3145_vm0, %v6170_v35, %v3142_v44  ;;  %v1762_v35 = vsel %vm1761_vm13, %v6854_v38, %v1528_v40  ;;  %v6855_v43 = vld [vmem:[#allocation19_spill] sm:$0xff] }
 0x77c   :  { %v3151_v25 = vsel %vm3148_vm1, %v3150_v37, %v3146_v51  ;;  %v1996_v53 = vsel %vm1995_vm2, %v6855_v43, %v1762_v35  ;;  %3366 = vmatpush.bf16.msra.mxu2 %v4050_v56 }
 0x77d   :  { %v3122_v13 = vmul.f32 %v4427_v32, %v3121_v18  ;;  %v3156_v9 = vsub.f32 1.0, %v3151_v25  ;;  %v2230_v61 = vsel %vm2229_vm3, %v6856_v31, %v1996_v53  ;;  %v3158_v7 = vmul.f32 %v3151_v25, %v6153_v22 }
 0x77e   :  { %v2464_v20 = vsel %vm2463_vm4, %v5926_v55, %v2230_v61  ;;  %v4236_v55 = vld [vmem:[#allocation11 + $0x4] sm:$0xf0] }
 0x77f   :  { %v3123_v4 = vadd.f32 %v4427_v32, %v3122_v13  ;;  %v2698_v39 = vsel %vm2697_vm5, %v6055_v23, %v2464_v20  ;;  %v4045_v13 = vld [vmem:[#allocation11 + $0x10] sm:$0xf]  ;;  %v4038_v50 = vor.u32 %v4236_v55, %v4037_v58 }
 0x780   :  { %v2932_v18 = vsel %vm2931_vm6, %v6153_v22, %v2698_v39  ;;  %v4046_v24 = vor.u32 %v4238_v63, %v4045_v13  ;;  %v4269_v22 = vld [vmem:[%s6215_s10] ss:$0 sm:$0xff] }
 0x781   :  { %v3127_v30 = vsel %vm3126_vm10, %v4427_v32, %v3123_v4  ;;  %v4039_v4 = vld [vmem:[#allocation11 + $0x8] sm:$0xf0] }
 0x782   :  { %v3132_v47 = vsel %vm3129_vm11, %v3131_v42, %v3127_v30  ;;  %3353 = vmatpush.bf16.msrb.mxu1 %v4046_v24  ;;  %v4042_v23 = vor.u32 %v4235_v0, %v4039_v4 }
 0x783   :  { %v3153_v48 = vmul.f32 %v3132_v47, %v3033_v62 }
 0x784   :  { %3367 = vmatpush.bf16.msra.mxu2 %v4042_v23 }
 0x785   :  { %v3154_v17 = vadd.f32 %v3153_v48, %v3112_v6 }
 0x786   :  { %3354 = vmatpush.bf16.msrb.mxu1 %v4038_v50 }
 0x787   :  { %4428 = vtanh.f32 %v3154_v17 }
 0x78d   :  { %v4429_v32 = vpop.eup %4428 }
 0x78e   :  { %v3157_v5 = vmul.f32 %v4429_v32, %v3156_v9 }
 0x790   :  { %v3159_v59 = vadd.f32 %v3158_v7, %v3157_v5 }
 0x792   :  { %v3166_v46 = vsel %vm3165_vm7, %v3159_v59, %v2932_v18 }
 0x793   :  { %v3167_v28 = vpack.c.bf16 %v3166_v46, %v3166_v46 }
 0x795   :  { %3244 = vmatmul.bf16.vlgmr.msrb.gmra.mxu0 %v3167_v28 }
 0x812   :  { %v3245_v42 = vpop.f32.mrf.mxu0 }
 0x813   :  { %v3246_v45 = vadd.f32 %v4269_v22, %v3245_v42 }
 0x815   :  { %v3249_v62 = vmax.f32 %v3246_v45, 0.0 }
 0x817   :  { %v3250_v30 = vpack.c.bf16 %v3249_v62, %v3249_v62 }
 0x819   :  { %3355 = vmatmul.bf16.vlgmr.msrb.gmra.mxu1 %v3250_v30  ;;  %3368 = vmatmul.bf16.vlgmr.msra.gmra.mxu2 %v3250_v30 }
 0x81a   :  { %v3247_v16 = vpop.f32.mrf.mxu0 }
 0x896   :  { %v3356_v41 = vpop.f32.mrf.mxu1 }
 0x897   :  { %3373 = vst [vmem:[#allocation12] sm:$0xff] %v3356_v41 }
 0x89c   :  { %v3369_v34 = vpop.f32.mrf.mxu2 }
 0x89d   :  { %3374 = vst [vmem:[#allocation12 + $0x8] sm:$0xff] %v3369_v34 }
 0x89e   :  { %v3358_v54 = vpop.f32.mrf.mxu1  ;;  %3385 = dma.vmem_to_hbm [thread:$0]  %s3381_s13, 256, %s3383_s11, [#allocation5]  }
 0x8a4   :  { %v3371_v47 = vpop.f32.mrf.mxu2 }
 0x8a5   :  { %4598 = dma.done.wait [#allocation5], 256  }
 0x8a6   :  { %4599 = vsyncadd [#allocation5], 4294967040 }
 0x8a7   :  { %3390 = vsyncpa [#allocation4], 1 }
 0x8a8   :  { %3391 = vsyncpa [#allocation7], 1 }
 0x8a9   :  { %3392 = vsyncpa [#allocation10], 1 }
 0x8aa   :  { %3393 = vsyncpa [#allocation5], 1 }

</bundles_post_ra>
